<compile_context>
chip_gen: v7x
topology: tpu7x:2x2x1
jax: 0.10.0
libtpu: 0.0.40
codegen_flags: <defaults>
</compile_context>

<pallas_src>
import jax
import jax.numpy as jnp
from jax.experimental import pallas as pl
from jax.experimental.pallas import tpu as pltpu

# ---- small, self-consistent hyperparameters (see note above) ----------------
N_MELS = 8
N_FRAMES = 32      # == D_MODEL == N_PATCHES (required by the reference module)
N_PATCHES = 32
D_MODEL = 32
N_HEADS = 4
N_LAYERS = 2
D_FF = 64
D_PROJ = 16
BATCH = 2
LN_EPS = 1e-5

E = N_FRAMES                 # transformer embedding dim
N = D_MODEL                  # transformer "batch" dim (batch_first=False semantics)
S = BATCH                    # transformer sequence length
HD = E // N_HEADS            # head dim
SN = S * N                   # packed activation rows

# ---- globals slab layout: (G_ROWS, 32) f32 ----------------------------------
G_CONV = 0                   # rows   0..63 : block-diag conv weight (SN, S*N_MELS) padded
G_BIASPOS = SN               # rows  64..127: conv_b + pos, tiled over the batch (SN, E)
G_SEG = 2 * SN               # rows 128..159: block-diagonal head-segment mask (E, E)
G_PROJW = G_SEG + E          # rows 160..191: proj weight (E, D_PROJ) padded
G_GF = G_PROJW + E           # row  192     : final LN gamma
G_BF = G_GF + 1              # row  193     : final LN beta
G_PROJB = G_BF + 1           # row  194     : proj bias (D_PROJ) padded
G_ROWS = 200
G_COLS = E

# ---- per-layer slab layout: (L_ROWS, 96) f32, stacked as (N_LAYERS, ...) ----
L_WQKV = 0                   # rows   0..31 : fused [wq|wk|wv] (E, 3E), scale folded in
L_W1 = E                     # rows  32..63 : w1 (E, D_FF) padded
L_WOUT = 2 * E               # rows  64..95 : w_out (E, E) padded
L_W2 = 3 * E                 # rows  96..159: w2 (D_FF, E) padded
L_BQKV = L_W2 + D_FF         # row  160     : fused [bq|bk|bv] (3E), scale folded in
L_BOUT = L_BQKV + 1          # row  161
L_B1 = L_BOUT + 1            # row  162
L_B2 = L_B1 + 1              # row  163
L_G1 = L_B2 + 1              # row  164
L_BE1 = L_G1 + 1             # row  165
L_G2 = L_BE1 + 1             # row  166
L_BE2 = L_G2 + 1             # row  167
L_ROWS = 168
L_COLS = 3 * E               # 96


def _ln(v, g, b):
    mu = jnp.mean(v, axis=-1, keepdims=True)
    vc = v - mu
    var = jnp.mean(vc * vc, axis=-1, keepdims=True)
    return vc * jax.lax.rsqrt(var + LN_EPS) * g + b


# -----------------------------------------------------------------------------
# Single fused Pallas kernel: conv -> +pos -> N transformer layers -> LN -> proj
# -----------------------------------------------------------------------------
def _encoder_kernel(x_ref, g_ref, l_ref, o_ref, h_ref):
    # ---- spec conv as one block-diagonal matmul, fused (conv_b + pos) add ----
    conv_bd = g_ref[G_CONV:G_CONV + SN, 0:S * N_MELS]            # (64, 16)
    bias_pos = g_ref[G_BIASPOS:G_BIASPOS + SN, :]                # (64, 32)
    h_ref[...] = (jnp.dot(conv_bd, x_ref[...],
                          preferred_element_type=jnp.float32) + bias_pos)

    # Block-diagonal head-segment mask: seg[e', e] = 1 iff head(e') == head(e).
    seg = g_ref[G_SEG:G_SEG + E, :]                              # (32, 32)

    for l in range(N_LAYERS):
        w_qkv = l_ref[l, L_WQKV:L_WQKV + E, :]                   # (32, 96)
        b_qkv = l_ref[l, L_BQKV:L_BQKV + 1, :]                   # (1, 96)
        w_out = l_ref[l, L_WOUT:L_WOUT + E, 0:E]
        b_out = l_ref[l, L_BOUT:L_BOUT + 1, 0:E]
        w1 = l_ref[l, L_W1:L_W1 + E, 0:D_FF]
        b1 = l_ref[l, L_B1:L_B1 + 1, 0:D_FF]
        w2 = l_ref[l, L_W2:L_W2 + D_FF, 0:E]
        b2 = l_ref[l, L_B2:L_B2 + 1, 0:E]
        g1 = l_ref[l, L_G1:L_G1 + 1, 0:E]
        be1 = l_ref[l, L_BE1:L_BE1 + 1, 0:E]
        g2 = l_ref[l, L_G2:L_G2 + 1, 0:E]
        be2 = l_ref[l, L_BE2:L_BE2 + 1, 0:E]

        h = h_ref[...]                                           # (64, 32)

        # ---- self attention over the length-S (= original audio batch) axis ----
        # Fused QKV projection: one MXU push with 96 output lanes.
        qkv = jnp.dot(h, w_qkv, preferred_element_type=jnp.float32) + b_qkv
        q = qkv[:, 0:E]                                          # scale already folded in
        k = qkv[:, E:2 * E]
        v = qkv[:, 2 * E:3 * E]

        # "Other sequence position" via an XLU half-roll on the sublane axis
        # (swaps the two length-N blocks; no concatenate, no relayout).
        k_sw = pltpu.roll(k, N, axis=0)
        v_sw = pltpu.roll(v, N, axis=0)

        # Per-head q.k scores broadcast across each head's lane segment,
        # both sequence positions as two M=64 MXU pushes.
        s_same = jnp.dot(q * k, seg, preferred_element_type=jnp.float32)
        s_cross = jnp.dot(q * k_sw, seg, preferred_element_type=jnp.float32)

        # Softmax over the 2 key positions (max-subtracted, EUP reciprocal).
        m = jnp.maximum(s_same, s_cross)
        e_same = jnp.exp(s_same - m)
        e_cross = jnp.exp(s_cross - m)
        r = pl.reciprocal(e_same + e_cross, approx=True)
        att = (e_same * r) * v + (e_cross * r) * v_sw            # (64, 32)

        sa = jnp.dot(att, w_out, preferred_element_type=jnp.float32) + b_out
        h = _ln(h + sa, g1, be1)                                 # norm1(x + sa)
        h_ref[...] = h

        # ---- feed forward ----
        f = jnp.maximum(jnp.dot(h, w1, preferred_element_type=jnp.float32) + b1, 0.0)
        f = jnp.dot(f, w2, preferred_element_type=jnp.float32) + b2
        h_ref[...] = _ln(h + f, g2, be2)                         # norm2(x + ff)

    # ---- final LayerNorm + projection ----
    gf = g_ref[G_GF:G_GF + 1, :]
    bf = g_ref[G_BF:G_BF + 1, :]
    proj_w = g_ref[G_PROJW:G_PROJW + E, 0:D_PROJ]
    proj_b = g_ref[G_PROJB:G_PROJB + 1, 0:D_PROJ]
    h = _ln(h_ref[...], gf, bf)
    out = jnp.dot(h, proj_w, preferred_element_type=jnp.float32) + proj_b
    o_ref[...] = out.astype(o_ref.dtype)
    # TODO(synk): the (64, 16) output store uses 16/128 lanes; pad to a lane-dense
    # 128-wide slab if this ever matters at real sizes.


# -----------------------------------------------------------------------------
# Parameters (deterministic synthetic init), packing, and forward wrapper
# -----------------------------------------------------------------------------
def init_params(key):
    ks = iter(jax.random.split(key, 64))

    def nxt(shape, scale=0.02):
        return scale * jax.random.normal(next(ks), shape, dtype=jnp.float32)

    params = {
        # PyTorch Conv2d weight is (d_model, 1, n_mels, 1) -> squeezed (d_model, n_mels).
        "conv_w": nxt((D_MODEL, N_MELS)),
        "conv_b": nxt((D_MODEL, 1)),
        "pos": nxt((N_PATCHES, D_MODEL)),
        "gf": jnp.ones((1, E), jnp.float32),
        "bf": jnp.zeros((1, E), jnp.float32),
        "proj_w": nxt((E, D_PROJ)),
        "proj_b": nxt((1, D_PROJ)),
        "layers": [],
    }
    for _ in range(N_LAYERS):
        # NOTE: Q/K/V weights stored transposed (E, E); real torch in_proj must be split
        # row-wise and transposed to load here.
        params["layers"].append({
            "wq": nxt((E, E)), "bq": nxt((1, E)),
            "wk": nxt((E, E)), "bk": nxt((1, E)),
            "wv": nxt((E, E)), "bv": nxt((1, E)),
            "w_out": nxt((E, E)), "b_out": nxt((1, E)),
            "w1": nxt((E, D_FF)), "b1": nxt((1, D_FF)),
            "w2": nxt((D_FF, E)), "b2": nxt((1, E)),
            "g1": jnp.ones((1, E), jnp.float32), "be1": jnp.zeros((1, E), jnp.float32),
            "g2": jnp.ones((1, E), jnp.float32), "be2": jnp.zeros((1, E), jnp.float32),
        })
    return params


def _pad_to(a, rows, cols):
    return jnp.pad(a, ((0, rows - a.shape[0]), (0, cols - a.shape[1])))


def pack_params(params):
    """One-time host-side packing into (globals_slab, layers_slab)."""
    scale = 1.0 / float(HD) ** 0.5

    # Block-diagonal conv weight over the batch dim: one MXU op in-kernel.
    conv_bd = jnp.zeros((SN, S * N_MELS), jnp.float32)
    for b in range(S):
        conv_bd = conv_bd.at[b * N:(b + 1) * N,
                             b * N_MELS:(b + 1) * N_MELS].set(params["conv_w"])
    bias_pos = jnp.tile(params["conv_b"] + params["pos"], (S, 1))          # (SN, E)

    rh = jnp.arange(E)[:, None] // HD
    ch = jnp.arange(E)[None, :] // HD
    seg = (rh == ch).astype(jnp.float32)                                   # (E, E)

    glob = jnp.concatenate([
        _pad_to(conv_bd, SN, G_COLS),
        bias_pos,
        seg,
        _pad_to(params["proj_w"], E, G_COLS),
        params["gf"],
        params["bf"],
        _pad_to(params["proj_b"], 1, G_COLS),
    ], axis=0)
    glob = _pad_to(glob, G_ROWS, G_COLS)

    layer_slabs = []
    for lp in params["layers"]:
        # Fold the attention scale into wq / bq (exact), fuse QKV weights/biases.
        w_qkv = jnp.concatenate([lp["wq"] * scale, lp["wk"], lp["wv"]], axis=1)  # (E, 3E)
        b_qkv = jnp.concatenate([lp["bq"] * scale, lp["bk"], lp["bv"]], axis=1)  # (1, 3E)
        slab = jnp.concatenate([
            w_qkv,
            _pad_to(lp["w1"], E, L_COLS),
            _pad_to(lp["w_out"], E, L_COLS),
            _pad_to(lp["w2"], D_FF, L_COLS),
            b_qkv,
            _pad_to(lp["b_out"], 1, L_COLS),
            _pad_to(lp["b1"], 1, L_COLS),
            _pad_to(lp["b2"], 1, L_COLS),
            _pad_to(lp["g1"], 1, L_COLS),
            _pad_to(lp["be1"], 1, L_COLS),
            _pad_to(lp["g2"], 1, L_COLS),
            _pad_to(lp["be2"], 1, L_COLS),
        ], axis=0)
        layer_slabs.append(_pad_to(slab, L_ROWS, L_COLS))
    layers = jnp.stack(layer_slabs, axis=0)                                # (N_LAYERS, 168, 96)
    return glob, layers


def audio_encoder_forward(packed, x):
    """packed = pack_params(params); x: (B, 1, n_mels, n_frames) -> (B, d_model, d_proj)."""
    glob, layers = packed
    # Free reshape: merges leading dims only (no transpose, no copy).
    x2d = x.reshape(S * N_MELS, N_FRAMES)
    out2d = pl.pallas_call(
        _encoder_kernel,
        out_shape=jax.ShapeDtypeStruct((SN, D_PROJ), jnp.float32),
        scratch_shapes=[pltpu.VMEM((SN, E), jnp.float32)],
    )(x2d, glob, layers)
    # Free reshape: splits the leading dim only.
    return out2d.reshape(BATCH, D_MODEL, D_PROJ)


# -----------------------------------------------------------------------------
# Pure-JAX reference (same semantics) for a sanity check
# -----------------------------------------------------------------------------
def reference_forward(params, x):
    h = jnp.einsum("dm,bmf->bdf", params["conv_w"], x[:, 0])
    h = h + params["conv_b"][None, :, :] + params["pos"][None, :, :]
    scale = 1.0 / float(HD) ** 0.5

    def ln(v, g, b):
        mu = v.mean(-1, keepdims=True)
        var = ((v - mu) ** 2).mean(-1, keepdims=True)
        return (v - mu) / jnp.sqrt(var + LN_EPS) * g + b

    for lp in params["layers"]:
        q = jnp.einsum("sne,ef->snf", h, lp["wq"]) + lp["bq"][0]
        k = jnp.einsum("sne,ef->snf", h, lp["wk"]) + lp["bk"][0]
        v = jnp.einsum("sne,ef->snf", h, lp["wv"]) + lp["bv"][0]

        def split(t):
            return t.reshape(S, N, N_HEADS, HD)

        qh, kh, vh = split(q) * scale, split(k), split(v)
        sc = jnp.einsum("snhd,tnhd->nhst", qh, kh)
        p = jax.nn.softmax(sc, axis=-1)
        att = jnp.einsum("nhst,tnhd->snhd", p, vh).reshape(S, N, E)
        sa = jnp.einsum("sne,ef->snf", att, lp["w_out"]) + lp["b_out"][0]
        h = ln(h + sa, lp["g1"][0], lp["be1"][0])
        f = jax.nn.relu(jnp.einsum("sne,ef->snf", h, lp["w1"]) + lp["b1"][0])
        f = jnp.einsum("snf,fe->sne", f, lp["w2"]) + lp["b2"][0]
        h = ln(h + f, lp["g2"][0], lp["be2"][0])
    h = ln(h, params["gf"][0], params["bf"][0])
    return jnp.einsum("sne,ep->snp", h, params["proj_w"]) + params["proj_b"][0]


if __name__ == "__main__":
    key = jax.random.PRNGKey(0)
    kp, kx = jax.random.split(key)
    params = init_params(kp)
    packed = pack_params(params)
    x = jax.random.normal(kx, (BATCH, 1, N_MELS, N_FRAMES), dtype=jnp.float32)

    out = jax.jit(audio_encoder_forward)(packed, x)
    out = jax.block_until_ready(out)
    assert out.shape == (BATCH, D_MODEL, D_PROJ), out.shape
    assert bool(jnp.all(jnp.isfinite(out)))

    ref = reference_forward(params, x)
    err = float(jnp.max(jnp.abs(out - ref)))
    assert err < 2e-2, f"max abs err vs reference: {err}"
    print("KERNEL_OK")
</pallas_src>

<mosaic_0001>
module attributes {stable_mosaic.version = 11 : i64} {
  func.func @_encoder_kernel(%arg0: memref<16x32xf32, #tpu.memory_space<vmem>>, %arg1: memref<200x32xf32, #tpu.memory_space<vmem>>, %arg2: memref<2x168x96xf32, #tpu.memory_space<vmem>>, %arg3: memref<64x16xf32, #tpu.memory_space<vmem>>, %arg4: memref<64x32xf32, #tpu.memory_space<vmem>>) attributes {dimension_semantics = [], scalar_prefetch = 0 : i64, scratch_operands = 1 : i64, tpu.core_type = #tpu.core_type<tc>} {
    %c0 = arith.constant 0 : index
    %c0_0 = arith.constant 0 : index
    %0 = vector.load %arg1[%c0, %c0_0] : memref<200x32xf32, #tpu.memory_space<vmem>>, vector<64x16xf32>
    %c64 = arith.constant 64 : index
    %c0_1 = arith.constant 0 : index
    %1 = vector.load %arg1[%c64, %c0_1] : memref<200x32xf32, #tpu.memory_space<vmem>>, vector<64x32xf32>
    %c0_2 = arith.constant 0 : index
    %c0_3 = arith.constant 0 : index
    %2 = vector.load %arg0[%c0_2, %c0_3] : memref<16x32xf32, #tpu.memory_space<vmem>>, vector<16x32xf32>
    %cst = arith.constant dense<0.000000e+00> : vector<64x32xf32>
    %3 = tpu.matmul %0, %2, %cst {dimension_numbers = #tpu.dot_dimension_numbers<[1], [0], [0], [1], [0, 0, 1, 1], [], []>} : vector<64x16xf32>, vector<16x32xf32>, vector<64x32xf32> -> vector<64x32xf32>
    %4 = arith.addf %3, %1 : vector<64x32xf32>
    %c0_4 = arith.constant 0 : index
    %c0_5 = arith.constant 0 : index
    %5 = vector.load %arg4[%c0_4, %c0_5] : memref<64x32xf32, #tpu.memory_space<vmem>>, vector<64x32xf32>
    tpu.vector_store %arg4[%c0_4, %c0_5], %4 {strides = array<i32>} : memref<64x32xf32, #tpu.memory_space<vmem>>, vector<64x32xf32>,
    %c128 = arith.constant 128 : index
    %c0_6 = arith.constant 0 : index
    %6 = vector.load %arg1[%c128, %c0_6] : memref<200x32xf32, #tpu.memory_space<vmem>>, vector<32x32xf32>
    %c0_7 = arith.constant 0 : index
    %c0_8 = arith.constant 0 : index
    %c0_9 = arith.constant 0 : index
    %7 = vector.load %arg2[%c0_7, %c0_8, %c0_9] : memref<2x168x96xf32, #tpu.memory_space<vmem>>, vector<1x32x96xf32>
    %8 = vector.shape_cast %7 : vector<1x32x96xf32> to vector<32x96xf32>
    %c0_10 = arith.constant 0 : index
    %c160 = arith.constant 160 : index
    %c0_11 = arith.constant 0 : index
    %9 = vector.load %arg2[%c0_10, %c160, %c0_11] : memref<2x168x96xf32, #tpu.memory_space<vmem>>, vector<1x1x96xf32>
    %10 = vector.shape_cast %9 : vector<1x1x96xf32> to vector<1x96xf32>
    %c0_12 = arith.constant 0 : index
    %c64_13 = arith.constant 64 : index
    %c0_14 = arith.constant 0 : index
    %11 = vector.load %arg2[%c0_12, %c64_13, %c0_14] : memref<2x168x96xf32, #tpu.memory_space<vmem>>, vector<1x32x32xf32>
    %12 = vector.shape_cast %11 : vector<1x32x32xf32> to vector<32x32xf32>
    %c0_15 = arith.constant 0 : index
    %c161 = arith.constant 161 : index
    %c0_16 = arith.constant 0 : index
    %13 = vector.load %arg2[%c0_15, %c161, %c0_16] : memref<2x168x96xf32, #tpu.memory_space<vmem>>, vector<1x1x32xf32>
    %14 = vector.shape_cast %13 : vector<1x1x32xf32> to vector<1x32xf32>
    %c0_17 = arith.constant 0 : index
    %c32 = arith.constant 32 : index
    %c0_18 = arith.constant 0 : index
    %15 = vector.load %arg2[%c0_17, %c32, %c0_18] : memref<2x168x96xf32, #tpu.memory_space<vmem>>, vector<1x32x64xf32>
    %16 = vector.shape_cast %15 : vector<1x32x64xf32> to vector<32x64xf32>
    %c0_19 = arith.constant 0 : index
    %c162 = arith.constant 162 : index
    %c0_20 = arith.constant 0 : index
    %17 = vector.load %arg2[%c0_19, %c162, %c0_20] : memref<2x168x96xf32, #tpu.memory_space<vmem>>, vector<1x1x64xf32>
    %18 = vector.shape_cast %17 : vector<1x1x64xf32> to vector<1x64xf32>
    %c0_21 = arith.constant 0 : index
    %c96 = arith.constant 96 : index
    %c0_22 = arith.constant 0 : index
    %19 = vector.load %arg2[%c0_21, %c96, %c0_22] : memref<2x168x96xf32, #tpu.memory_space<vmem>>, vector<1x64x32xf32>
    %20 = vector.shape_cast %19 : vector<1x64x32xf32> to vector<64x32xf32>
    %c0_23 = arith.constant 0 : index
    %c163 = arith.constant 163 : index
    %c0_24 = arith.constant 0 : index
    %21 = vector.load %arg2[%c0_23, %c163, %c0_24] : memref<2x168x96xf32, #tpu.memory_space<vmem>>, vector<1x1x32xf32>
    %22 = vector.shape_cast %21 : vector<1x1x32xf32> to vector<1x32xf32>
    %c0_25 = arith.constant 0 : index
    %c164 = arith.constant 164 : index
    %c0_26 = arith.constant 0 : index
    %23 = vector.load %arg2[%c0_25, %c164, %c0_26] : memref<2x168x96xf32, #tpu.memory_space<vmem>>, vector<1x1x32xf32>
    %24 = vector.shape_cast %23 : vector<1x1x32xf32> to vector<1x32xf32>
    %c0_27 = arith.constant 0 : index
    %c165 = arith.constant 165 : index
    %c0_28 = arith.constant 0 : index
    %25 = vector.load %arg2[%c0_27, %c165, %c0_28] : memref<2x168x96xf32, #tpu.memory_space<vmem>>, vector<1x1x32xf32>
    %26 = vector.shape_cast %25 : vector<1x1x32xf32> to vector<1x32xf32>
    %c0_29 = arith.constant 0 : index
    %c166 = arith.constant 166 : index
    %c0_30 = arith.constant 0 : index
    %27 = vector.load %arg2[%c0_29, %c166, %c0_30] : memref<2x168x96xf32, #tpu.memory_space<vmem>>, vector<1x1x32xf32>
    %28 = vector.shape_cast %27 : vector<1x1x32xf32> to vector<1x32xf32>
    %c0_31 = arith.constant 0 : index
    %c167 = arith.constant 167 : index
    %c0_32 = arith.constant 0 : index
    %29 = vector.load %arg2[%c0_31, %c167, %c0_32] : memref<2x168x96xf32, #tpu.memory_space<vmem>>, vector<1x1x32xf32>
    %30 = vector.shape_cast %29 : vector<1x1x32xf32> to vector<1x32xf32>
    %c0_33 = arith.constant 0 : index
    %c0_34 = arith.constant 0 : index
    %31 = vector.load %arg4[%c0_33, %c0_34] : memref<64x32xf32, #tpu.memory_space<vmem>>, vector<64x32xf32>
    %cst_35 = arith.constant dense<0.000000e+00> : vector<64x96xf32>
    %32 = tpu.matmul %31, %8, %cst_35 {dimension_numbers = #tpu.dot_dimension_numbers<[1], [0], [0], [1], [0, 0, 1, 1], [], []>} : vector<64x32xf32>, vector<32x96xf32>, vector<64x96xf32> -> vector<64x96xf32>
    %33 = vector.broadcast %10 : vector<1x96xf32> to vector<64x96xf32>
    %34 = arith.addf %32, %33 : vector<64x96xf32>
    %35 = vector.extract_strided_slice %34 {offsets = [0, 0], sizes = [64, 32], strides = [1, 1]} : vector<64x96xf32> to vector<64x32xf32>
    %36 = vector.extract_strided_slice %34 {offsets = [0, 32], sizes = [64, 32], strides = [1, 1]} : vector<64x96xf32> to vector<64x32xf32>
    %37 = vector.extract_strided_slice %34 {offsets = [0, 64], sizes = [64, 32], strides = [1, 1]} : vector<64x96xf32> to vector<64x32xf32>
    %c32_i32 = arith.constant 32 : i32
    %38 = tpu.dynamic_rotate %36 by %c32_i32 dim 0 : vector<64x32xf32>, i32 -> vector<64x32xf32>
    %c32_i32_36 = arith.constant 32 : i32
    %39 = tpu.dynamic_rotate %37 by %c32_i32_36 dim 0 : vector<64x32xf32>, i32 -> vector<64x32xf32>
    %40 = arith.mulf %35, %36 : vector<64x32xf32>
    %cst_37 = arith.constant dense<0.000000e+00> : vector<64x32xf32>
    %41 = tpu.matmul %40, %6, %cst_37 {dimension_numbers = #tpu.dot_dimension_numbers<[1], [0], [0], [1], [0, 0, 1, 1], [], []>} : vector<64x32xf32>, vector<32x32xf32>, vector<64x32xf32> -> vector<64x32xf32>
    %42 = arith.mulf %35, %38 : vector<64x32xf32>
    %cst_38 = arith.constant dense<0.000000e+00> : vector<64x32xf32>
    %43 = tpu.matmul %42, %6, %cst_38 {dimension_numbers = #tpu.dot_dimension_numbers<[1], [0], [0], [1], [0, 0, 1, 1], [], []>} : vector<64x32xf32>, vector<32x32xf32>, vector<64x32xf32> -> vector<64x32xf32>
    %44 = arith.maximumf %41, %43 : vector<64x32xf32>
    %45 = arith.subf %41, %44 : vector<64x32xf32>
    %46 = math.exp %45 : vector<64x32xf32>
    %47 = arith.subf %43, %44 : vector<64x32xf32>
    %48 = math.exp %47 : vector<64x32xf32>
    %49 = arith.addf %46, %48 : vector<64x32xf32>
    %50 = tpu.reciprocal %49 {approx = true} : vector<64x32xf32> -> vector<64x32xf32>
    %51 = arith.mulf %46, %50 : vector<64x32xf32>
    %52 = arith.mulf %51, %37 : vector<64x32xf32>
    %53 = arith.mulf %48, %50 : vector<64x32xf32>
    %54 = arith.mulf %53, %39 : vector<64x32xf32>
    %55 = arith.addf %52, %54 : vector<64x32xf32>
    %cst_39 = arith.constant dense<0.000000e+00> : vector<64x32xf32>
    %56 = tpu.matmul %55, %12, %cst_39 {dimension_numbers = #tpu.dot_dimension_numbers<[1], [0], [0], [1], [0, 0, 1, 1], [], []>} : vector<64x32xf32>, vector<32x32xf32>, vector<64x32xf32> -> vector<64x32xf32>
    %57 = vector.broadcast %14 : vector<1x32xf32> to vector<64x32xf32>
    %58 = arith.addf %56, %57 : vector<64x32xf32>
    %59 = arith.addf %31, %58 : vector<64x32xf32>
    %cst_40 = arith.constant dense<0.000000e+00> : vector<64xf32>
    %60 = vector.multi_reduction <add>, %59, %cst_40 [1] : vector<64x32xf32> to vector<64xf32>
    %61 = vector.shape_cast %60 : vector<64xf32> to vector<64x1xf32>
    %cst_41 = arith.constant 3.200000e+01 : f32
    %62 = vector.broadcast %cst_41 : f32 to vector<64x1xf32>
    %63 = arith.divf %61, %62 : vector<64x1xf32>
    %64 = vector.broadcast %63 : vector<64x1xf32> to vector<64x32xf32>
    %65 = arith.subf %59, %64 : vector<64x32xf32>
    %66 = arith.mulf %65, %65 : vector<64x32xf32>
    %cst_42 = arith.constant dense<0.000000e+00> : vector<64xf32>
    %67 = vector.multi_reduction <add>, %66, %cst_42 [1] : vector<64x32xf32> to vector<64xf32>
    %68 = vector.shape_cast %67 : vector<64xf32> to vector<64x1xf32>
    %cst_43 = arith.constant 3.200000e+01 : f32
    %69 = vector.broadcast %cst_43 : f32 to vector<64x1xf32>
    %70 = arith.divf %68, %69 : vector<64x1xf32>
    %cst_44 = arith.constant 9.99999974E-6 : f32
    %71 = vector.broadcast %cst_44 : f32 to vector<64x1xf32>
    %72 = arith.addf %70, %71 : vector<64x1xf32>
    %73 = math.rsqrt %72 : vector<64x1xf32>
    %74 = vector.broadcast %73 : vector<64x1xf32> to vector<64x32xf32>
    %75 = arith.mulf %65, %74 : vector<64x32xf32>
    %76 = vector.broadcast %24 : vector<1x32xf32> to vector<64x32xf32>
    %77 = arith.mulf %75, %76 : vector<64x32xf32>
    %78 = vector.broadcast %26 : vector<1x32xf32> to vector<64x32xf32>
    %79 = arith.addf %77, %78 : vector<64x32xf32>
    %c0_45 = arith.constant 0 : index
    %c0_46 = arith.constant 0 : index
    %80 = vector.load %arg4[%c0_45, %c0_46] : memref<64x32xf32, #tpu.memory_space<vmem>>, vector<64x32xf32>
    tpu.vector_store %arg4[%c0_45, %c0_46], %79 {strides = array<i32>} : memref<64x32xf32, #tpu.memory_space<vmem>>, vector<64x32xf32>,
    %cst_47 = arith.constant dense<0.000000e+00> : vector<64x64xf32>
    %81 = tpu.matmul %79, %16, %cst_47 {dimension_numbers = #tpu.dot_dimension_numbers<[1], [0], [0], [1], [0, 0, 1, 1], [], []>} : vector<64x32xf32>, vector<32x64xf32>, vector<64x64xf32> -> vector<64x64xf32>
    %82 = vector.broadcast %18 : vector<1x64xf32> to vector<64x64xf32>
    %83 = arith.addf %81, %82 : vector<64x64xf32>
    %cst_48 = arith.constant 0.000000e+00 : f32
    %84 = vector.broadcast %cst_48 : f32 to vector<64x64xf32>
    %85 = arith.maximumf %83, %84 : vector<64x64xf32>
    %cst_49 = arith.constant dense<0.000000e+00> : vector<64x32xf32>
    %86 = tpu.matmul %85, %20, %cst_49 {dimension_numbers = #tpu.dot_dimension_numbers<[1], [0], [0], [1], [0, 0, 1, 1], [], []>} : vector<64x64xf32>, vector<64x32xf32>, vector<64x32xf32> -> vector<64x32xf32>
    %87 = vector.broadcast %22 : vector<1x32xf32> to vector<64x32xf32>
    %88 = arith.addf %86, %87 : vector<64x32xf32>
    %89 = arith.addf %79, %88 : vector<64x32xf32>
    %cst_50 = arith.constant dense<0.000000e+00> : vector<64xf32>
    %90 = vector.multi_reduction <add>, %89, %cst_50 [1] : vector<64x32xf32> to vector<64xf32>
    %91 = vector.shape_cast %90 : vector<64xf32> to vector<64x1xf32>
    %cst_51 = arith.constant 3.200000e+01 : f32
    %92 = vector.broadcast %cst_51 : f32 to vector<64x1xf32>
    %93 = arith.divf %91, %92 : vector<64x1xf32>
    %94 = vector.broadcast %93 : vector<64x1xf32> to vector<64x32xf32>
    %95 = arith.subf %89, %94 : vector<64x32xf32>
    %96 = arith.mulf %95, %95 : vector<64x32xf32>
    %cst_52 = arith.constant dense<0.000000e+00> : vector<64xf32>
    %97 = vector.multi_reduction <add>, %96, %cst_52 [1] : vector<64x32xf32> to vector<64xf32>
    %98 = vector.shape_cast %97 : vector<64xf32> to vector<64x1xf32>
    %cst_53 = arith.constant 3.200000e+01 : f32
    %99 = vector.broadcast %cst_53 : f32 to vector<64x1xf32>
    %100 = arith.divf %98, %99 : vector<64x1xf32>
    %cst_54 = arith.constant 9.99999974E-6 : f32
    %101 = vector.broadcast %cst_54 : f32 to vector<64x1xf32>
    %102 = arith.addf %100, %101 : vector<64x1xf32>
    %103 = math.rsqrt %102 : vector<64x1xf32>
    %104 = vector.broadcast %103 : vector<64x1xf32> to vector<64x32xf32>
    %105 = arith.mulf %95, %104 : vector<64x32xf32>
    %106 = vector.broadcast %28 : vector<1x32xf32> to vector<64x32xf32>
    %107 = arith.mulf %105, %106 : vector<64x32xf32>
    %108 = vector.broadcast %30 : vector<1x32xf32> to vector<64x32xf32>
    %109 = arith.addf %107, %108 : vector<64x32xf32>
    %c0_55 = arith.constant 0 : index
    %c0_56 = arith.constant 0 : index
    %110 = vector.load %arg4[%c0_55, %c0_56] : memref<64x32xf32, #tpu.memory_space<vmem>>, vector<64x32xf32>
    tpu.vector_store %arg4[%c0_55, %c0_56], %109 {strides = array<i32>} : memref<64x32xf32, #tpu.memory_space<vmem>>, vector<64x32xf32>,
    %c1 = arith.constant 1 : index
    %c0_57 = arith.constant 0 : index
    %c0_58 = arith.constant 0 : index
    %111 = vector.load %arg2[%c1, %c0_57, %c0_58] : memref<2x168x96xf32, #tpu.memory_space<vmem>>, vector<1x32x96xf32>
    %112 = vector.shape_cast %111 : vector<1x32x96xf32> to vector<32x96xf32>
    %c1_59 = arith.constant 1 : index
    %c160_60 = arith.constant 160 : index
    %c0_61 = arith.constant 0 : index
    %113 = vector.load %arg2[%c1_59, %c160_60, %c0_61] : memref<2x168x96xf32, #tpu.memory_space<vmem>>, vector<1x1x96xf32>
    %114 = vector.shape_cast %113 : vector<1x1x96xf32> to vector<1x96xf32>
    %c1_62 = arith.constant 1 : index
    %c64_63 = arith.constant 64 : index
    %c0_64 = arith.constant 0 : index
    %115 = vector.load %arg2[%c1_62, %c64_63, %c0_64] : memref<2x168x96xf32, #tpu.memory_space<vmem>>, vector<1x32x32xf32>
    %116 = vector.shape_cast %115 : vector<1x32x32xf32> to vector<32x32xf32>
    %c1_65 = arith.constant 1 : index
    %c161_66 = arith.constant 161 : index
    %c0_67 = arith.constant 0 : index
    %117 = vector.load %arg2[%c1_65, %c161_66, %c0_67] : memref<2x168x96xf32, #tpu.memory_space<vmem>>, vector<1x1x32xf32>
    %118 = vector.shape_cast %117 : vector<1x1x32xf32> to vector<1x32xf32>
    %c1_68 = arith.constant 1 : index
    %c32_69 = arith.constant 32 : index
    %c0_70 = arith.constant 0 : index
    %119 = vector.load %arg2[%c1_68, %c32_69, %c0_70] : memref<2x168x96xf32, #tpu.memory_space<vmem>>, vector<1x32x64xf32>
    %120 = vector.shape_cast %119 : vector<1x32x64xf32> to vector<32x64xf32>
    %c1_71 = arith.constant 1 : index
    %c162_72 = arith.constant 162 : index
    %c0_73 = arith.constant 0 : index
    %121 = vector.load %arg2[%c1_71, %c162_72, %c0_73] : memref<2x168x96xf32, #tpu.memory_space<vmem>>, vector<1x1x64xf32>
    %122 = vector.shape_cast %121 : vector<1x1x64xf32> to vector<1x64xf32>
    %c1_74 = arith.constant 1 : index
    %c96_75 = arith.constant 96 : index
    %c0_76 = arith.constant 0 : index
    %123 = vector.load %arg2[%c1_74, %c96_75, %c0_76] : memref<2x168x96xf32, #tpu.memory_space<vmem>>, vector<1x64x32xf32>
    %124 = vector.shape_cast %123 : vector<1x64x32xf32> to vector<64x32xf32>
    %c1_77 = arith.constant 1 : index
    %c163_78 = arith.constant 163 : index
    %c0_79 = arith.constant 0 : index
    %125 = vector.load %arg2[%c1_77, %c163_78, %c0_79] : memref<2x168x96xf32, #tpu.memory_space<vmem>>, vector<1x1x32xf32>
    %126 = vector.shape_cast %125 : vector<1x1x32xf32> to vector<1x32xf32>
    %c1_80 = arith.constant 1 : index
    %c164_81 = arith.constant 164 : index
    %c0_82 = arith.constant 0 : index
    %127 = vector.load %arg2[%c1_80, %c164_81, %c0_82] : memref<2x168x96xf32, #tpu.memory_space<vmem>>, vector<1x1x32xf32>
    %128 = vector.shape_cast %127 : vector<1x1x32xf32> to vector<1x32xf32>
    %c1_83 = arith.constant 1 : index
    %c165_84 = arith.constant 165 : index
    %c0_85 = arith.constant 0 : index
    %129 = vector.load %arg2[%c1_83, %c165_84, %c0_85] : memref<2x168x96xf32, #tpu.memory_space<vmem>>, vector<1x1x32xf32>
    %130 = vector.shape_cast %129 : vector<1x1x32xf32> to vector<1x32xf32>
    %c1_86 = arith.constant 1 : index
    %c166_87 = arith.constant 166 : index
    %c0_88 = arith.constant 0 : index
    %131 = vector.load %arg2[%c1_86, %c166_87, %c0_88] : memref<2x168x96xf32, #tpu.memory_space<vmem>>, vector<1x1x32xf32>
    %132 = vector.shape_cast %131 : vector<1x1x32xf32> to vector<1x32xf32>
    %c1_89 = arith.constant 1 : index
    %c167_90 = arith.constant 167 : index
    %c0_91 = arith.constant 0 : index
    %133 = vector.load %arg2[%c1_89, %c167_90, %c0_91] : memref<2x168x96xf32, #tpu.memory_space<vmem>>, vector<1x1x32xf32>
    %134 = vector.shape_cast %133 : vector<1x1x32xf32> to vector<1x32xf32>
    %c0_92 = arith.constant 0 : index
    %c0_93 = arith.constant 0 : index
    %135 = vector.load %arg4[%c0_92, %c0_93] : memref<64x32xf32, #tpu.memory_space<vmem>>, vector<64x32xf32>
    %cst_94 = arith.constant dense<0.000000e+00> : vector<64x96xf32>
    %136 = tpu.matmul %135, %112, %cst_94 {dimension_numbers = #tpu.dot_dimension_numbers<[1], [0], [0], [1], [0, 0, 1, 1], [], []>} : vector<64x32xf32>, vector<32x96xf32>, vector<64x96xf32> -> vector<64x96xf32>
    %137 = vector.broadcast %114 : vector<1x96xf32> to vector<64x96xf32>
    %138 = arith.addf %136, %137 : vector<64x96xf32>
    %139 = vector.extract_strided_slice %138 {offsets = [0, 0], sizes = [64, 32], strides = [1, 1]} : vector<64x96xf32> to vector<64x32xf32>
    %140 = vector.extract_strided_slice %138 {offsets = [0, 32], sizes = [64, 32], strides = [1, 1]} : vector<64x96xf32> to vector<64x32xf32>
    %141 = vector.extract_strided_slice %138 {offsets = [0, 64], sizes = [64, 32], strides = [1, 1]} : vector<64x96xf32> to vector<64x32xf32>
    %c32_i32_95 = arith.constant 32 : i32
    %142 = tpu.dynamic_rotate %140 by %c32_i32_95 dim 0 : vector<64x32xf32>, i32 -> vector<64x32xf32>
    %c32_i32_96 = arith.constant 32 : i32
    %143 = tpu.dynamic_rotate %141 by %c32_i32_96 dim 0 : vector<64x32xf32>, i32 -> vector<64x32xf32>
    %144 = arith.mulf %139, %140 : vector<64x32xf32>
    %cst_97 = arith.constant dense<0.000000e+00> : vector<64x32xf32>
    %145 = tpu.matmul %144, %6, %cst_97 {dimension_numbers = #tpu.dot_dimension_numbers<[1], [0], [0], [1], [0, 0, 1, 1], [], []>} : vector<64x32xf32>, vector<32x32xf32>, vector<64x32xf32> -> vector<64x32xf32>
    %146 = arith.mulf %139, %142 : vector<64x32xf32>
    %cst_98 = arith.constant dense<0.000000e+00> : vector<64x32xf32>
    %147 = tpu.matmul %146, %6, %cst_98 {dimension_numbers = #tpu.dot_dimension_numbers<[1], [0], [0], [1], [0, 0, 1, 1], [], []>} : vector<64x32xf32>, vector<32x32xf32>, vector<64x32xf32> -> vector<64x32xf32>
    %148 = arith.maximumf %145, %147 : vector<64x32xf32>
    %149 = arith.subf %145, %148 : vector<64x32xf32>
    %150 = math.exp %149 : vector<64x32xf32>
    %151 = arith.subf %147, %148 : vector<64x32xf32>
    %152 = math.exp %151 : vector<64x32xf32>
    %153 = arith.addf %150, %152 : vector<64x32xf32>
    %154 = tpu.reciprocal %153 {approx = true} : vector<64x32xf32> -> vector<64x32xf32>
    %155 = arith.mulf %150, %154 : vector<64x32xf32>
    %156 = arith.mulf %155, %141 : vector<64x32xf32>
    %157 = arith.mulf %152, %154 : vector<64x32xf32>
    %158 = arith.mulf %157, %143 : vector<64x32xf32>
    %159 = arith.addf %156, %158 : vector<64x32xf32>
    %cst_99 = arith.constant dense<0.000000e+00> : vector<64x32xf32>
    %160 = tpu.matmul %159, %116, %cst_99 {dimension_numbers = #tpu.dot_dimension_numbers<[1], [0], [0], [1], [0, 0, 1, 1], [], []>} : vector<64x32xf32>, vector<32x32xf32>, vector<64x32xf32> -> vector<64x32xf32>
    %161 = vector.broadcast %118 : vector<1x32xf32> to vector<64x32xf32>
    %162 = arith.addf %160, %161 : vector<64x32xf32>
    %163 = arith.addf %135, %162 : vector<64x32xf32>
    %cst_100 = arith.constant dense<0.000000e+00> : vector<64xf32>
    %164 = vector.multi_reduction <add>, %163, %cst_100 [1] : vector<64x32xf32> to vector<64xf32>
    %165 = vector.shape_cast %164 : vector<64xf32> to vector<64x1xf32>
    %cst_101 = arith.constant 3.200000e+01 : f32
    %166 = vector.broadcast %cst_101 : f32 to vector<64x1xf32>
    %167 = arith.divf %165, %166 : vector<64x1xf32>
    %168 = vector.broadcast %167 : vector<64x1xf32> to vector<64x32xf32>
    %169 = arith.subf %163, %168 : vector<64x32xf32>
    %170 = arith.mulf %169, %169 : vector<64x32xf32>
    %cst_102 = arith.constant dense<0.000000e+00> : vector<64xf32>
    %171 = vector.multi_reduction <add>, %170, %cst_102 [1] : vector<64x32xf32> to vector<64xf32>
    %172 = vector.shape_cast %171 : vector<64xf32> to vector<64x1xf32>
    %cst_103 = arith.constant 3.200000e+01 : f32
    %173 = vector.broadcast %cst_103 : f32 to vector<64x1xf32>
    %174 = arith.divf %172, %173 : vector<64x1xf32>
    %cst_104 = arith.constant 9.99999974E-6 : f32
    %175 = vector.broadcast %cst_104 : f32 to vector<64x1xf32>
    %176 = arith.addf %174, %175 : vector<64x1xf32>
    %177 = math.rsqrt %176 : vector<64x1xf32>
    %178 = vector.broadcast %177 : vector<64x1xf32> to vector<64x32xf32>
    %179 = arith.mulf %169, %178 : vector<64x32xf32>
    %180 = vector.broadcast %128 : vector<1x32xf32> to vector<64x32xf32>
    %181 = arith.mulf %179, %180 : vector<64x32xf32>
    %182 = vector.broadcast %130 : vector<1x32xf32> to vector<64x32xf32>
    %183 = arith.addf %181, %182 : vector<64x32xf32>
    %c0_105 = arith.constant 0 : index
    %c0_106 = arith.constant 0 : index
    %184 = vector.load %arg4[%c0_105, %c0_106] : memref<64x32xf32, #tpu.memory_space<vmem>>, vector<64x32xf32>
    tpu.vector_store %arg4[%c0_105, %c0_106], %183 {strides = array<i32>} : memref<64x32xf32, #tpu.memory_space<vmem>>, vector<64x32xf32>,
    %cst_107 = arith.constant dense<0.000000e+00> : vector<64x64xf32>
    %185 = tpu.matmul %183, %120, %cst_107 {dimension_numbers = #tpu.dot_dimension_numbers<[1], [0], [0], [1], [0, 0, 1, 1], [], []>} : vector<64x32xf32>, vector<32x64xf32>, vector<64x64xf32> -> vector<64x64xf32>
    %186 = vector.broadcast %122 : vector<1x64xf32> to vector<64x64xf32>
    %187 = arith.addf %185, %186 : vector<64x64xf32>
    %cst_108 = arith.constant 0.000000e+00 : f32
    %188 = vector.broadcast %cst_108 : f32 to vector<64x64xf32>
    %189 = arith.maximumf %187, %188 : vector<64x64xf32>
    %cst_109 = arith.constant dense<0.000000e+00> : vector<64x32xf32>
    %190 = tpu.matmul %189, %124, %cst_109 {dimension_numbers = #tpu.dot_dimension_numbers<[1], [0], [0], [1], [0, 0, 1, 1], [], []>} : vector<64x64xf32>, vector<64x32xf32>, vector<64x32xf32> -> vector<64x32xf32>
    %191 = vector.broadcast %126 : vector<1x32xf32> to vector<64x32xf32>
    %192 = arith.addf %190, %191 : vector<64x32xf32>
    %193 = arith.addf %183, %192 : vector<64x32xf32>
    %cst_110 = arith.constant dense<0.000000e+00> : vector<64xf32>
    %194 = vector.multi_reduction <add>, %193, %cst_110 [1] : vector<64x32xf32> to vector<64xf32>
    %195 = vector.shape_cast %194 : vector<64xf32> to vector<64x1xf32>
    %cst_111 = arith.constant 3.200000e+01 : f32
    %196 = vector.broadcast %cst_111 : f32 to vector<64x1xf32>
    %197 = arith.divf %195, %196 : vector<64x1xf32>
    %198 = vector.broadcast %197 : vector<64x1xf32> to vector<64x32xf32>
    %199 = arith.subf %193, %198 : vector<64x32xf32>
    %200 = arith.mulf %199, %199 : vector<64x32xf32>
    %cst_112 = arith.constant dense<0.000000e+00> : vector<64xf32>
    %201 = vector.multi_reduction <add>, %200, %cst_112 [1] : vector<64x32xf32> to vector<64xf32>
    %202 = vector.shape_cast %201 : vector<64xf32> to vector<64x1xf32>
    %cst_113 = arith.constant 3.200000e+01 : f32
    %203 = vector.broadcast %cst_113 : f32 to vector<64x1xf32>
    %204 = arith.divf %202, %203 : vector<64x1xf32>
    %cst_114 = arith.constant 9.99999974E-6 : f32
    %205 = vector.broadcast %cst_114 : f32 to vector<64x1xf32>
    %206 = arith.addf %204, %205 : vector<64x1xf32>
    %207 = math.rsqrt %206 : vector<64x1xf32>
    %208 = vector.broadcast %207 : vector<64x1xf32> to vector<64x32xf32>
    %209 = arith.mulf %199, %208 : vector<64x32xf32>
    %210 = vector.broadcast %132 : vector<1x32xf32> to vector<64x32xf32>
    %211 = arith.mulf %209, %210 : vector<64x32xf32>
    %212 = vector.broadcast %134 : vector<1x32xf32> to vector<64x32xf32>
    %213 = arith.addf %211, %212 : vector<64x32xf32>
    %c0_115 = arith.constant 0 : index
    %c0_116 = arith.constant 0 : index
    %214 = vector.load %arg4[%c0_115, %c0_116] : memref<64x32xf32, #tpu.memory_space<vmem>>, vector<64x32xf32>
    tpu.vector_store %arg4[%c0_115, %c0_116], %213 {strides = array<i32>} : memref<64x32xf32, #tpu.memory_space<vmem>>, vector<64x32xf32>,
    %c192 = arith.constant 192 : index
    %c0_117 = arith.constant 0 : index
    %215 = vector.load %arg1[%c192, %c0_117] : memref<200x32xf32, #tpu.memory_space<vmem>>, vector<1x32xf32>
    %c193 = arith.constant 193 : index
    %c0_118 = arith.constant 0 : index
    %216 = vector.load %arg1[%c193, %c0_118] : memref<200x32xf32, #tpu.memory_space<vmem>>, vector<1x32xf32>
    %c160_119 = arith.constant 160 : index
    %c0_120 = arith.constant 0 : index
    %217 = vector.load %arg1[%c160_119, %c0_120] : memref<200x32xf32, #tpu.memory_space<vmem>>, vector<32x16xf32>
    %c194 = arith.constant 194 : index
    %c0_121 = arith.constant 0 : index
    %218 = vector.load %arg1[%c194, %c0_121] : memref<200x32xf32, #tpu.memory_space<vmem>>, vector<1x16xf32>
    %c0_122 = arith.constant 0 : index
    %c0_123 = arith.constant 0 : index
    %219 = vector.load %arg4[%c0_122, %c0_123] : memref<64x32xf32, #tpu.memory_space<vmem>>, vector<64x32xf32>
    %cst_124 = arith.constant dense<0.000000e+00> : vector<64xf32>
    %220 = vector.multi_reduction <add>, %219, %cst_124 [1] : vector<64x32xf32> to vector<64xf32>
    %221 = vector.shape_cast %220 : vector<64xf32> to vector<64x1xf32>
    %cst_125 = arith.constant 3.200000e+01 : f32
    %222 = vector.broadcast %cst_125 : f32 to vector<64x1xf32>
    %223 = arith.divf %221, %222 : vector<64x1xf32>
    %224 = vector.broadcast %223 : vector<64x1xf32> to vector<64x32xf32>
    %225 = arith.subf %219, %224 : vector<64x32xf32>
    %226 = arith.mulf %225, %225 : vector<64x32xf32>
    %cst_126 = arith.constant dense<0.000000e+00> : vector<64xf32>
    %227 = vector.multi_reduction <add>, %226, %cst_126 [1] : vector<64x32xf32> to vector<64xf32>
    %228 = vector.shape_cast %227 : vector<64xf32> to vector<64x1xf32>
    %cst_127 = arith.constant 3.200000e+01 : f32
    %229 = vector.broadcast %cst_127 : f32 to vector<64x1xf32>
    %230 = arith.divf %228, %229 : vector<64x1xf32>
    %cst_128 = arith.constant 9.99999974E-6 : f32
    %231 = vector.broadcast %cst_128 : f32 to vector<64x1xf32>
    %232 = arith.addf %230, %231 : vector<64x1xf32>
    %233 = math.rsqrt %232 : vector<64x1xf32>
    %234 = vector.broadcast %233 : vector<64x1xf32> to vector<64x32xf32>
    %235 = arith.mulf %225, %234 : vector<64x32xf32>
    %236 = vector.broadcast %215 : vector<1x32xf32> to vector<64x32xf32>
    %237 = arith.mulf %235, %236 : vector<64x32xf32>
    %238 = vector.broadcast %216 : vector<1x32xf32> to vector<64x32xf32>
    %239 = arith.addf %237, %238 : vector<64x32xf32>
    %cst_129 = arith.constant dense<0.000000e+00> : vector<64x16xf32>
    %240 = tpu.matmul %239, %217, %cst_129 {dimension_numbers = #tpu.dot_dimension_numbers<[1], [0], [0], [1], [0, 0, 1, 1], [], []>} : vector<64x32xf32>, vector<32x16xf32>, vector<64x16xf32> -> vector<64x16xf32>
    %241 = vector.broadcast %218 : vector<1x16xf32> to vector<64x16xf32>
    %242 = arith.addf %240, %241 : vector<64x16xf32>
    %c0_130 = arith.constant 0 : index
    %c0_131 = arith.constant 0 : index
    %243 = vector.load %arg3[%c0_130, %c0_131] : memref<64x16xf32, #tpu.memory_space<vmem>>, vector<64x16xf32>
    tpu.vector_store %arg3[%c0_130, %c0_131], %242 {strides = array<i32>} : memref<64x16xf32, #tpu.memory_space<vmem>>, vector<64x16xf32>,
    return
  }
}

</mosaic_0001>

<bundles_post_ra>
// kernel: audio_encoder_forward.1
= control target key start
LH: loop header
LB: loop body
LE: loop exit
PB: predicated region body
PF: predicated region fallthrough
CT: control target
= control target key end

     0   :  { %8 = vsyncpa [#allocation4], 0  ;;  %s4019_s12 = smov [#allocation3]   ;;  %s4819_s0 = inlined_call_operand.vmem [shape: f32[16,32], index: 0, kind: input, shape index: {}]   ;;  %s4820_s1 = inlined_call_operand.vmem [shape: f32[200,32], index: 1, kind: input, shape index: {}]   ;;  %s4821_s2 = inlined_call_operand.hbm [shape: f32[2,168,96], index: 2, kind: input, shape index: {}]   ;;  %s4822_s3 = inlined_call_operand.vmem [shape: f32[64,16], index: 3, kind: output, shape index: {}]  }
   0x1   :  { %s18_s13 = sshll.u32 %s4019_s12, 4  ;;  %s3995_s16 = scalar_lea.hbm %s4821_s2, 5376  ;;  %s19_s13 = int_to_ptr.vmem [resolvable:$true] %s18_s13 }
   0x2   :  { %p3996_p0 = scmp.ne.s32.totalorder %s4821_s2, %s3995_s16  ;;  %p3999_p1 = scmp.lt.u32.totalorder %s3995_s16, %s4821_s2 }
   0x4   :  { %p4001_p2 = pnand %p3999_p1, %p3996_p0 }
   0x6   :  { %4004 = shalt.err (!%p4001_p2)
}
   0x7   :  { %s4005_s21 = scalar_lea.vmem %s19_s13, 5376  ;;  %p4010_p4 = scmp.lt.s32.totalorder %s19_s13, %s19_s13 }
   0x8   :  { %p4006_p3 = scmp.ne.s32.totalorder %s19_s13, %s4005_s21  ;;  %p4011_p5 = scmp.lt.s32.totalorder %s4005_s21, %s4005_s21 }
   0xa   :  { %p4012_p6 = por %p4011_p5, %p4010_p4 }
   0xc   :  { %p4013_p7 = pnand %p4012_p6, %p4006_p3 }
   0xe   :  { %4016 = shalt.err (!%p4013_p7)
}
   0xf   :  { %s4020_s22 = smov 128   ;;  %s4021_s23 = smov 8  }
  0x10   :  { %24 = dma.hbm_to_vmem [thread:$0]  %s4821_s2, 5376, %s19_s13, [#allocation4], %s4020_s22, %s4020_s22, %s4021_s23  }
  0x11   :  { %4017 = dma.done.wait [#allocation4], 5376  }
  0x12   :  { %4018 = vsyncadd [#allocation4], 4294961920  ;;  %vm46_vm0 = vcmask 130048   ;;  %v44_v0 = vld [vmem:[%s4819_s0] sm:$0xff]  ;;  %v45_v1 = vld [vmem:[%s4819_s0 + $0x8] sm:$0xff]  ;;  %vm176_vm1 = vcmask 261120  }
  0x13   :  { %v28_v2 = vld [vmem:[%s4820_s1] sm:$0xff]  ;;  %v3690_v3 = vpack.c.bf16 %v45_v1, %v44_v0  ;;  %v29_v4 = vld [vmem:[%s4820_s1 + $0x8] sm:$0xff]  ;;  %v30_v5 = vld [vmem:[%s4820_s1 + $0x10] sm:$0xff]  ;;  %s4022_s12 = smov 96   ;;  %s4023_s13 = smov 64   ;;  %vm1223_vm2 = vcmask 523264  }
  0x14   :  { %3402 = vmatprep.mubr.msk.f32.mxu0 %vm46_vm0, %v28_v2  ;;  %v31_v6 = vld [vmem:[%s4820_s1 + $0x18] sm:$0xff]  ;;  %v32_v7 = vld [vmem:[%s4820_s1 + $0x20] sm:$0xff]  ;;  %v33_v8 = vld [vmem:[%s4820_s1 + $0x28] sm:$0xff] }
  0x15   :  { %3691 = vmatprep.subr.bf16.mxu0 %v3690_v3  ;;  %v34_v9 = vld [vmem:[%s4820_s1 + $0x30] sm:$0xff]  ;;  %v35_v10 = vld [vmem:[%s4820_s1 + $0x38] sm:$0xff]  ;;  %v189_v11 = vld [vmem:[#allocation3] sm:$0xff] }
  0x16   :  { %3693 = vmatpush3.bf16.msra.mxu0 %v3690_v3  ;;  %v190_v12 = vld [vmem:[#allocation3 + $0x8] sm:$0xff]  ;;  %v191_v14 = vld [vmem:[#allocation3 + $0x10] sm:$0xff]  ;;  %v192_v15 = vld [vmem:[#allocation3 + $0x18] sm:$0xff] }
  0x17   :  { %v3694_v13 = vpack.c.bf16 %v190_v12, %v189_v11  ;;  %v3698_v16 = vpack.c.bf16 %v192_v15, %v191_v14  ;;  %v37_v17 = vld [vmem:[%s4820_s1 + $0x48] sm:$0xff]  ;;  %v36_v18 = vld [vmem:[%s4820_s1 + $0x40] sm:$0xff]  ;;  %v39_v23 = vld [vmem:[%s4820_s1 + $0x58] sm:$0xff] }
  0x18   :  { %v38_v24 = vld [vmem:[%s4820_s1 + $0x50] sm:$0xff]  ;;  %v41_v29 = vld [vmem:[%s4820_s1 + $0x68] sm:$0xff]  ;;  %v40_v30 = vld [vmem:[%s4820_s1 + $0x60] sm:$0xff] }
  0x19   :  { %3403 = vmatmul.mubr.msk.f32.vlgmr.msra.gmra.mrb[0].mxu0 %vm46_vm0, %v29_v4  ;;  %3695 = vmatprep.subr.bf16.mxu1 %v3694_v13  ;;  %v43_v35 = vld [vmem:[%s4820_s1 + $0x78] sm:$0xff]  ;;  %v42_v37 = vld [vmem:[%s4820_s1 + $0x70] sm:$0xff]  ;;  %v185_v49 = vld [vmem:[%s4820_s1 + $0x80] sm:$0xff] }
  0x1a   :  { %3405 = vmatprep.mubr.msk.f32.mxu0 %vm46_vm0, %v30_v5  ;;  %3697 = vmatpush3.bf16.msra.mxu1 %v3694_v13  ;;  %v186_v50 = vld [vmem:[%s4820_s1 + $0x88] sm:$0xff]  ;;  %v187_v52 = vld [vmem:[%s4820_s1 + $0x90] sm:$0xff]  ;;  %v188_v53 = vld [vmem:[%s4820_s1 + $0x98] sm:$0xff] }
  0x1b   :  { %3699 = vmatprep.subr.bf16.mxu1 %v3698_v16  ;;  %v4164_v51 = vpack.c.bf16 %v186_v50, %v185_v49  ;;  %v4176_v54 = vpack.c.bf16 %v188_v53, %v187_v52  ;;  %v3101_v55 = vld [vmem:[#allocation3 + $0xa0] ss:$0 sm:$0xff] }
  0x1d   :  { %3406 = vmatmul.mubr.msk.f32.gmra.mrb[2].mxu0 %vm46_vm0, %v31_v6  ;;  %3703 = vmatprep.subr.bf16.mxu0 %v4164_v51 }
  0x1e   :  { %3408 = vmatprep.mubr.msk.f32.mxu0 %vm46_vm0, %v32_v7  ;;  %3701 = vmatpush3.bf16.msra.mxu1 %v3698_v16 }
  0x1f   :  { %3711 = vmatprep.subr.bf16.mxu1 %v4164_v51  ;;  %3705 = vmatpush3.bf16.msra.mxu0 %v4164_v51 }
  0x20   :  { %3707 = vmatprep.subr.bf16.mxu0 %v4176_v54 }
  0x21   :  { %3409 = vmatmul.mubr.msk.f32.gmra.mrb[4].mxu0 %vm46_vm0, %v33_v8 }
  0x22   :  { %3411 = vmatprep.mubr.msk.f32.mxu0 %vm46_vm0, %v34_v9 }
  0x23   :  { %3709 = vmatpush3.bf16.msra.mxu0 %v4176_v54 }
  0x25   :  { %3412 = vmatmul.mubr.msk.f32.gmra.mrb[6].mxu0 %vm46_vm0, %v35_v10 }
  0xec   :  { %v3404_v19 = vpop.f32.mrb[0].mxu0 }
  0xed   :  { %v143_v20 = vadd.f32 %v3404_v19, %v37_v17  ;;  %v137_v21 = vpop.f32.mrb[1].mxu0 }
  0xee   :  { %v138_v22 = vadd.f32 %v137_v21, %v36_v18 }
  0xef   :  { %178 = vst.msk [vmem:[#allocation2 + $0x8] sm:$0xff] %vm176_vm1, %v143_v20 }
  0xf0   :  { %177 = vst.msk [vmem:[#allocation2] sm:$0xff] %vm176_vm1, %v138_v22  ;;  %v3407_v25 = vpop.f32.mrb[2].mxu0 }
  0xf1   :  { %v153_v26 = vadd.f32 %v3407_v25, %v39_v23  ;;  %v147_v27 = vpop.f32.mrb[3].mxu0 }
  0xf2   :  { %v148_v28 = vadd.f32 %v147_v27, %v38_v24 }
  0xf3   :  { %180 = vst.msk [vmem:[#allocation2 + $0x18] sm:$0xff] %vm176_vm1, %v153_v26 }
  0xf4   :  { %179 = vst.msk [vmem:[#allocation2 + $0x10] sm:$0xff] %vm176_vm1, %v148_v28  ;;  %v3410_v31 = vpop.f32.mrb[4].mxu0 }
  0xf5   :  { %v163_v32 = vadd.f32 %v3410_v31, %v41_v29  ;;  %v157_v33 = vpop.f32.mrb[5].mxu0 }
  0xf6   :  { %v158_v34 = vadd.f32 %v157_v33, %v40_v30  ;;  %v4128_v39 = vld [vmem:[#allocation2 + $0x8] sm:$0xff] }
  0xf7   :  { %182 = vst.msk [vmem:[#allocation2 + $0x28] sm:$0xff] %vm176_vm1, %v163_v32  ;;  %v4120_v36 = vld [vmem:[#allocation2] sm:$0xff]  ;;  %v195_v33 = vld [vmem:[#allocation3 + $0x48] sm:$0xff] }
  0xf8   :  { %181 = vst.msk [vmem:[#allocation2 + $0x20] sm:$0xff] %vm176_vm1, %v158_v34  ;;  %v3413_v38 = vpop.f32.mrb[6].mxu0  ;;  %3422 = vmatprep.mubr.msk.f32.mxu1 %vm176_vm1, %v4120_v36  ;;  %v194_v32 = vld [vmem:[#allocation3 + $0x40] sm:$0xff] }
  0xf9   :  { %v173_v40 = vadd.f32 %v3413_v38, %v43_v35  ;;  %v167_v41 = vpop.f32.mrb[7].mxu0  ;;  %3423 = vmatmul.mubr.msk.f32.vlgmr.msra.gmra.mrb[0].mxu1 %vm176_vm1, %v4128_v39  ;;  %v3718_v34 = vpack.c.bf16 %v195_v33, %v194_v32  ;;  %v196_v35 = vld [vmem:[#allocation3 + $0x50] sm:$0xff] }
  0xfa   :  { %v168_v42 = vadd.f32 %v167_v41, %v42_v37  ;;  %v4138_v44 = vld [vmem:[#allocation2 + $0x18] sm:$0xff]  ;;  %3713 = vmatpush3.bf16.msra.mxu1 %v4164_v51 }
  0xfb   :  { %184 = vst.msk [vmem:[#allocation2 + $0x38] sm:$0xff] %vm176_vm1, %v173_v40  ;;  %v4133_v43 = vld [vmem:[#allocation2 + $0x10] sm:$0xff]  ;;  %3715 = vmatprep.subr.bf16.mxu1 %v4176_v54  ;;  %3719 = vmatprep.subr.bf16.mxu0 %v3718_v34  ;;  %v197_v37 = vld [vmem:[#allocation3 + $0x58] sm:$0xff] }
  0xfc   :  { %183 = vst.msk [vmem:[#allocation2 + $0x30] sm:$0xff] %vm176_vm1, %v168_v42  ;;  %3425 = vmatprep.mubr.msk.f32.mxu1 %vm176_vm1, %v4133_v43  ;;  %v3722_v38 = vpack.c.bf16 %v197_v37, %v196_v35 }
  0xfd   :  { %3426 = vmatmul.mubr.msk.f32.gmra.mrb[2].mxu1 %vm176_vm1, %v4138_v44 }
  0xfe   :  { %v4146_v46 = vld [vmem:[#allocation2 + $0x28] sm:$0xff]  ;;  %3717 = vmatpush3.bf16.msra.mxu1 %v4176_v54 }
  0xff   :  { %v4142_v45 = vld [vmem:[#allocation2 + $0x20] sm:$0xff] }
 0x100   :  { %3428 = vmatprep.mubr.msk.f32.mxu1 %vm176_vm1, %v4142_v45 }
 0x101   :  { %3429 = vmatmul.mubr.msk.f32.gmra.mrb[4].mxu1 %vm176_vm1, %v4146_v46 }
 0x102   :  { %v4154_v48 = vld [vmem:[#allocation2 + $0x38] sm:$0xff] }
 0x103   :  { %v4150_v47 = vld [vmem:[#allocation2 + $0x30] sm:$0xff] }
 0x104   :  { %3431 = vmatprep.mubr.msk.f32.mxu1 %vm176_vm1, %v4150_v47 }
 0x105   :  { %3432 = vmatmul.mubr.msk.f32.gmra.mrb[6].mxu1 %vm176_vm1, %v4154_v48 }
 0x1cc   :  { %v3424_v56 = vpop.f32.mrb[0].mxu1 }
 0x1cd   :  { %v325_v57 = vadd.f32 %v3424_v56, %v3101_v55  ;;  %v319_v58 = vpop.f32.mrb[1].mxu1 }
 0x1ce   :  { %v320_v59 = vadd.f32 %v3101_v55, %v319_v58 }
 0x1cf   :  { %368 = vrot.lane.b32.xlu1 %v325_v57, %s4022_s12 }
 0x1d0   :  { %v3427_v60 = vpop.f32.mrb[2].mxu1  ;;  %366 = vrot.lane.b32.xlu0 %v320_v59, %s4022_s12 }
 0x1d1   :  { %v329_v61 = vpop.f32.mrb[3].mxu1  ;;  %v335_v6 = vadd.f32 %v3427_v60, %v3101_v55 }
 0x1d2   :  { %v330_v4 = vadd.f32 %v3101_v55, %v329_v61 }
 0x1d4   :  { %v3430_v62 = vpop.f32.mrb[4].mxu1 }
 0x1d5   :  { %v345_v63 = vadd.f32 %v3430_v62, %v3101_v55  ;;  %v339_v0 = vpop.f32.mrb[5].mxu1 }
 0x1d6   :  { %v340_v1 = vadd.f32 %v3101_v55, %v339_v0 }
 0x1d7   :  { %376 = vrot.lane.b32.xlu1 %v345_v63, %s4022_s12 }
 0x1d8   :  { %v3433_v2 = vpop.f32.mrb[6].mxu1  ;;  %374 = vrot.lane.b32.xlu0 %v340_v1, %s4022_s12 }
 0x1d9   :  { %v349_v3 = vpop.f32.mrb[7].mxu1  ;;  %v355_v7 = vadd.f32 %v3433_v2, %v3101_v55 }
 0x1da   :  { %v350_v5 = vadd.f32 %v3101_v55, %v349_v3 }
 0x1dc   :  { %378 = vrot.lane.b32.xlu1 %v350_v5, %s4022_s12  ;;  %370 = vrot.lane.b32.xlu0 %v330_v4, %s4022_s12 }
 0x1e0   :  { %380 = vrot.lane.b32.xlu1 %v355_v7, %s4022_s12  ;;  %372 = vrot.lane.b32.xlu0 %v335_v6, %s4022_s12 }
 0x1e4   :  { %398 = vrot.lane.b32.xlu1 %v340_v1, %s4023_s13  ;;  %390 = vrot.lane.b32.xlu0 %v320_v59, %s4023_s13 }
 0x1e8   :  { %400 = vrot.lane.b32.xlu1 %v345_v63, %s4023_s13  ;;  %392 = vrot.lane.b32.xlu0 %v325_v57, %s4023_s13 }
 0x1ec   :  { %402 = vrot.lane.b32.xlu1 %v350_v5, %s4023_s13  ;;  %394 = vrot.lane.b32.xlu0 %v330_v4, %s4023_s13 }
 0x1f0   :  { %404 = vrot.lane.b32.xlu1 %v355_v7, %s4023_s13  ;;  %396 = vrot.lane.b32.xlu0 %v335_v6, %s4023_s13 }
 0x241   :  { %v369_v8 = vpop.permute.xlu1 %368 }
 0x242   :  { %v367_v9 = vpop.permute.xlu0 %366  ;;  %v415_v11 = vmul.f32 %v369_v8, %v325_v57  ;;  %v556_v26 = vmul.f32 %v369_v8, %v345_v63 }
 0x243   :  { %v414_v10 = vmul.f32 %v367_v9, %v320_v59  ;;  %v555_v24 = vmul.f32 %v367_v9, %v340_v1 }
 0x245   :  { %3442 = vmatprep.mubr.msk.f32.mxu0 %vm176_vm1, %v414_v10 }
 0x246   :  { %3443 = vmatmul.mubr.msk.f32.vlgmr.msra.gmra.mrb[8].mxu0 %vm176_vm1, %v415_v11 }
 0x247   :  { %3721 = vmatpush3.bf16.msra.mxu0 %v3718_v34 }
 0x248   :  { %3723 = vmatprep.subr.bf16.mxu0 %v3722_v38 }
 0x249   :  { %v377_v12 = vpop.permute.xlu1 %376 }
 0x24a   :  { %v375_v13 = vpop.permute.xlu0 %374  ;;  %v552_v15 = vmul.f32 %v377_v12, %v325_v57  ;;  %v419_v27 = vmul.f32 %v377_v12, %v345_v63 }
 0x24b   :  { %v551_v14 = vmul.f32 %v375_v13, %v320_v59  ;;  %v418_v25 = vmul.f32 %v375_v13, %v340_v1  ;;  %3725 = vmatpush3.bf16.msra.mxu0 %v3722_v38 }
 0x24d   :  { %3462 = vmatprep.mubr.msk.f32.mxu1 %vm176_vm1, %v551_v14 }
 0x24e   :  { %v379_v16 = vpop.permute.xlu1 %378  ;;  %3463 = vmatmul.mubr.msk.f32.vlgmr.msra.gmra.mrb[8].mxu1 %vm176_vm1, %v552_v15  ;;  %v371_v17 = vpop.permute.xlu0 %370 }
 0x24f   :  { %v553_v18 = vmul.f32 %v379_v16, %v330_v4  ;;  %v416_v19 = vmul.f32 %v371_v17, %v330_v4  ;;  %v420_v28 = vmul.f32 %v379_v16, %v350_v5  ;;  %v557_v29 = vmul.f32 %v371_v17, %v350_v5 }
 0x251   :  { %3445 = vmatprep.mubr.msk.f32.mxu0 %vm176_vm1, %v416_v19  ;;  %3465 = vmatprep.mubr.msk.f32.mxu1 %vm176_vm1, %v553_v18 }
 0x252   :  { %v381_v20 = vpop.permute.xlu1 %380  ;;  %v373_v21 = vpop.permute.xlu0 %372 }
 0x253   :  { %v554_v22 = vmul.f32 %v381_v20, %v335_v6  ;;  %v417_v23 = vmul.f32 %v373_v21, %v335_v6  ;;  %v421_v30 = vmul.f32 %v381_v20, %v355_v7  ;;  %v558_v31 = vmul.f32 %v373_v21, %v355_v7 }
 0x255   :  { %3446 = vmatmul.mubr.msk.f32.gmra.mrb[10].mxu0 %vm176_vm1, %v417_v23  ;;  %3466 = vmatmul.mubr.msk.f32.gmra.mrb[10].mxu1 %vm176_vm1, %v554_v22 }
 0x256   :  { %3448 = vmatprep.mubr.msk.f32.mxu0 %vm176_vm1, %v418_v25  ;;  %3468 = vmatprep.mubr.msk.f32.mxu1 %vm176_vm1, %v555_v24 }
 0x259   :  { %3449 = vmatmul.mubr.msk.f32.gmra.mrb[12].mxu0 %vm176_vm1, %v419_v27  ;;  %3469 = vmatmul.mubr.msk.f32.gmra.mrb[12].mxu1 %vm176_vm1, %v556_v26 }
 0x25a   :  { %3451 = vmatprep.mubr.msk.f32.mxu0 %vm176_vm1, %v420_v28  ;;  %3471 = vmatprep.mubr.msk.f32.mxu1 %vm176_vm1, %v557_v29 }
 0x25d   :  { %3452 = vmatmul.mubr.msk.f32.gmra.mrb[14].mxu0 %vm176_vm1, %v421_v30  ;;  %3472 = vmatmul.mubr.msk.f32.gmra.mrb[14].mxu1 %vm176_vm1, %v558_v31 }
 0x319   :  { %v3444_v40 = vpop.f32.mrb[8].mxu0 }
 0x31a   :  { %v512_v41 = vpop.f32.mrb[9].mxu0 }
 0x321   :  { %v3464_v42 = vpop.f32.mrb[8].mxu1 }
 0x322   :  { %v689_v49 = vmax.f32 %v3444_v40, %v3464_v42  ;;  %v649_v50 = vpop.f32.mrb[9].mxu1 }
 0x323   :  { %v688_v52 = vmax.f32 %v512_v41, %v649_v50 }
 0x324   :  { %v697_v53 = vsub.f32 %v3444_v40, %v689_v49  ;;  %v721_v55 = vsub.f32 %v3464_v42, %v689_v49 }
 0x325   :  { %v696_v56 = vsub.f32 %v512_v41, %v688_v52  ;;  %v720_v57 = vsub.f32 %v649_v50, %v688_v52 }
 0x326   :  { %v706_v58 = vmul.f32 1.442695, %v697_v53  ;;  %v730_v59 = vmul.f32 1.442695, %v721_v55  ;;  %v4214_v53 = vpop.permute.xlu1 %398  ;;  %v4216_v55 = vpop.permute.xlu0 %390 }
 0x327   :  { %v704_v60 = vmul.f32 1.442695, %v696_v56  ;;  %v728_v61 = vmul.f32 1.442695, %v720_v57 }
 0x328   :  { %3819 = vpow2.f32 %v706_v58  ;;  %v3447_v62 = vpop.f32.mrb[10].mxu0  ;;  %v3467_v63 = vpop.f32.mrb[10].mxu1 }
 0x329   :  { %3821 = vpow2.f32 %v730_v59  ;;  %v691_v0 = vmax.f32 %v3447_v62, %v3467_v63  ;;  %v522_v1 = vpop.f32.mrb[11].mxu0  ;;  %v659_v2 = vpop.f32.mrb[11].mxu1 }
 0x32a   :  { %3823 = vpow2.f32 %v704_v60  ;;  %v690_v3 = vmax.f32 %v522_v1, %v659_v2 }
 0x32b   :  { %3825 = vpow2.f32 %v728_v61  ;;  %v699_v4 = vsub.f32 %v3447_v62, %v691_v0  ;;  %v723_v5 = vsub.f32 %v3467_v63, %v691_v0  ;;  %v401_v0 = vpop.permute.xlu1 %400 }
 0x32c   :  { %v698_v6 = vsub.f32 %v522_v1, %v690_v3  ;;  %v722_v7 = vsub.f32 %v659_v2, %v690_v3  ;;  %v3450_v8 = vpop.f32.mrb[12].mxu0  ;;  %v3470_v9 = vpop.f32.mrb[12].mxu1 }
 0x32d   :  { %v710_v10 = vmul.f32 1.442695, %v699_v4  ;;  %v734_v11 = vmul.f32 1.442695, %v723_v5  ;;  %v693_v12 = vmax.f32 %v3450_v8, %v3470_v9  ;;  %v532_v13 = vpop.f32.mrb[13].mxu0  ;;  %v669_v14 = vpop.f32.mrb[13].mxu1 }
 0x32e   :  { %v708_v15 = vmul.f32 1.442695, %v698_v6  ;;  %v732_v16 = vmul.f32 1.442695, %v722_v7  ;;  %v692_v17 = vmax.f32 %v532_v13, %v669_v14  ;;  %v393_v1 = vpop.permute.xlu0 %392 }
 0x32f   :  { %3827 = vpow2.f32 %v710_v10  ;;  %v701_v18 = vsub.f32 %v3450_v8, %v693_v12  ;;  %v725_v19 = vsub.f32 %v3470_v9, %v693_v12 }
 0x330   :  { %3829 = vpow2.f32 %v734_v11  ;;  %v700_v20 = vsub.f32 %v532_v13, %v692_v17  ;;  %v724_v21 = vsub.f32 %v669_v14, %v692_v17  ;;  %v3453_v22 = vpop.f32.mrb[14].mxu0  ;;  %v3473_v23 = vpop.f32.mrb[14].mxu1 }
 0x331   :  { %3831 = vpow2.f32 %v708_v15  ;;  %v714_v24 = vmul.f32 1.442695, %v701_v18  ;;  %v738_v25 = vmul.f32 1.442695, %v725_v19  ;;  %v695_v26 = vmax.f32 %v3453_v22, %v3473_v23  ;;  %v542_v27 = vpop.f32.mrb[15].mxu0  ;;  %v679_v28 = vpop.f32.mrb[15].mxu1 }
 0x332   :  { %v3820_v29 = vpop.eup %3819  ;;  %3833 = vpow2.f32 %v732_v16  ;;  %v712_v30 = vmul.f32 1.442695, %v700_v20  ;;  %v694_v31 = vmax.f32 %v542_v27, %v679_v28  ;;  %v736_v33 = vmul.f32 1.442695, %v724_v21  ;;  %v403_v13 = vpop.permute.xlu1 %402 }
 0x333   :  { %v3822_v32 = vpop.eup %3821  ;;  %3835 = vpow2.f32 %v714_v24  ;;  %v703_v34 = vsub.f32 %v3453_v22, %v695_v26  ;;  %v727_v35 = vsub.f32 %v3473_v23, %v695_v26  ;;  %v395_v14 = vpop.permute.xlu0 %394 }
 0x334   :  { %v3824_v37 = vpop.eup %3823  ;;  %v745_v38 = vadd.f32 %v3822_v32, %v3820_v29  ;;  %3837 = vpow2.f32 %v738_v25  ;;  %v702_v40 = vsub.f32 %v542_v27, %v694_v31  ;;  %v726_v41 = vsub.f32 %v679_v28, %v694_v31 }
 0x335   :  { %v3826_v42 = vpop.eup %3825  ;;  %3839 = vpow2.f32 %v712_v30  ;;  %v718_v49 = vmul.f32 1.442695, %v703_v34  ;;  %v742_v52 = vmul.f32 1.442695, %v727_v35 }
 0x336   :  { %3841 = vrcp.f32 %v745_v38  ;;  %v744_v50 = vadd.f32 %v3826_v42, %v3824_v37  ;;  %v716_v56 = vmul.f32 1.442695, %v702_v40  ;;  %v740_v57 = vmul.f32 1.442695, %v726_v41 }
 0x337   :  { %3843 = vpow2.f32 %v736_v33  ;;  %v397_v33 = vpop.permute.xlu0 %396 }
 0x338   :  { %3845 = vrcp.f32 %v744_v50 }
 0x339   :  { %v3828_v58 = vpop.eup %3827  ;;  %3847 = vpow2.f32 %v718_v49 }
 0x33a   :  { %v3830_v59 = vpop.eup %3829  ;;  %3849 = vpow2.f32 %v742_v52 }
 0x33b   :  { %v3832_v60 = vpop.eup %3831  ;;  %v747_v61 = vadd.f32 %v3830_v59, %v3828_v58  ;;  %3851 = vpow2.f32 %v716_v56 }
 0x33c   :  { %v3834_v62 = vpop.eup %3833  ;;  %3853 = vpow2.f32 %v740_v57 }
 0x33d   :  { %v3836_v63 = vpop.eup %3835  ;;  %3855 = vrcp.f32 %v747_v61  ;;  %v746_v2 = vadd.f32 %v3834_v62, %v3832_v60 }
 0x33e   :  { %v3838_v3 = vpop.eup %3837 }
 0x33f   :  { %v3840_v4 = vpop.eup %3839  ;;  %3857 = vrcp.f32 %v746_v2  ;;  %v749_v5 = vadd.f32 %v3838_v3, %v3836_v63 }
 0x340   :  { %v3842_v6 = vpop.eup %3841 }
 0x341   :  { %v3844_v7 = vpop.eup %3843  ;;  %v761_v8 = vmul.f32 %v3842_v6, %v3820_v29  ;;  %v777_v9 = vmul.f32 %v3842_v6, %v3822_v32  ;;  %3859 = vrcp.f32 %v749_v5  ;;  %v405_v32 = vpop.permute.xlu1 %404 }
 0x342   :  { %v3846_v10 = vpop.eup %3845  ;;  %v748_v11 = vadd.f32 %v3844_v7, %v3840_v4 }
 0x343   :  { %v3848_v12 = vpop.eup %3847  ;;  %v769_v15 = vmul.f32 %v761_v8, %v393_v1  ;;  %v785_v16 = vmul.f32 %v777_v9, %v401_v0  ;;  %v760_v17 = vmul.f32 %v3846_v10, %v3824_v37  ;;  %v776_v18 = vmul.f32 %v3846_v10, %v3826_v42 }
 0x344   :  { %v3850_v19 = vpop.eup %3849  ;;  %3861 = vrcp.f32 %v748_v11 }
 0x345   :  { %v3852_v20 = vpop.eup %3851  ;;  %v751_v21 = vadd.f32 %v3850_v19, %v3848_v12  ;;  %v768_v22 = vmul.f32 %v760_v17, %v4216_v55  ;;  %v784_v23 = vmul.f32 %v776_v18, %v4214_v53  ;;  %v793_v24 = vadd.f32 %v785_v16, %v769_v15 }
 0x346   :  { %v3854_v25 = vpop.eup %3853 }
 0x347   :  { %v3856_v26 = vpop.eup %3855  ;;  %3863 = vrcp.f32 %v751_v21  ;;  %v750_v27 = vadd.f32 %v3854_v25, %v3852_v20  ;;  %v792_v28 = vadd.f32 %v784_v23, %v768_v22 }
 0x348   :  { %v763_v29 = vmul.f32 %v3856_v26, %v3828_v58  ;;  %v779_v30 = vmul.f32 %v3856_v26, %v3830_v59 }
 0x349   :  { %v3858_v31 = vpop.eup %3857  ;;  %3865 = vrcp.f32 %v750_v27  ;;  %3482 = vmatprep.mubr.msk.f32.mxu0 %vm176_vm1, %v792_v28 }
 0x34a   :  { %3483 = vmatmul.mubr.msk.f32.vlgmr.msra.gmra.mrb[16].mxu0 %vm176_vm1, %v793_v24  ;;  %v762_v34 = vmul.f32 %v3858_v31, %v3832_v60  ;;  %v778_v35 = vmul.f32 %v3858_v31, %v3834_v62  ;;  %v771_v37 = vmul.f32 %v763_v29, %v397_v33  ;;  %v787_v38 = vmul.f32 %v779_v30, %v405_v32 }
 0x34b   :  { %v3860_v40 = vpop.eup %3859 }
 0x34c   :  { %v770_v41 = vmul.f32 %v762_v34, %v395_v14  ;;  %v786_v42 = vmul.f32 %v778_v35, %v403_v13  ;;  %v795_v49 = vadd.f32 %v787_v38, %v771_v37  ;;  %v765_v50 = vmul.f32 %v3860_v40, %v3836_v63 }
 0x34d   :  { %v781_v52 = vmul.f32 %v3860_v40, %v3838_v3 }
 0x34e   :  { %v3862_v56 = vpop.eup %3861  ;;  %v794_v57 = vadd.f32 %v786_v42, %v770_v41  ;;  %v773_v58 = vmul.f32 %v765_v50, %v401_v0 }
 0x34f   :  { %v764_v59 = vmul.f32 %v3862_v56, %v3840_v4  ;;  %v780_v61 = vmul.f32 %v3862_v56, %v3844_v7  ;;  %v789_v2 = vmul.f32 %v781_v52, %v393_v1 }
 0x350   :  { %3485 = vmatprep.mubr.msk.f32.mxu0 %vm176_vm1, %v794_v57 }
 0x351   :  { %v3864_v5 = vpop.eup %3863  ;;  %3486 = vmatmul.mubr.msk.f32.gmra.mrb[18].mxu0 %vm176_vm1, %v795_v49  ;;  %v772_v60 = vmul.f32 %v764_v59, %v4214_v53  ;;  %v788_v62 = vmul.f32 %v780_v61, %v4216_v55  ;;  %v797_v6 = vadd.f32 %v789_v2, %v773_v58  ;;  %v3126_v53 = vld [vmem:[#allocation3 + $0xa1] ss:$0 sm:$0xff] }
 0x352   :  { %v767_v8 = vmul.f32 %v3864_v5, %v3848_v12  ;;  %v783_v9 = vmul.f32 %v3864_v5, %v3850_v19 }
 0x353   :  { %v3866_v63 = vpop.eup %3865  ;;  %v796_v3 = vadd.f32 %v788_v62, %v772_v60 }
 0x354   :  { %v766_v10 = vmul.f32 %v3866_v63, %v3852_v20  ;;  %v782_v11 = vmul.f32 %v3866_v63, %v3854_v25  ;;  %v775_v0 = vmul.f32 %v767_v8, %v405_v32  ;;  %v791_v4 = vmul.f32 %v783_v9, %v397_v33 }
 0x355   :  { %3488 = vmatprep.mubr.msk.f32.mxu0 %vm176_vm1, %v796_v3 }
 0x356   :  { %3489 = vmatmul.mubr.msk.f32.gmra.mrb[20].mxu0 %vm176_vm1, %v797_v6  ;;  %v774_v1 = vmul.f32 %v766_v10, %v403_v13  ;;  %v790_v7 = vmul.f32 %v782_v11, %v395_v14  ;;  %v799_v15 = vadd.f32 %v791_v4, %v775_v0 }
 0x358   :  { %v798_v16 = vadd.f32 %v790_v7, %v774_v1 }
 0x35a   :  { %3491 = vmatprep.mubr.msk.f32.mxu0 %vm176_vm1, %v798_v16 }
 0x35b   :  { %3492 = vmatmul.mubr.msk.f32.gmra.mrb[22].mxu0 %vm176_vm1, %v799_v15 }
 0x41d   :  { %v3484_v55 = vpop.f32.mrb[16].mxu0 }
 0x41e   :  { %v900_v12 = vadd.f32 %v3484_v55, %v3126_v53  ;;  %v894_v17 = vpop.f32.mrb[17].mxu0 }
 0x41f   :  { %v895_v18 = vadd.f32 %v3126_v53, %v894_v17 }
 0x420   :  { %v934_v19 = vadd.f32 %v900_v12, %v4128_v39 }
 0x421   :  { %v933_v20 = vadd.f32 %v895_v18, %v4120_v36 }
 0x422   :  { %v944_v21 = vsel %vm176_vm1, %v934_v19, 0.0 }
 0x423   :  { %945 = vadd.xlane.f32.xlu1 %v944_v21  ;;  %v941_v13 = vsel %vm176_vm1, %v933_v20, 0.0 }
 0x424   :  { %942 = vadd.xlane.f32.xlu0 %v941_v13  ;;  %v3487_v14 = vpop.f32.mrb[18].mxu0 }
 0x425   :  { %v904_v22 = vpop.f32.mrb[19].mxu0  ;;  %v910_v23 = vadd.f32 %v3487_v14, %v3126_v53 }
 0x426   :  { %v905_v24 = vadd.f32 %v3126_v53, %v904_v22 }
 0x427   :  { %v936_v39 = vadd.f32 %v910_v23, %v4138_v44  ;;  %v199_v23 = vld [vmem:[#allocation3 + $0x20] sm:$0xff] }
 0x428   :  { %v935_v25 = vadd.f32 %v905_v24, %v4133_v43  ;;  %v200_v24 = vld [vmem:[#allocation3 + $0x28] sm:$0xff] }
 0x429   :  { %v3490_v26 = vpop.f32.mrb[20].mxu0  ;;  %v950_v32 = vsel %vm176_vm1, %v936_v39, 0.0 }
 0x42a   :  { %v920_v27 = vadd.f32 %v3490_v26, %v3126_v53  ;;  %v914_v28 = vpop.f32.mrb[21].mxu0  ;;  %v947_v29 = vsel %vm176_vm1, %v935_v25, 0.0  ;;  %v201_v26 = vld [vmem:[#allocation3 + $0x30] sm:$0xff] }
 0x42b   :  { %v915_v36 = vadd.f32 %v3126_v53, %v914_v28  ;;  %948 = vadd.xlane.f32.xlu0 %v947_v29  ;;  %v204_v29 = vld [vmem:[#allocation3 + $0x60] sm:$0xff] }
 0x42c   :  { %v938_v33 = vadd.f32 %v920_v27, %v4146_v46  ;;  %v202_v27 = vld [vmem:[#allocation3 + $0x38] sm:$0xff] }
 0x42d   :  { %v937_v30 = vadd.f32 %v915_v36, %v4142_v45  ;;  %v3730_v28 = vpack.c.bf16 %v202_v27, %v201_v26  ;;  %v206_v36 = vld [vmem:[#allocation3 + $0x70] sm:$0xff] }
 0x42e   :  { %v3493_v31 = vpop.f32.mrb[22].mxu0  ;;  %v956_v44 = vsel %vm176_vm1, %v938_v33, 0.0 }
 0x42f   :  { %v930_v34 = vadd.f32 %v3493_v31, %v3126_v53  ;;  %v924_v35 = vpop.f32.mrb[23].mxu0  ;;  %v953_v43 = vsel %vm176_vm1, %v937_v30, 0.0  ;;  %951 = vadd.xlane.f32.xlu0 %v950_v32  ;;  %v207_v31 = vld [vmem:[#allocation3 + $0x78] sm:$0xff] }
 0x430   :  { %v925_v37 = vadd.f32 %v3126_v53, %v924_v35  ;;  %954 = vadd.xlane.f32.xlu1 %v953_v43  ;;  %v3738_v32 = vpack.c.bf16 %v207_v31, %v206_v36 }
 0x431   :  { %v940_v40 = vadd.f32 %v930_v34, %v4154_v48  ;;  %v209_v34 = vld [vmem:[#allocation3 + $0x88] sm:$0xff] }
 0x432   :  { %v939_v38 = vadd.f32 %v925_v37, %v4150_v47 }
 0x433   :  { %957 = vadd.xlane.f32.xlu0 %v956_v44  ;;  %v962_v41 = vsel %vm176_vm1, %v940_v40, 0.0 }
 0x434   :  { %v959_v45 = vsel %vm176_vm1, %v939_v38, 0.0 }
 0x435   :  { %960 = vadd.xlane.f32.xlu1 %v959_v45 }
 0x437   :  { %963 = vadd.xlane.f32.xlu0 %v962_v41 }
 0x4b0   :  { %v946_v46 = vpop.xlane.xlu1 %945 }
 0x4b1   :  { %v967_v42 = vmul.f32 0.03125, %v946_v46  ;;  %v943_v49 = vpop.xlane.xlu0 %942 }
 0x4b2   :  { %v966_v50 = vmul.f32 0.03125, %v943_v49 }
 0x4b3   :  { %v4246_v52 = vsub.f32 %v934_v19, %v967_v42 }
 0x4b4   :  { %v4248_v56 = vsub.f32 %v933_v20, %v966_v50 }
 0x4b5   :  { %v983_v47 = vmul.f32 %v4246_v52, %v4246_v52 }
 0x4b6   :  { %v982_v48 = vmul.f32 %v4248_v56, %v4248_v56 }
 0x4b7   :  { %v993_v57 = vsel %vm176_vm1, %v983_v47, 0.0 }
 0x4b8   :  { %994 = vadd.xlane.f32.xlu0 %v993_v57  ;;  %v949_v58 = vpop.xlane.xlu0 %948  ;;  %v990_v59 = vsel %vm176_vm1, %v982_v48, 0.0 }
 0x4b9   :  { %v968_v61 = vmul.f32 0.03125, %v949_v58  ;;  %991 = vadd.xlane.f32.xlu1 %v990_v59  ;;  %v3135_v58 = vld [vmem:[#allocation3 + $0xa4] ss:$0 sm:$0xff] }
 0x4bb   :  { %v4256_v2 = vsub.f32 %v935_v25, %v968_v61  ;;  %v3726_v25 = vpack.c.bf16 %v200_v24, %v199_v23 }
 0x4bc   :  { %v952_v5 = vpop.xlane.xlu0 %951 }
 0x4bd   :  { %v955_v60 = vpop.xlane.xlu1 %954  ;;  %v969_v62 = vmul.f32 0.03125, %v952_v5  ;;  %v984_v6 = vmul.f32 %v4256_v2, %v4256_v2  ;;  %3727 = vmatprep.subr.bf16.mxu1 %v3726_v25 }
 0x4be   :  { %v970_v8 = vmul.f32 0.03125, %v955_v60  ;;  %3729 = vmatpush3.bf16.msra.mxu1 %v3726_v25 }
 0x4bf   :  { %v4260_v9 = vsub.f32 %v936_v39, %v969_v62  ;;  %v996_v63 = vsel %vm176_vm1, %v984_v6, 0.0  ;;  %3731 = vmatprep.subr.bf16.mxu1 %v3730_v28  ;;  %v205_v39 = vld [vmem:[#allocation3 + $0x68] sm:$0xff]  ;;  %v3136_v6 = vld [vmem:[#allocation3 + $0xa5] ss:$0 sm:$0xff] }
 0x4c0   :  { %v4263_v3 = vsub.f32 %v937_v30, %v970_v8  ;;  %997 = vadd.xlane.f32.xlu1 %v996_v63  ;;  %v958_v10 = vpop.xlane.xlu0 %957  ;;  %v3734_v30 = vpack.c.bf16 %v205_v39, %v204_v29 }
 0x4c1   :  { %v971_v11 = vmul.f32 0.03125, %v958_v10  ;;  %v985_v0 = vmul.f32 %v4260_v9, %v4260_v9 }
 0x4c2   :  { %v961_v4 = vpop.xlane.xlu1 %960  ;;  %v986_v1 = vmul.f32 %v4263_v3, %v4263_v3  ;;  %3733 = vmatpush3.bf16.msra.mxu1 %v3730_v28  ;;  %3735 = vmatprep.subr.bf16.mxu0 %v3734_v30 }
 0x4c3   :  { %v972_v7 = vmul.f32 0.03125, %v961_v4  ;;  %v4269_v15 = vsub.f32 %v938_v33, %v971_v11  ;;  %v999_v16 = vsel %vm176_vm1, %v985_v0, 0.0  ;;  %v208_v33 = vld [vmem:[#allocation3 + $0x80] sm:$0xff]  ;;  %3737 = vmatpush3.bf16.msra.mxu0 %v3734_v30 }
 0x4c4   :  { %v1002_v53 = vsel %vm176_vm1, %v986_v1, 0.0  ;;  %1000 = vadd.xlane.f32.xlu0 %v999_v16  ;;  %v964_v55 = vpop.xlane.xlu0 %963  ;;  %3739 = vmatprep.subr.bf16.mxu0 %v3738_v32  ;;  %v3742_v35 = vpack.c.bf16 %v209_v34, %v208_v33  ;;  %v211_v33 = vld [vmem:[#allocation3 + $0x98] sm:$0xff] }
 0x4c5   :  { %v4273_v12 = vsub.f32 %v939_v38, %v972_v7  ;;  %1003 = vadd.xlane.f32.xlu1 %v1002_v53  ;;  %v973_v17 = vmul.f32 0.03125, %v964_v55  ;;  %v987_v18 = vmul.f32 %v4269_v15, %v4269_v15 }
 0x4c7   :  { %v4277_v19 = vsub.f32 %v940_v40, %v973_v17  ;;  %v988_v20 = vmul.f32 %v4273_v12, %v4273_v12  ;;  %v1005_v21 = vsel %vm176_vm1, %v987_v18, 0.0  ;;  %3741 = vmatpush3.bf16.msra.mxu0 %v3738_v32 }
 0x4c8   :  { %1006 = vadd.xlane.f32.xlu0 %v1005_v21  ;;  %3743 = vmatprep.subr.bf16.mxu0 %v3742_v35 }
 0x4c9   :  { %v1008_v13 = vsel %vm176_vm1, %v988_v20, 0.0  ;;  %v989_v14 = vmul.f32 %v4277_v19, %v4277_v19 }
 0x4ca   :  { %1009 = vadd.xlane.f32.xlu1 %v1008_v13 }
 0x4cb   :  { %v1011_v22 = vsel %vm176_vm1, %v989_v14, 0.0  ;;  %3745 = vmatpush3.bf16.msra.mxu0 %v3742_v35  ;;  %v3137_v35 = vld [vmem:[#allocation3 + $0xa2] ss:$0 sm:$0xff] }
 0x4cc   :  { %1012 = vadd.xlane.f32.xlu0 %v1011_v22 }
 0x545   :  { %v995_v43 = vpop.xlane.xlu0 %994 }
 0x546   :  { %v1015_v37 = vmul.f32 0.03125, %v995_v43  ;;  %v992_v38 = vpop.xlane.xlu1 %991 }
 0x547   :  { %v1014_v44 = vmul.f32 0.03125, %v992_v38 }
 0x548   :  { %v1023_v40 = vadd.f32 1e-05, %v1015_v37 }
 0x549   :  { %v1022_v45 = vadd.f32 1e-05, %v1014_v44 }
 0x54a   :  { %3867 = vrsqrt.f32 %v1023_v40 }
 0x54b   :  { %3869 = vrsqrt.f32 %v1022_v45 }
 0x54d   :  { %v998_v41 = vpop.xlane.xlu1 %997 }
 0x54e   :  { %v1016_v46 = vmul.f32 0.03125, %v998_v41 }
 0x550   :  { %v1024_v42 = vadd.f32 1e-05, %v1016_v46 }
 0x551   :  { %v1001_v49 = vpop.xlane.xlu0 %1000 }
 0x552   :  { %3871 = vrsqrt.f32 %v1024_v42  ;;  %v1004_v50 = vpop.xlane.xlu1 %1003  ;;  %v1017_v47 = vmul.f32 0.03125, %v1001_v49 }
 0x553   :  { %v1018_v48 = vmul.f32 0.03125, %v1004_v50 }
 0x554   :  { %v3868_v57 = vpop.eup %3867  ;;  %v1025_v59 = vadd.f32 1e-05, %v1017_v47 }
 0x555   :  { %v3870_v61 = vpop.eup %3869  ;;  %v1039_v5 = vmul.f32 %v3868_v57, %v4246_v52  ;;  %v1026_v60 = vadd.f32 1e-05, %v1018_v48  ;;  %v1007_v62 = vpop.xlane.xlu0 %1006 }
 0x556   :  { %3873 = vrsqrt.f32 %v1025_v59  ;;  %v1019_v8 = vmul.f32 0.03125, %v1007_v62  ;;  %v1038_v63 = vmul.f32 %v3870_v61, %v4248_v56 }
 0x557   :  { %v1051_v10 = vmul.f32 %v3135_v58, %v1039_v5  ;;  %3875 = vrsqrt.f32 %v1026_v60  ;;  %v1010_v11 = vpop.xlane.xlu1 %1009 }
 0x558   :  { %v1020_v0 = vmul.f32 0.03125, %v1010_v11  ;;  %v1027_v4 = vadd.f32 1e-05, %v1019_v8  ;;  %v1050_v1 = vmul.f32 %v3135_v58, %v1038_v63  ;;  %v3146_v11 = vld [vmem:[#allocation3 + $0xa3] ss:$0 sm:$0xff] }
 0x559   :  { %v4288_v7 = vadd.f32 %v3136_v6, %v1051_v10  ;;  %v1013_v16 = vpop.xlane.xlu0 %1012 }
 0x55a   :  { %v1028_v53 = vadd.f32 1e-05, %v1020_v0  ;;  %3877 = vrsqrt.f32 %v1027_v4  ;;  %v1021_v55 = vmul.f32 0.03125, %v1013_v16  ;;  %v4290_v52 = vadd.f32 %v3136_v6, %v1050_v1 }
 0x55b   :  { %1071 = vst.msk [vmem:[#allocation2 + $0x8] sm:$0xff] %vm176_vm1, %v4288_v7 }
 0x55c   :  { %v3872_v17 = vpop.eup %3871  ;;  %3879 = vrsqrt.f32 %v1028_v53  ;;  %v1029_v56 = vadd.f32 1e-05, %v1021_v55  ;;  %1070 = vst.msk [vmem:[#allocation2] sm:$0xff] %vm176_vm1, %v4290_v52  ;;  %3502 = vmatprep.mubr.msk.f32.mxu1 %vm176_vm1, %v4290_v52 }
 0x55d   :  { %3503 = vmatmul.mubr.msk.f32.vlgmr.msra.gmra.mrb[16].mxu1 %vm176_vm1, %v4288_v7  ;;  %v1040_v18 = vmul.f32 %v3872_v17, %v4256_v2 }
 0x55e   :  { %3881 = vrsqrt.f32 %v1029_v56 }
 0x55f   :  { %v1052_v20 = vmul.f32 %v3135_v58, %v1040_v18 }
 0x560   :  { %v3874_v21 = vpop.eup %3873 }
 0x561   :  { %v3876_v13 = vpop.eup %3875  ;;  %v4301_v14 = vadd.f32 %v3136_v6, %v1052_v20  ;;  %v1041_v22 = vmul.f32 %v3874_v21, %v4260_v9 }
 0x562   :  { %v1042_v23 = vmul.f32 %v3876_v13, %v4263_v3 }
 0x563   :  { %1072 = vst.msk [vmem:[#allocation2 + $0x10] sm:$0xff] %vm176_vm1, %v4301_v14  ;;  %3505 = vmatprep.mubr.msk.f32.mxu1 %vm176_vm1, %v4301_v14  ;;  %v1053_v24 = vmul.f32 %v3135_v58, %v1041_v22 }
 0x564   :  { %v3878_v25 = vpop.eup %3877  ;;  %v1054_v26 = vmul.f32 %v3135_v58, %v1042_v23 }
 0x565   :  { %v4309_v2 = vadd.f32 %v3136_v6, %v1053_v24  ;;  %v1043_v27 = vmul.f32 %v3878_v25, %v4269_v15 }
 0x566   :  { %v3880_v28 = vpop.eup %3879  ;;  %v4312_v29 = vadd.f32 %v3136_v6, %v1054_v26 }
 0x567   :  { %1073 = vst.msk [vmem:[#allocation2 + $0x18] sm:$0xff] %vm176_vm1, %v4309_v2  ;;  %3506 = vmatmul.mubr.msk.f32.gmra.mrb[18].mxu1 %vm176_vm1, %v4309_v2  ;;  %v1055_v9 = vmul.f32 %v3135_v58, %v1043_v27  ;;  %v1044_v3 = vmul.f32 %v3880_v28, %v4273_v12 }
 0x568   :  { %v3882_v39 = vpop.eup %3881  ;;  %1074 = vst.msk [vmem:[#allocation2 + $0x20] sm:$0xff] %vm176_vm1, %v4312_v29  ;;  %3508 = vmatprep.mubr.msk.f32.mxu1 %vm176_vm1, %v4312_v29 }
 0x569   :  { %v4323_v15 = vadd.f32 %v3136_v6, %v1055_v9  ;;  %v1056_v36 = vmul.f32 %v3135_v58, %v1044_v3  ;;  %v1045_v30 = vmul.f32 %v3882_v39, %v4277_v19  ;;  %v210_v19 = vld [vmem:[#allocation3 + $0x90] sm:$0xff] }
 0x56a   :  { %v3746_v34 = vpack.c.bf16 %v211_v33, %v210_v19 }
 0x56b   :  { %1075 = vst.msk [vmem:[#allocation2 + $0x28] sm:$0xff] %vm176_vm1, %v4323_v15  ;;  %3509 = vmatmul.mubr.msk.f32.gmra.mrb[20].mxu1 %vm176_vm1, %v4323_v15  ;;  %v4330_v31 = vadd.f32 %v3136_v6, %v1056_v36  ;;  %v1057_v12 = vmul.f32 %v3135_v58, %v1045_v30 }
 0x56c   :  { %3747 = vmatprep.subr.bf16.mxu0 %v3746_v34 }
 0x56d   :  { %1076 = vst.msk [vmem:[#allocation2 + $0x30] sm:$0xff] %vm176_vm1, %v4330_v31  ;;  %3511 = vmatprep.mubr.msk.f32.mxu1 %vm176_vm1, %v4330_v31  ;;  %v4336_v32 = vadd.f32 %v3136_v6, %v1057_v12  ;;  %3749 = vmatpush3.bf16.msra.mxu0 %v3746_v34 }
 0x56e   :  { %3759 = vmatprep.subr.bf16.mxu0 %v4164_v51 }
 0x56f   :  { %1077 = vst.msk [vmem:[#allocation2 + $0x38] sm:$0xff] %vm176_vm1, %v4336_v32  ;;  %3512 = vmatmul.mubr.msk.f32.gmra.mrb[22].mxu1 %vm176_vm1, %v4336_v32 }
 0x630   :  { %v3504_v43 = vpop.f32.mrb[16].mxu1 }
 0x631   :  { %v1178_v37 = vadd.f32 %v3504_v43, %v3137_v35  ;;  %v1172_v38 = vpop.f32.mrb[17].mxu1 }
 0x632   :  { %v1173_v44 = vadd.f32 %v3137_v35, %v1172_v38 }
 0x633   :  { %v1212_v45 = vmax.f32 %v1178_v37, 0.0 }
 0x634   :  { %v1211_v40 = vmax.f32 %v1173_v44, 0.0 }
 0x636   :  { %3530 = vmatprep.mubr.msk.f32.mxu0 %vm1223_vm2, %v1211_v40 }
 0x637   :  { %3531 = vmatmul.mubr.msk.f32.vlgmr.msra.gmra.mrb[24].mxu0 %vm1223_vm2, %v1212_v45 }
 0x638   :  { %3761 = vmatpush3.bf16.msra.mxu0 %v4164_v51 }
 0x639   :  { %3763 = vmatprep.subr.bf16.mxu0 %v4176_v54 }
 0x63a   :  { %v3507_v41 = vpop.f32.mrb[18].mxu1 }
 0x63b   :  { %v1188_v46 = vadd.f32 %v3507_v41, %v3137_v35  ;;  %v1182_v42 = vpop.f32.mrb[19].mxu1 }
 0x63c   :  { %v1183_v49 = vadd.f32 %v3137_v35, %v1182_v42  ;;  %3765 = vmatpush3.bf16.msra.mxu0 %v4176_v54 }
 0x63d   :  { %v1214_v48 = vmax.f32 %v1188_v46, 0.0 }
 0x63e   :  { %v1213_v50 = vmax.f32 %v1183_v49, 0.0  ;;  %v3510_v47 = vpop.f32.mrb[20].mxu1 }
 0x63f   :  { %v1198_v57 = vadd.f32 %v3510_v47, %v3137_v35  ;;  %v1192_v58 = vpop.f32.mrb[21].mxu1 }
 0x640   :  { %v1193_v59 = vadd.f32 %v3137_v35, %v1192_v58  ;;  %3533 = vmatprep.mubr.msk.f32.mxu0 %vm1223_vm2, %v1213_v50 }
 0x641   :  { %3534 = vmatmul.mubr.msk.f32.gmra.mrb[26].mxu0 %vm1223_vm2, %v1214_v48  ;;  %v1216_v60 = vmax.f32 %v1198_v57, 0.0 }
 0x642   :  { %v1215_v61 = vmax.f32 %v1193_v59, 0.0  ;;  %v3513_v5 = vpop.f32.mrb[22].mxu1 }
 0x643   :  { %v1208_v62 = vadd.f32 %v3513_v5, %v3137_v35  ;;  %v1202_v6 = vpop.f32.mrb[23].mxu1 }
 0x644   :  { %v1203_v8 = vadd.f32 %v3137_v35, %v1202_v6  ;;  %3536 = vmatprep.mubr.msk.f32.mxu0 %vm1223_vm2, %v1215_v61 }
 0x645   :  { %3537 = vmatmul.mubr.msk.f32.gmra.mrb[28].mxu0 %vm1223_vm2, %v1216_v60  ;;  %v1218_v10 = vmax.f32 %v1208_v62, 0.0 }
 0x646   :  { %v1217_v63 = vmax.f32 %v1203_v8, 0.0 }
 0x648   :  { %3539 = vmatprep.mubr.msk.f32.mxu0 %vm1223_vm2, %v1217_v63 }
 0x649   :  { %3540 = vmatmul.mubr.msk.f32.gmra.mrb[30].mxu0 %vm1223_vm2, %v1218_v10 }
 0x70a   :  { %v3532_v0 = vpop.f32.mrb[24].mxu0 }
 0x70b   :  { %v1320_v4 = vadd.f32 %v3532_v0, %v3146_v11  ;;  %v1314_v1 = vpop.f32.mrb[25].mxu0 }
 0x70c   :  { %v1315_v16 = vadd.f32 %v3146_v11, %v1314_v1 }
 0x70d   :  { %v1354_v53 = vadd.f32 %v1320_v4, %v4288_v7 }
 0x70e   :  { %v1353_v55 = vadd.f32 %v1315_v16, %v4290_v52 }
 0x70f   :  { %v1364_v17 = vsel %vm176_vm1, %v1354_v53, 0.0 }
 0x710   :  { %1365 = vadd.xlane.f32.xlu0 %v1364_v17  ;;  %v1361_v56 = vsel %vm176_vm1, %v1353_v55, 0.0 }
 0x711   :  { %1362 = vadd.xlane.f32.xlu1 %v1361_v56 }
 0x714   :  { %v3535_v18 = vpop.f32.mrb[26].mxu0 }
 0x715   :  { %v1330_v20 = vadd.f32 %v3535_v18, %v3146_v11  ;;  %v1324_v21 = vpop.f32.mrb[27].mxu0 }
 0x716   :  { %v1325_v13 = vadd.f32 %v3146_v11, %v1324_v21  ;;  %v1498_v21 = vld [vmem:[#allocation3 + $0xa8] sm:$0xff] }
 0x717   :  { %v1356_v22 = vadd.f32 %v1330_v20, %v4309_v2 }
 0x718   :  { %v3538_v23 = vpop.f32.mrb[28].mxu0  ;;  %v1355_v24 = vadd.f32 %v1325_v13, %v4301_v14  ;;  %v1499_v13 = vld [vmem:[#allocation3 + $0xb0] sm:$0xff] }
 0x719   :  { %v1340_v25 = vadd.f32 %v3538_v23, %v3146_v11  ;;  %v1334_v26 = vpop.f32.mrb[29].mxu0  ;;  %v1370_v7 = vsel %vm176_vm1, %v1356_v22, 0.0  ;;  %v1500_v23 = vld [vmem:[#allocation3 + $0xb8] sm:$0xff] }
 0x71a   :  { %v1335_v52 = vadd.f32 %v3146_v11, %v1334_v26  ;;  %1371 = vadd.xlane.f32.xlu0 %v1370_v7  ;;  %v1367_v27 = vsel %vm176_vm1, %v1355_v24, 0.0 }
 0x71b   :  { %1368 = vadd.xlane.f32.xlu1 %v1367_v27  ;;  %v1358_v28 = vadd.f32 %v1340_v25, %v4323_v15 }
 0x71c   :  { %v3541_v9 = vpop.f32.mrb[30].mxu0  ;;  %v1357_v3 = vadd.f32 %v1335_v52, %v4312_v29 }
 0x71d   :  { %v1350_v39 = vadd.f32 %v3541_v9, %v3146_v11  ;;  %v1344_v36 = vpop.f32.mrb[31].mxu0  ;;  %v1376_v2 = vsel %vm176_vm1, %v1358_v28, 0.0 }
 0x71e   :  { %v1345_v30 = vadd.f32 %v3146_v11, %v1344_v36  ;;  %1377 = vadd.xlane.f32.xlu0 %v1376_v2  ;;  %v1373_v14 = vsel %vm176_vm1, %v1357_v3, 0.0 }
 0x71f   :  { %1374 = vadd.xlane.f32.xlu1 %v1373_v14  ;;  %v1360_v12 = vadd.f32 %v1350_v39, %v4336_v32 }
 0x720   :  { %v1359_v19 = vadd.f32 %v1345_v30, %v4330_v31 }
 0x721   :  { %v1382_v33 = vsel %vm176_vm1, %v1360_v12, 0.0 }
 0x722   :  { %1383 = vadd.xlane.f32.xlu0 %v1382_v33  ;;  %v1379_v15 = vsel %vm176_vm1, %v1359_v19, 0.0  ;;  %v3155_v33 = vld [vmem:[#allocation3 + $0xa6] ss:$0 sm:$0xff] }
 0x723   :  { %1380 = vadd.xlane.f32.xlu1 %v1379_v15 }
 0x79d   :  { %v1366_v29 = vpop.xlane.xlu0 %1365 }
 0x79e   :  { %v1386_v34 = vmul.f32 0.03125, %v1366_v29  ;;  %v1363_v35 = vpop.xlane.xlu1 %1362 }
 0x79f   :  { %v1385_v43 = vmul.f32 0.03125, %v1363_v35 }
 0x7a0   :  { %v4370_v37 = vsub.f32 %v1354_v53, %v1386_v34 }
 0x7a1   :  { %v4372_v38 = vsub.f32 %v1353_v55, %v1385_v43 }
 0x7a2   :  { %v1402_v44 = vmul.f32 %v4370_v37, %v4370_v37 }
 0x7a3   :  { %v1401_v31 = vmul.f32 %v4372_v38, %v4372_v38 }
 0x7a4   :  { %v1412_v32 = vsel %vm176_vm1, %v1402_v44, 0.0  ;;  %v3156_v44 = vld [vmem:[#allocation3 + $0xa7] ss:$0 sm:$0xff] }
 0x7a5   :  { %1413 = vadd.xlane.f32.xlu0 %v1412_v32  ;;  %v1409_v40 = vsel %vm176_vm1, %v1401_v31, 0.0 }
 0x7a6   :  { %1410 = vadd.xlane.f32.xlu1 %v1409_v40 }
 0x7a7   :  { %v1372_v45 = vpop.xlane.xlu0 %1371 }
 0x7a8   :  { %v1388_v41 = vmul.f32 0.03125, %v1372_v45  ;;  %v1369_v46 = vpop.xlane.xlu1 %1368 }
 0x7a9   :  { %v1387_v42 = vmul.f32 0.03125, %v1369_v46 }
 0x7aa   :  { %v4380_v49 = vsub.f32 %v1356_v22, %v1388_v41  ;;  %v3750_v22 = vpack.c.bf16 %v1499_v13, %v1498_v21 }
 0x7ab   :  { %v4382_v50 = vsub.f32 %v1355_v24, %v1387_v42  ;;  %v1378_v47 = vpop.xlane.xlu0 %1377  ;;  %v1501_v24 = vld [vmem:[#allocation3 + $0xc0] sm:$0xff] }
 0x7ac   :  { %v1390_v48 = vmul.f32 0.03125, %v1378_v47  ;;  %v1375_v57 = vpop.xlane.xlu1 %1374  ;;  %v1404_v58 = vmul.f32 %v4380_v49, %v4380_v49  ;;  %3751 = vmatprep.subr.bf16.mxu1 %v3750_v22  ;;  %v3754_v25 = vpack.c.bf16 %v1501_v24, %v1500_v23 }
 0x7ad   :  { %v1389_v59 = vmul.f32 0.03125, %v1375_v57  ;;  %v1403_v61 = vmul.f32 %v4382_v50, %v4382_v50  ;;  %3753 = vmatpush3.bf16.msra.mxu1 %v3750_v22 }
 0x7ae   :  { %v4388_v5 = vsub.f32 %v1358_v28, %v1390_v48  ;;  %v1418_v60 = vsel %vm176_vm1, %v1404_v58, 0.0  ;;  %3755 = vmatprep.subr.bf16.mxu1 %v3754_v25 }
 0x7af   :  { %v4391_v62 = vsub.f32 %v1357_v3, %v1389_v59  ;;  %1419 = vadd.xlane.f32.xlu0 %v1418_v60  ;;  %v1384_v6 = vpop.xlane.xlu0 %1383  ;;  %v1415_v8 = vsel %vm176_vm1, %v1403_v61, 0.0 }
 0x7b0   :  { %v1392_v63 = vmul.f32 0.03125, %v1384_v6  ;;  %1416 = vadd.xlane.f32.xlu1 %v1415_v8  ;;  %v1381_v10 = vpop.xlane.xlu1 %1380  ;;  %v1406_v11 = vmul.f32 %v4388_v5, %v4388_v5 }
 0x7b1   :  { %v1391_v0 = vmul.f32 0.03125, %v1381_v10  ;;  %v1405_v4 = vmul.f32 %v4391_v62, %v4391_v62  ;;  %3757 = vmatpush3.bf16.msra.mxu1 %v3754_v25 }
 0x7b2   :  { %v4398_v1 = vsub.f32 %v1360_v12, %v1392_v63  ;;  %v1424_v16 = vsel %vm176_vm1, %v1406_v11, 0.0  ;;  %3767 = vmatprep.subr.bf16.mxu1 %v4164_v51 }
 0x7b3   :  { %v4401_v53 = vsub.f32 %v1359_v19, %v1391_v0  ;;  %1425 = vadd.xlane.f32.xlu0 %v1424_v16  ;;  %v1421_v55 = vsel %vm176_vm1, %v1405_v4, 0.0 }
 0x7b4   :  { %1422 = vadd.xlane.f32.xlu1 %v1421_v55  ;;  %v1408_v17 = vmul.f32 %v4398_v1, %v4398_v1 }
 0x7b5   :  { %v1407_v56 = vmul.f32 %v4401_v53, %v4401_v53 }
 0x7b6   :  { %v1430_v18 = vsel %vm176_vm1, %v1408_v17, 0.0 }
 0x7b7   :  { %1431 = vadd.xlane.f32.xlu0 %v1430_v18  ;;  %v1427_v20 = vsel %vm176_vm1, %v1407_v56, 0.0 }
 0x7b8   :  { %1428 = vadd.xlane.f32.xlu1 %v1427_v20 }
 0x832   :  { %v1414_v26 = vpop.xlane.xlu0 %1413 }
 0x833   :  { %v1434_v7 = vmul.f32 0.03125, %v1414_v26  ;;  %v1411_v52 = vpop.xlane.xlu1 %1410 }
 0x834   :  { %v1433_v27 = vmul.f32 0.03125, %v1411_v52  ;;  %v3157_v52 = vld [vmem:[#allocation3 + $0x148] ss:$0 sm:$0xff] }
 0x835   :  { %v1442_v28 = vadd.f32 1e-05, %v1434_v7 }
 0x836   :  { %v1441_v9 = vadd.f32 1e-05, %v1433_v27 }
 0x837   :  { %3883 = vrsqrt.f32 %v1442_v28 }
 0x838   :  { %3885 = vrsqrt.f32 %v1441_v9 }
 0x83c   :  { %v1420_v3 = vpop.xlane.xlu0 %1419 }
 0x83d   :  { %v1436_v39 = vmul.f32 0.03125, %v1420_v3  ;;  %v1417_v36 = vpop.xlane.xlu1 %1416 }
 0x83e   :  { %v1435_v2 = vmul.f32 0.03125, %v1417_v36 }
 0x83f   :  { %v1444_v30 = vadd.f32 1e-05, %v1436_v39 }
 0x840   :  { %v1443_v14 = vadd.f32 1e-05, %v1435_v2  ;;  %v1426_v12 = vpop.xlane.xlu0 %1425 }
 0x841   :  { %v3884_v19 = vpop.eup %3883  ;;  %3887 = vrsqrt.f32 %v1444_v30  ;;  %v1438_v15 = vmul.f32 0.03125, %v1426_v12  ;;  %v1423_v29 = vpop.xlane.xlu1 %1422 }
 0x842   :  { %v3886_v34 = vpop.eup %3885  ;;  %v1458_v35 = vmul.f32 %v3884_v19, %v4370_v37  ;;  %3889 = vrsqrt.f32 %v1443_v14  ;;  %v1437_v43 = vmul.f32 0.03125, %v1423_v29 }
 0x843   :  { %v1457_v31 = vmul.f32 %v3886_v34, %v4372_v38  ;;  %v1446_v32 = vadd.f32 1e-05, %v1438_v15 }
 0x844   :  { %v1470_v40 = vmul.f32 %v3155_v33, %v1458_v35  ;;  %v1445_v45 = vadd.f32 1e-05, %v1437_v43  ;;  %v1432_v41 = vpop.xlane.xlu0 %1431 }
 0x845   :  { %v1469_v46 = vmul.f32 %v3155_v33, %v1457_v31  ;;  %3891 = vrsqrt.f32 %v1446_v32  ;;  %v1440_v42 = vmul.f32 0.03125, %v1432_v41  ;;  %v1429_v47 = vpop.xlane.xlu1 %1428 }
 0x846   :  { %v1482_v48 = vadd.f32 %v3156_v44, %v1470_v40  ;;  %3893 = vrsqrt.f32 %v1445_v45  ;;  %v1439_v57 = vmul.f32 0.03125, %v1429_v47 }
 0x847   :  { %v1481_v58 = vadd.f32 %v3156_v44, %v1469_v46  ;;  %v1448_v59 = vadd.f32 1e-05, %v1440_v42 }
 0x848   :  { %1490 = vst.msk [vmem:[#allocation2 + $0x8] sm:$0xff] %vm176_vm1, %v1482_v48  ;;  %v1447_v37 = vadd.f32 1e-05, %v1439_v57 }
 0x849   :  { %1489 = vst.msk [vmem:[#allocation2] sm:$0xff] %vm176_vm1, %v1481_v58  ;;  %3895 = vrsqrt.f32 %v1448_v59 }
 0x84a   :  { %3897 = vrsqrt.f32 %v1447_v37 }
 0x84b   :  { %v3888_v38 = vpop.eup %3887 }
 0x84c   :  { %v3890_v61 = vpop.eup %3889  ;;  %v1460_v60 = vmul.f32 %v3888_v38, %v4380_v49 }
 0x84d   :  { %v1459_v6 = vmul.f32 %v3890_v61, %v4382_v50 }
 0x84e   :  { %v1472_v8 = vmul.f32 %v3155_v33, %v1460_v60 }
 0x84f   :  { %v3892_v63 = vpop.eup %3891  ;;  %v1471_v10 = vmul.f32 %v3155_v33, %v1459_v6  ;;  %v4423_v56 = vld [vmem:[#allocation2 + $0x8] sm:$0xff] }
 0x850   :  { %v3894_v11 = vpop.eup %3893  ;;  %v1484_v0 = vadd.f32 %v3156_v44, %v1472_v8  ;;  %v1462_v4 = vmul.f32 %v3892_v63, %v4388_v5  ;;  %v4418_v16 = vld [vmem:[#allocation2] sm:$0xff] }
 0x851   :  { %v1483_v55 = vadd.f32 %v3156_v44, %v1471_v10  ;;  %v1461_v17 = vmul.f32 %v3894_v11, %v4391_v62  ;;  %3550 = vmatprep.mubr.msk.f32.mxu1 %vm176_vm1, %v4418_v16 }
 0x852   :  { %1492 = vst.msk [vmem:[#allocation2 + $0x18] sm:$0xff] %vm176_vm1, %v1484_v0  ;;  %v1474_v49 = vmul.f32 %v3155_v33, %v1462_v4  ;;  %3551 = vmatmul.mubr.msk.f32.vlgmr.msra.gmra.mrb[24].mxu1 %vm176_vm1, %v4423_v56  ;;  %v1503_v4 = vld [vmem:[#allocation3 + $0xe8] sm:$0xff] }
 0x853   :  { %v3896_v50 = vpop.eup %3895  ;;  %1491 = vst.msk [vmem:[#allocation2 + $0x10] sm:$0xff] %vm176_vm1, %v1483_v55  ;;  %v1473_v5 = vmul.f32 %v3155_v33, %v1461_v17  ;;  %3769 = vmatpush3.bf16.msra.mxu1 %v4164_v51  ;;  %v1504_v55 = vld [vmem:[#allocation3 + $0xf0] sm:$0xff] }
 0x854   :  { %v3898_v18 = vpop.eup %3897  ;;  %v1486_v20 = vadd.f32 %v3156_v44, %v1474_v49  ;;  %v1464_v62 = vmul.f32 %v3896_v50, %v4398_v1  ;;  %3771 = vmatprep.subr.bf16.mxu1 %v4176_v54  ;;  %v3774_v17 = vpack.c.bf16 %v1504_v55, %v1503_v4  ;;  %v1505_v49 = vld [vmem:[#allocation3 + $0xf8] sm:$0xff]  ;;  %v1506_v50 = vld [vmem:[#allocation3 + $0x100] sm:$0xff] }
 0x855   :  { %v1485_v21 = vadd.f32 %v3156_v44, %v1473_v5  ;;  %v1463_v13 = vmul.f32 %v3898_v18, %v4401_v53  ;;  %v3778_v5 = vpack.c.bf16 %v1506_v50, %v1505_v49 }
 0x856   :  { %1494 = vst.msk [vmem:[#allocation2 + $0x28] sm:$0xff] %vm176_vm1, %v1486_v20  ;;  %v1476_v22 = vmul.f32 %v3155_v33, %v1464_v62  ;;  %3775 = vmatprep.subr.bf16.mxu0 %v3774_v17 }
 0x857   :  { %1493 = vst.msk [vmem:[#allocation2 + $0x20] sm:$0xff] %vm176_vm1, %v1485_v21  ;;  %v1475_v23 = vmul.f32 %v3155_v33, %v1463_v13  ;;  %3773 = vmatpush3.bf16.msra.mxu1 %v4176_v54 }
 0x858   :  { %v1488_v24 = vadd.f32 %v3156_v44, %v1476_v22 }
 0x859   :  { %v1487_v25 = vadd.f32 %v3156_v44, %v1475_v23  ;;  %v4442_v1 = vld [vmem:[#allocation2 + $0x18] sm:$0xff] }
 0x85a   :  { %1496 = vst.msk [vmem:[#allocation2 + $0x38] sm:$0xff] %vm176_vm1, %v1488_v24  ;;  %v4437_v51 = vld [vmem:[#allocation2 + $0x10] sm:$0xff] }
 0x85b   :  { %1495 = vst.msk [vmem:[#allocation2 + $0x30] sm:$0xff] %vm176_vm1, %v1487_v25  ;;  %3553 = vmatprep.mubr.msk.f32.mxu1 %vm176_vm1, %v4437_v51 }
 0x85c   :  { %3554 = vmatmul.mubr.msk.f32.gmra.mrb[26].mxu1 %vm176_vm1, %v4442_v1 }
 0x85d   :  { %v4450_v54 = vld [vmem:[#allocation2 + $0x28] sm:$0xff] }
 0x85e   :  { %v4446_v53 = vld [vmem:[#allocation2 + $0x20] sm:$0xff] }
 0x85f   :  { %3556 = vmatprep.mubr.msk.f32.mxu1 %vm176_vm1, %v4446_v53 }
 0x860   :  { %3557 = vmatmul.mubr.msk.f32.gmra.mrb[28].mxu1 %vm176_vm1, %v4450_v54 }
 0x861   :  { %v4458_v7 = vld [vmem:[#allocation2 + $0x38] sm:$0xff] }
 0x862   :  { %v4454_v26 = vld [vmem:[#allocation2 + $0x30] sm:$0xff] }
 0x863   :  { %3559 = vmatprep.mubr.msk.f32.mxu1 %vm176_vm1, %v4454_v26 }
 0x864   :  { %3560 = vmatmul.mubr.msk.f32.gmra.mrb[30].mxu1 %vm176_vm1, %v4458_v7 }
 0x925   :  { %v3552_v27 = vpop.f32.mrb[24].mxu1 }
 0x926   :  { %v1634_v28 = vadd.f32 %v3552_v27, %v3157_v52  ;;  %v1628_v9 = vpop.f32.mrb[25].mxu1 }
 0x927   :  { %v1629_v3 = vadd.f32 %v3157_v52, %v1628_v9 }
 0x928   :  { %1677 = vrot.lane.b32.xlu1 %v1634_v28, %s4022_s12 }
 0x92c   :  { %1675 = vrot.lane.b32.xlu1 %v1629_v3, %s4022_s12 }
 0x92f   :  { %v3555_v39 = vpop.f32.mrb[26].mxu1 }
 0x930   :  { %v1638_v36 = vpop.f32.mrb[27].mxu1  ;;  %v1644_v34 = vadd.f32 %v3555_v39, %v3157_v52 }
 0x931   :  { %v1639_v15 = vadd.f32 %v3157_v52, %v1638_v36 }
 0x933   :  { %v3558_v2 = vpop.f32.mrb[28].mxu1 }
 0x934   :  { %v1654_v30 = vadd.f32 %v3558_v2, %v3157_v52  ;;  %v1648_v14 = vpop.f32.mrb[29].mxu1 }
 0x935   :  { %v1649_v12 = vadd.f32 %v3157_v52, %v1648_v14 }
 0x936   :  { %1685 = vrot.lane.b32.xlu1 %v1654_v30, %s4022_s12 }
 0x937   :  { %1683 = vrot.lane.b32.xlu0 %v1649_v12, %s4022_s12  ;;  %v3561_v19 = vpop.f32.mrb[30].mxu1 }
 0x938   :  { %v1658_v33 = vpop.f32.mrb[31].mxu1  ;;  %v1664_v35 = vadd.f32 %v3561_v19, %v3157_v52 }
 0x939   :  { %v1659_v29 = vadd.f32 %v3157_v52, %v1658_v33 }
 0x93b   :  { %1679 = vrot.lane.b32.xlu0 %v1639_v15, %s4022_s12  ;;  %1687 = vrot.lane.b32.xlu1 %v1659_v29, %s4022_s12 }
 0x93f   :  { %1681 = vrot.lane.b32.xlu0 %v1644_v34, %s4022_s12  ;;  %1689 = vrot.lane.b32.xlu1 %v1664_v35, %s4022_s12 }
 0x943   :  { %1699 = vrot.lane.b32.xlu0 %v1629_v3, %s4023_s13  ;;  %1707 = vrot.lane.b32.xlu1 %v1649_v12, %s4023_s13 }
 0x947   :  { %1701 = vrot.lane.b32.xlu0 %v1634_v28, %s4023_s13  ;;  %1709 = vrot.lane.b32.xlu1 %v1654_v30, %s4023_s13 }
 0x94b   :  { %1703 = vrot.lane.b32.xlu0 %v1639_v15, %s4023_s13  ;;  %1711 = vrot.lane.b32.xlu1 %v1659_v29, %s4023_s13 }
 0x94f   :  { %1705 = vrot.lane.b32.xlu0 %v1644_v34, %s4023_s13  ;;  %1713 = vrot.lane.b32.xlu1 %v1664_v35, %s4023_s13 }
 0x99a   :  { %v1678_v43 = vpop.permute.xlu1 %1677 }
 0x99b   :  { %v1724_v32 = vmul.f32 %v1678_v43, %v1634_v28  ;;  %v1865_v6 = vmul.f32 %v1678_v43, %v1654_v30 }
 0x99e   :  { %v1676_v44 = vpop.permute.xlu1 %1675 }
 0x99f   :  { %v1723_v31 = vmul.f32 %v1676_v44, %v1629_v3  ;;  %v1864_v61 = vmul.f32 %v1676_v44, %v1649_v12 }
 0x9a1   :  { %3570 = vmatprep.mubr.msk.f32.mxu0 %vm176_vm1, %v1723_v31 }
 0x9a2   :  { %3571 = vmatmul.mubr.msk.f32.vlgmr.msra.gmra.mrb[32].mxu0 %vm176_vm1, %v1724_v32 }
 0x9a3   :  { %3777 = vmatpush3.bf16.msra.mxu0 %v3774_v17 }
 0x9a4   :  { %3779 = vmatprep.subr.bf16.mxu0 %v3778_v5 }
 0x9a7   :  { %3781 = vmatpush3.bf16.msra.mxu0 %v3778_v5 }
 0x9a8   :  { %v1686_v40 = vpop.permute.xlu1 %1685 }
 0x9a9   :  { %v1684_v45 = vpop.permute.xlu0 %1683  ;;  %v1861_v46 = vmul.f32 %v1686_v40, %v1634_v28  ;;  %v1728_v8 = vmul.f32 %v1686_v40, %v1654_v30 }
 0x9aa   :  { %v1860_v41 = vmul.f32 %v1684_v45, %v1629_v3  ;;  %v1727_v60 = vmul.f32 %v1684_v45, %v1649_v12 }
 0x9ac   :  { %3590 = vmatprep.mubr.msk.f32.mxu1 %vm176_vm1, %v1860_v41 }
 0x9ad   :  { %v1688_v42 = vpop.permute.xlu1 %1687  ;;  %3591 = vmatmul.mubr.msk.f32.vlgmr.msra.gmra.mrb[32].mxu1 %vm176_vm1, %v1861_v46  ;;  %v1680_v47 = vpop.permute.xlu0 %1679 }
 0x9ae   :  { %v1862_v48 = vmul.f32 %v1688_v42, %v1639_v15  ;;  %v1725_v57 = vmul.f32 %v1680_v47, %v1639_v15  ;;  %v1729_v63 = vmul.f32 %v1688_v42, %v1659_v29  ;;  %v1866_v10 = vmul.f32 %v1680_v47, %v1659_v29 }
 0x9b0   :  { %3573 = vmatprep.mubr.msk.f32.mxu0 %vm176_vm1, %v1725_v57  ;;  %3593 = vmatprep.mubr.msk.f32.mxu1 %vm176_vm1, %v1862_v48 }
 0x9b1   :  { %v1690_v58 = vpop.permute.xlu1 %1689  ;;  %v1682_v59 = vpop.permute.xlu0 %1681 }
 0x9b2   :  { %v1863_v37 = vmul.f32 %v1690_v58, %v1644_v34  ;;  %v1726_v38 = vmul.f32 %v1682_v59, %v1644_v34  ;;  %v1730_v11 = vmul.f32 %v1690_v58, %v1664_v35  ;;  %v1867_v0 = vmul.f32 %v1682_v59, %v1664_v35 }
 0x9b4   :  { %3574 = vmatmul.mubr.msk.f32.gmra.mrb[34].mxu0 %vm176_vm1, %v1726_v38  ;;  %3594 = vmatmul.mubr.msk.f32.gmra.mrb[34].mxu1 %vm176_vm1, %v1863_v37 }
 0x9b5   :  { %3576 = vmatprep.mubr.msk.f32.mxu0 %vm176_vm1, %v1727_v60  ;;  %3596 = vmatprep.mubr.msk.f32.mxu1 %vm176_vm1, %v1864_v61 }
 0x9b8   :  { %3577 = vmatmul.mubr.msk.f32.gmra.mrb[36].mxu0 %vm176_vm1, %v1728_v8  ;;  %3597 = vmatmul.mubr.msk.f32.gmra.mrb[36].mxu1 %vm176_vm1, %v1865_v6 }
 0x9b9   :  { %3579 = vmatprep.mubr.msk.f32.mxu0 %vm176_vm1, %v1729_v63  ;;  %3599 = vmatprep.mubr.msk.f32.mxu1 %vm176_vm1, %v1866_v10 }
 0x9bc   :  { %3580 = vmatmul.mubr.msk.f32.gmra.mrb[38].mxu0 %vm176_vm1, %v1730_v11  ;;  %3600 = vmatmul.mubr.msk.f32.gmra.mrb[38].mxu1 %vm176_vm1, %v1867_v0 }
 0xa75   :  { %v3572_v18 = vpop.f32.mrb[32].mxu0 }
 0xa76   :  { %v1821_v20 = vpop.f32.mrb[33].mxu0 }
 0xa80   :  { %v3592_v62 = vpop.f32.mrb[32].mxu1 }
 0xa81   :  { %v1998_v21 = vmax.f32 %v3572_v18, %v3592_v62  ;;  %v1958_v13 = vpop.f32.mrb[33].mxu1 }
 0xa82   :  { %v1997_v22 = vmax.f32 %v1821_v20, %v1958_v13 }
 0xa83   :  { %v2006_v23 = vsub.f32 %v3572_v18, %v1998_v21  ;;  %v2030_v24 = vsub.f32 %v3592_v62, %v1998_v21 }
 0xa84   :  { %v2005_v25 = vsub.f32 %v1821_v20, %v1997_v22  ;;  %v2029_v52 = vsub.f32 %v1958_v13, %v1997_v22  ;;  %v4494_v13 = vpop.permute.xlu1 %1707  ;;  %v4496_v22 = vpop.permute.xlu0 %1699 }
 0xa85   :  { %v2015_v27 = vmul.f32 1.442695, %v2006_v23  ;;  %v2039_v28 = vmul.f32 1.442695, %v2030_v24 }
 0xa86   :  { %v2013_v9 = vmul.f32 1.442695, %v2005_v25  ;;  %v2037_v3 = vmul.f32 1.442695, %v2029_v52 }
 0xa87   :  { %3899 = vpow2.f32 %v2015_v27  ;;  %v3575_v39 = vpop.f32.mrb[34].mxu0  ;;  %v3595_v36 = vpop.f32.mrb[34].mxu1 }
 0xa88   :  { %3901 = vpow2.f32 %v2039_v28  ;;  %v2000_v2 = vmax.f32 %v3575_v39, %v3595_v36  ;;  %v1831_v30 = vpop.f32.mrb[35].mxu0  ;;  %v1968_v14 = vpop.f32.mrb[35].mxu1 }
 0xa89   :  { %3903 = vpow2.f32 %v2013_v9  ;;  %v1999_v12 = vmax.f32 %v1831_v30, %v1968_v14 }
 0xa8a   :  { %3905 = vpow2.f32 %v2037_v3  ;;  %v2008_v19 = vsub.f32 %v3575_v39, %v2000_v2  ;;  %v2032_v33 = vsub.f32 %v3595_v36, %v2000_v2  ;;  %v1710_v39 = vpop.permute.xlu1 %1709  ;;  %v1702_v36 = vpop.permute.xlu0 %1701 }
 0xa8b   :  { %v2007_v15 = vsub.f32 %v1831_v30, %v1999_v12  ;;  %v2031_v29 = vsub.f32 %v1968_v14, %v1999_v12  ;;  %v3578_v34 = vpop.f32.mrb[36].mxu0  ;;  %v3598_v35 = vpop.f32.mrb[36].mxu1 }
 0xa8c   :  { %v2019_v43 = vmul.f32 1.442695, %v2008_v19  ;;  %v2043_v44 = vmul.f32 1.442695, %v2032_v33  ;;  %v2002_v31 = vmax.f32 %v3578_v34, %v3598_v35  ;;  %v1841_v32 = vpop.f32.mrb[37].mxu0  ;;  %v1978_v40 = vpop.f32.mrb[37].mxu1 }
 0xa8d   :  { %v2017_v45 = vmul.f32 1.442695, %v2007_v15  ;;  %v2041_v41 = vmul.f32 1.442695, %v2031_v29  ;;  %v2001_v46 = vmax.f32 %v1841_v32, %v1978_v40 }
 0xa8e   :  { %3907 = vpow2.f32 %v2019_v43  ;;  %v2010_v42 = vsub.f32 %v3578_v34, %v2002_v31  ;;  %v2034_v47 = vsub.f32 %v3598_v35, %v2002_v31  ;;  %v1704_v31 = vpop.permute.xlu0 %1703 }
 0xa8f   :  { %3909 = vpow2.f32 %v2043_v44  ;;  %v2009_v48 = vsub.f32 %v1841_v32, %v2001_v46  ;;  %v2033_v57 = vsub.f32 %v1978_v40, %v2001_v46  ;;  %v3581_v58 = vpop.f32.mrb[38].mxu0  ;;  %v3601_v59 = vpop.f32.mrb[38].mxu1 }
 0xa90   :  { %3911 = vpow2.f32 %v2017_v45  ;;  %v2023_v37 = vmul.f32 1.442695, %v2010_v42  ;;  %v2047_v38 = vmul.f32 1.442695, %v2034_v47  ;;  %v2004_v61 = vmax.f32 %v3581_v58, %v3601_v59  ;;  %v1851_v60 = vpop.f32.mrb[39].mxu0  ;;  %v1988_v6 = vpop.f32.mrb[39].mxu1 }
 0xa91   :  { %v3900_v8 = vpop.eup %3899  ;;  %3913 = vpow2.f32 %v2041_v41  ;;  %v2021_v63 = vmul.f32 1.442695, %v2009_v48  ;;  %v2003_v10 = vmax.f32 %v1851_v60, %v1988_v6  ;;  %v2045_v0 = vmul.f32 1.442695, %v2033_v57  ;;  %v1712_v44 = vpop.permute.xlu1 %1711 }
 0xa92   :  { %v3902_v11 = vpop.eup %3901  ;;  %3915 = vpow2.f32 %v2023_v37  ;;  %v2012_v4 = vsub.f32 %v3581_v58, %v2004_v61  ;;  %v2036_v55 = vsub.f32 %v3601_v59, %v2004_v61 }
 0xa93   :  { %v3904_v17 = vpop.eup %3903  ;;  %v2054_v49 = vadd.f32 %v3902_v11, %v3900_v8  ;;  %3917 = vpow2.f32 %v2047_v38  ;;  %v2011_v50 = vsub.f32 %v1851_v60, %v2003_v10  ;;  %v2035_v5 = vsub.f32 %v1988_v6, %v2003_v10  ;;  %v1706_v10 = vpop.permute.xlu0 %1705 }
 0xa94   :  { %v3906_v18 = vpop.eup %3905  ;;  %3919 = vpow2.f32 %v2021_v63  ;;  %v2027_v20 = vmul.f32 1.442695, %v2012_v4  ;;  %v2051_v21 = vmul.f32 1.442695, %v2036_v55 }
 0xa95   :  { %3921 = vrcp.f32 %v2054_v49  ;;  %v2053_v62 = vadd.f32 %v3906_v18, %v3904_v17  ;;  %v2025_v23 = vmul.f32 1.442695, %v2011_v50  ;;  %v2049_v24 = vmul.f32 1.442695, %v2035_v5  ;;  %v1714_v63 = vpop.permute.xlu1 %1713 }
 0xa96   :  { %3923 = vpow2.f32 %v2045_v0 }
 0xa97   :  { %3925 = vrcp.f32 %v2053_v62 }
 0xa98   :  { %v3908_v25 = vpop.eup %3907  ;;  %3927 = vpow2.f32 %v2027_v20 }
 0xa99   :  { %v3910_v52 = vpop.eup %3909  ;;  %3929 = vpow2.f32 %v2051_v21 }
 0xa9a   :  { %v3912_v27 = vpop.eup %3911  ;;  %v2056_v28 = vadd.f32 %v3910_v52, %v3908_v25  ;;  %3931 = vpow2.f32 %v2025_v23 }
 0xa9b   :  { %v3914_v9 = vpop.eup %3913  ;;  %3933 = vpow2.f32 %v2049_v24 }
 0xa9c   :  { %v3916_v3 = vpop.eup %3915  ;;  %3935 = vrcp.f32 %v2056_v28  ;;  %v2055_v2 = vadd.f32 %v3914_v9, %v3912_v27 }
 0xa9d   :  { %v3918_v30 = vpop.eup %3917 }
 0xa9e   :  { %v3920_v14 = vpop.eup %3919  ;;  %3937 = vrcp.f32 %v2055_v2  ;;  %v2058_v12 = vadd.f32 %v3918_v30, %v3916_v3 }
 0xa9f   :  { %v3922_v19 = vpop.eup %3921 }
 0xaa0   :  { %v3924_v33 = vpop.eup %3923  ;;  %v2070_v15 = vmul.f32 %v3922_v19, %v3900_v8  ;;  %v2086_v29 = vmul.f32 %v3922_v19, %v3902_v11  ;;  %3939 = vrcp.f32 %v2058_v12 }
 0xaa1   :  { %v3926_v34 = vpop.eup %3925  ;;  %v2057_v35 = vadd.f32 %v3924_v33, %v3920_v14 }
 0xaa2   :  { %v3928_v43 = vpop.eup %3927  ;;  %v2078_v32 = vmul.f32 %v2070_v15, %v1702_v36  ;;  %v2094_v40 = vmul.f32 %v2086_v29, %v1710_v39  ;;  %v2069_v45 = vmul.f32 %v3926_v34, %v3904_v17  ;;  %v2085_v41 = vmul.f32 %v3926_v34, %v3906_v18 }
 0xaa3   :  { %v3930_v46 = vpop.eup %3929  ;;  %3941 = vrcp.f32 %v2057_v35 }
 0xaa4   :  { %v3932_v42 = vpop.eup %3931  ;;  %v2060_v47 = vadd.f32 %v3930_v46, %v3928_v43  ;;  %v2077_v48 = vmul.f32 %v2069_v45, %v4496_v22  ;;  %v2093_v57 = vmul.f32 %v2085_v41, %v4494_v13  ;;  %v2102_v58 = vadd.f32 %v2094_v40, %v2078_v32 }
 0xaa5   :  { %v3934_v59 = vpop.eup %3933 }
 0xaa6   :  { %v3936_v37 = vpop.eup %3935  ;;  %3943 = vrcp.f32 %v2060_v47  ;;  %v2059_v38 = vadd.f32 %v3934_v59, %v3932_v42  ;;  %v2101_v61 = vadd.f32 %v2093_v57, %v2077_v48 }
 0xaa7   :  { %v2072_v60 = vmul.f32 %v3936_v37, %v3908_v25  ;;  %v2088_v6 = vmul.f32 %v3936_v37, %v3910_v52 }
 0xaa8   :  { %v3938_v8 = vpop.eup %3937  ;;  %3945 = vrcp.f32 %v2059_v38  ;;  %3610 = vmatprep.mubr.msk.f32.mxu0 %vm176_vm1, %v2101_v61 }
 0xaa9   :  { %3611 = vmatmul.mubr.msk.f32.vlgmr.msra.gmra.mrb[40].mxu0 %vm176_vm1, %v2102_v58  ;;  %v2071_v11 = vmul.f32 %v3938_v8, %v3912_v27  ;;  %v2087_v0 = vmul.f32 %v3938_v8, %v3914_v9  ;;  %v2080_v4 = vmul.f32 %v2072_v60, %v1706_v10  ;;  %v2096_v55 = vmul.f32 %v2088_v6, %v1714_v63 }
 0xaaa   :  { %v3940_v17 = vpop.eup %3939 }
 0xaab   :  { %v2079_v49 = vmul.f32 %v2071_v11, %v1704_v31  ;;  %v2095_v50 = vmul.f32 %v2087_v0, %v1712_v44  ;;  %v2104_v5 = vadd.f32 %v2096_v55, %v2080_v4  ;;  %v2074_v18 = vmul.f32 %v3940_v17, %v3916_v3 }
 0xaac   :  { %v2090_v20 = vmul.f32 %v3940_v17, %v3918_v30 }
 0xaad   :  { %v3942_v62 = vpop.eup %3941  ;;  %v2103_v21 = vadd.f32 %v2095_v50, %v2079_v49  ;;  %v2082_v23 = vmul.f32 %v2074_v18, %v1710_v39 }
 0xaae   :  { %v2073_v24 = vmul.f32 %v3942_v62, %v3920_v14  ;;  %v2089_v25 = vmul.f32 %v3942_v62, %v3924_v33  ;;  %v2098_v52 = vmul.f32 %v2090_v20, %v1702_v36 }
 0xaaf   :  { %3613 = vmatprep.mubr.msk.f32.mxu0 %vm176_vm1, %v2103_v21 }
 0xab0   :  { %v3944_v28 = vpop.eup %3943  ;;  %3614 = vmatmul.mubr.msk.f32.gmra.mrb[42].mxu0 %vm176_vm1, %v2104_v5  ;;  %v2081_v27 = vmul.f32 %v2073_v24, %v4494_v13  ;;  %v2097_v9 = vmul.f32 %v2089_v25, %v4496_v22  ;;  %v2106_v2 = vadd.f32 %v2098_v52, %v2082_v23  ;;  %v3182_v13 = vld [vmem:[#allocation3 + $0x149] ss:$0 sm:$0xff] }
 0xab1   :  { %v2076_v12 = vmul.f32 %v3944_v28, %v3928_v43  ;;  %v2092_v19 = vmul.f32 %v3944_v28, %v3930_v46 }
 0xab2   :  { %v3946_v3 = vpop.eup %3945  ;;  %v2105_v30 = vadd.f32 %v2097_v9, %v2081_v27 }
 0xab3   :  { %v2075_v15 = vmul.f32 %v3946_v3, %v3932_v42  ;;  %v2091_v29 = vmul.f32 %v3946_v3, %v3934_v59  ;;  %v2084_v39 = vmul.f32 %v2076_v12, %v1714_v63  ;;  %v2100_v14 = vmul.f32 %v2092_v19, %v1706_v10 }
 0xab4   :  { %3616 = vmatprep.mubr.msk.f32.mxu0 %vm176_vm1, %v2105_v30 }
 0xab5   :  { %3617 = vmatmul.mubr.msk.f32.gmra.mrb[44].mxu0 %vm176_vm1, %v2106_v2  ;;  %v2083_v36 = vmul.f32 %v2075_v15, %v1712_v44  ;;  %v2099_v33 = vmul.f32 %v2091_v29, %v1704_v31  ;;  %v2108_v34 = vadd.f32 %v2100_v14, %v2084_v39 }
 0xab7   :  { %v2107_v35 = vadd.f32 %v2099_v33, %v2083_v36 }
 0xab9   :  { %3619 = vmatprep.mubr.msk.f32.mxu0 %vm176_vm1, %v2107_v35 }
 0xaba   :  { %3620 = vmatmul.mubr.msk.f32.gmra.mrb[46].mxu0 %vm176_vm1, %v2108_v34 }
 0xb7c   :  { %v3612_v22 = vpop.f32.mrb[40].mxu0 }
 0xb7d   :  { %v2209_v43 = vadd.f32 %v3612_v22, %v3182_v13  ;;  %v2203_v32 = vpop.f32.mrb[41].mxu0 }
 0xb7e   :  { %v2204_v40 = vadd.f32 %v3182_v13, %v2203_v32 }
 0xb7f   :  { %v2243_v45 = vadd.f32 %v2209_v43, %v4423_v56 }
 0xb80   :  { %v2242_v41 = vadd.f32 %v2204_v40, %v4418_v16 }
 0xb81   :  { %v2253_v46 = vsel %vm176_vm1, %v2243_v45, 0.0 }
 0xb82   :  { %2254 = vadd.xlane.f32.xlu1 %v2253_v46  ;;  %v2250_v44 = vsel %vm176_vm1, %v2242_v41, 0.0 }
 0xb83   :  { %2251 = vadd.xlane.f32.xlu0 %v2250_v44  ;;  %v3615_v31 = vpop.f32.mrb[42].mxu0 }
 0xb84   :  { %v2213_v42 = vpop.f32.mrb[43].mxu0  ;;  %v2219_v47 = vadd.f32 %v3615_v31, %v3182_v13  ;;  %v1508_v31 = vld [vmem:[#allocation3 + $0xc8] sm:$0xff] }
 0xb85   :  { %v2214_v48 = vadd.f32 %v3182_v13, %v2213_v42  ;;  %v1509_v42 = vld [vmem:[#allocation3 + $0xd0] sm:$0xff] }
 0xb86   :  { %v2245_v56 = vadd.f32 %v2219_v47, %v4442_v1  ;;  %v3782_v47 = vpack.c.bf16 %v1509_v42, %v1508_v31 }
 0xb87   :  { %v2244_v57 = vadd.f32 %v2214_v48, %v4437_v51  ;;  %v1510_v48 = vld [vmem:[#allocation3 + $0xd8] sm:$0xff] }
 0xb88   :  { %v3618_v58 = vpop.f32.mrb[44].mxu0  ;;  %v2259_v6 = vsel %vm176_vm1, %v2245_v56, 0.0  ;;  %3783 = vmatprep.subr.bf16.mxu1 %v3782_v47 }
 0xb89   :  { %v2229_v59 = vadd.f32 %v3618_v58, %v3182_v13  ;;  %v2223_v37 = vpop.f32.mrb[45].mxu0  ;;  %v2256_v38 = vsel %vm176_vm1, %v2244_v57, 0.0  ;;  %3785 = vmatpush3.bf16.msra.mxu1 %v3782_v47 }
 0xb8a   :  { %v2224_v16 = vadd.f32 %v3182_v13, %v2223_v37  ;;  %2257 = vadd.xlane.f32.xlu0 %v2256_v38  ;;  %v1514_v37 = vld [vmem:[#allocation3 + $0x110] sm:$0xff]  ;;  %v1515_v38 = vld [vmem:[#allocation3 + $0x118] sm:$0xff] }
 0xb8b   :  { %v2247_v8 = vadd.f32 %v2229_v59, %v4450_v54  ;;  %v1513_v59 = vld [vmem:[#allocation3 + $0x108] sm:$0xff] }
 0xb8c   :  { %v2246_v61 = vadd.f32 %v2224_v16, %v4446_v53  ;;  %v1516_v16 = vld [vmem:[#allocation3 + $0x120] sm:$0xff] }
 0xb8d   :  { %v3621_v60 = vpop.f32.mrb[46].mxu0  ;;  %v2265_v1 = vsel %vm176_vm1, %v2247_v8, 0.0 }
 0xb8e   :  { %v2239_v63 = vadd.f32 %v3621_v60, %v3182_v13  ;;  %v2233_v10 = vpop.f32.mrb[47].mxu0  ;;  %v2262_v51 = vsel %vm176_vm1, %v2246_v61, 0.0  ;;  %2260 = vadd.xlane.f32.xlu0 %v2259_v6  ;;  %v1517_v60 = vld [vmem:[#allocation3 + $0x128] sm:$0xff]  ;;  %v1518_v6 = vld [vmem:[#allocation3 + $0x130] sm:$0xff] }
 0xb8f   :  { %v2234_v11 = vadd.f32 %v3182_v13, %v2233_v10  ;;  %2263 = vadd.xlane.f32.xlu1 %v2262_v51 }
 0xb90   :  { %v2249_v4 = vadd.f32 %v2239_v63, %v4458_v7 }
 0xb91   :  { %v2248_v0 = vadd.f32 %v2234_v11, %v4454_v26 }
 0xb92   :  { %2266 = vadd.xlane.f32.xlu0 %v2265_v1  ;;  %v2271_v55 = vsel %vm176_vm1, %v2249_v4, 0.0 }
 0xb93   :  { %v2268_v53 = vsel %vm176_vm1, %v2248_v0, 0.0 }
 0xb94   :  { %2269 = vadd.xlane.f32.xlu1 %v2268_v53 }
 0xb96   :  { %2272 = vadd.xlane.f32.xlu0 %v2271_v55 }
 0xc0f   :  { %v2255_v54 = vpop.xlane.xlu1 %2254 }
 0xc10   :  { %v2275_v17 = vmul.f32 0.03125, %v2255_v54  ;;  %v2252_v49 = vpop.xlane.xlu0 %2251 }
 0xc11   :  { %v2274_v50 = vmul.f32 0.03125, %v2252_v49 }
 0xc12   :  { %v4526_v5 = vsub.f32 %v2243_v45, %v2275_v17 }
 0xc13   :  { %v4528_v18 = vsub.f32 %v2242_v41, %v2274_v50 }
 0xc14   :  { %v2291_v26 = vmul.f32 %v4526_v5, %v4526_v5 }
 0xc15   :  { %v2290_v7 = vmul.f32 %v4528_v18, %v4528_v18 }
 0xc16   :  { %v2301_v20 = vsel %vm176_vm1, %v2291_v26, 0.0 }
 0xc17   :  { %2302 = vadd.xlane.f32.xlu0 %v2301_v20  ;;  %v2258_v62 = vpop.xlane.xlu0 %2257  ;;  %v2298_v21 = vsel %vm176_vm1, %v2290_v7, 0.0  ;;  %v3191_v7 = vld [vmem:[#allocation3 + $0x14c] ss:$0 sm:$0xff] }
 0xc18   :  { %v2276_v23 = vmul.f32 0.03125, %v2258_v62  ;;  %2299 = vadd.xlane.f32.xlu1 %v2298_v21 }
 0xc1a   :  { %v4536_v24 = vsub.f32 %v2244_v57, %v2276_v23  ;;  %v1511_v57 = vld [vmem:[#allocation3 + $0xe0] sm:$0xff] }
 0xc1b   :  { %v2261_v25 = vpop.xlane.xlu0 %2260  ;;  %v3786_v58 = vpack.c.bf16 %v1511_v57, %v1510_v48 }
 0xc1c   :  { %v2264_v52 = vpop.xlane.xlu1 %2263  ;;  %v2277_v28 = vmul.f32 0.03125, %v2261_v25  ;;  %v2292_v27 = vmul.f32 %v4536_v24, %v4536_v24 }
 0xc1d   :  { %v2278_v9 = vmul.f32 0.03125, %v2264_v52  ;;  %3787 = vmatprep.subr.bf16.mxu1 %v3786_v58  ;;  %v3192_v52 = vld [vmem:[#allocation3 + $0x14d] ss:$0 sm:$0xff] }
 0xc1e   :  { %v4540_v2 = vsub.f32 %v2245_v56, %v2277_v28  ;;  %v2304_v12 = vsel %vm176_vm1, %v2292_v27, 0.0  ;;  %3789 = vmatpush3.bf16.msra.mxu1 %v3786_v58  ;;  %v3790_v56 = vpack.c.bf16 %v1514_v37, %v1513_v59 }
 0xc1f   :  { %v4543_v19 = vsub.f32 %v2246_v61, %v2278_v9  ;;  %2305 = vadd.xlane.f32.xlu1 %v2304_v12  ;;  %v2267_v3 = vpop.xlane.xlu0 %2266  ;;  %v3794_v61 = vpack.c.bf16 %v1516_v16, %v1515_v38  ;;  %v1520_v16 = vld [vmem:[#allocation3 + $0x140] sm:$0xff] }
 0xc20   :  { %v2279_v30 = vmul.f32 0.03125, %v2267_v3  ;;  %v2293_v15 = vmul.f32 %v4540_v2, %v4540_v2  ;;  %3791 = vmatprep.subr.bf16.mxu0 %v3790_v56 }
 0xc21   :  { %v2270_v29 = vpop.xlane.xlu1 %2269  ;;  %v2294_v39 = vmul.f32 %v4543_v19, %v4543_v19  ;;  %3793 = vmatpush3.bf16.msra.mxu0 %v3790_v56 }
 0xc22   :  { %v2280_v14 = vmul.f32 0.03125, %v2270_v29  ;;  %v4549_v36 = vsub.f32 %v2247_v8, %v2279_v30  ;;  %v2307_v33 = vsel %vm176_vm1, %v2293_v15, 0.0  ;;  %3795 = vmatprep.subr.bf16.mxu0 %v3794_v61  ;;  %v3798_v8 = vpack.c.bf16 %v1518_v6, %v1517_v60  ;;  %v3193_v60 = vld [vmem:[#allocation3 + $0x14a] ss:$0 sm:$0xff] }
 0xc23   :  { %v2310_v34 = vsel %vm176_vm1, %v2294_v39, 0.0  ;;  %2308 = vadd.xlane.f32.xlu0 %v2307_v33  ;;  %v2273_v35 = vpop.xlane.xlu0 %2272 }
 0xc24   :  { %v4553_v13 = vsub.f32 %v2248_v0, %v2280_v14  ;;  %2311 = vadd.xlane.f32.xlu1 %v2310_v34  ;;  %v2281_v22 = vmul.f32 0.03125, %v2273_v35  ;;  %v2295_v43 = vmul.f32 %v4549_v36, %v4549_v36 }
 0xc25   :  { %3797 = vmatpush3.bf16.msra.mxu0 %v3794_v61 }
 0xc26   :  { %v4557_v32 = vsub.f32 %v2249_v4, %v2281_v22  ;;  %v2296_v40 = vmul.f32 %v4553_v13, %v4553_v13  ;;  %v2313_v45 = vsel %vm176_vm1, %v2295_v43, 0.0  ;;  %3799 = vmatprep.subr.bf16.mxu0 %v3798_v8 }
 0xc27   :  { %2314 = vadd.xlane.f32.xlu0 %v2313_v45 }
 0xc28   :  { %v2316_v41 = vsel %vm176_vm1, %v2296_v40, 0.0  ;;  %v2297_v46 = vmul.f32 %v4557_v32, %v4557_v32 }
 0xc29   :  { %2317 = vadd.xlane.f32.xlu1 %v2316_v41  ;;  %3801 = vmatpush3.bf16.msra.mxu0 %v3798_v8 }
 0xc2a   :  { %v2319_v44 = vsel %vm176_vm1, %v2297_v46, 0.0 }
 0xc2b   :  { %2320 = vadd.xlane.f32.xlu0 %v2319_v44 }
 0xca4   :  { %v2303_v63 = vpop.xlane.xlu0 %2302 }
 0xca5   :  { %v2323_v10 = vmul.f32 0.03125, %v2303_v63  ;;  %v2300_v51 = vpop.xlane.xlu1 %2299 }
 0xca6   :  { %v2322_v11 = vmul.f32 0.03125, %v2300_v51 }
 0xca7   :  { %v2331_v0 = vadd.f32 1e-05, %v2323_v10 }
 0xca8   :  { %v2330_v1 = vadd.f32 1e-05, %v2322_v11 }
 0xca9   :  { %3947 = vrsqrt.f32 %v2331_v0 }
 0xcaa   :  { %3949 = vrsqrt.f32 %v2330_v1 }
 0xcac   :  { %v2306_v4 = vpop.xlane.xlu1 %2305 }
 0xcad   :  { %v2324_v53 = vmul.f32 0.03125, %v2306_v4 }
 0xcaf   :  { %v2332_v55 = vadd.f32 1e-05, %v2324_v53 }
 0xcb0   :  { %v2309_v54 = vpop.xlane.xlu0 %2308 }
 0xcb1   :  { %3951 = vrsqrt.f32 %v2332_v55  ;;  %v2312_v17 = vpop.xlane.xlu1 %2311  ;;  %v2325_v49 = vmul.f32 0.03125, %v2309_v54 }
 0xcb2   :  { %v2326_v50 = vmul.f32 0.03125, %v2312_v17 }
 0xcb3   :  { %v3948_v26 = vpop.eup %3947  ;;  %v2333_v20 = vadd.f32 1e-05, %v2325_v49 }
 0xcb4   :  { %v3950_v62 = vpop.eup %3949  ;;  %v2347_v21 = vmul.f32 %v3948_v26, %v4526_v5  ;;  %v2334_v23 = vadd.f32 1e-05, %v2326_v50  ;;  %v2315_v25 = vpop.xlane.xlu0 %2314 }
 0xcb5   :  { %3953 = vrsqrt.f32 %v2333_v20  ;;  %v2327_v28 = vmul.f32 0.03125, %v2315_v25  ;;  %v2346_v27 = vmul.f32 %v3950_v62, %v4528_v18 }
 0xcb6   :  { %v2359_v9 = vmul.f32 %v3191_v7, %v2347_v21  ;;  %3955 = vrsqrt.f32 %v2334_v23  ;;  %v2318_v12 = vpop.xlane.xlu1 %2317 }
 0xcb7   :  { %v2328_v3 = vmul.f32 0.03125, %v2318_v12  ;;  %v2335_v30 = vadd.f32 1e-05, %v2327_v28  ;;  %v2358_v15 = vmul.f32 %v3191_v7, %v2346_v27  ;;  %v3202_v27 = vld [vmem:[#allocation3 + $0x14b] ss:$0 sm:$0xff] }
 0xcb8   :  { %v4568_v29 = vadd.f32 %v3192_v52, %v2359_v9  ;;  %v2321_v39 = vpop.xlane.xlu0 %2320 }
 0xcb9   :  { %v2336_v14 = vadd.f32 1e-05, %v2328_v3  ;;  %3957 = vrsqrt.f32 %v2335_v30  ;;  %v2329_v33 = vmul.f32 0.03125, %v2321_v39  ;;  %v4570_v5 = vadd.f32 %v3192_v52, %v2358_v15 }
 0xcba   :  { %2379 = vst.msk [vmem:[#allocation2 + $0x8] sm:$0xff] %vm176_vm1, %v4568_v29 }
 0xcbb   :  { %v3952_v34 = vpop.eup %3951  ;;  %3959 = vrsqrt.f32 %v2336_v14  ;;  %v2337_v18 = vadd.f32 1e-05, %v2329_v33  ;;  %2378 = vst.msk [vmem:[#allocation2] sm:$0xff] %vm176_vm1, %v4570_v5  ;;  %3630 = vmatprep.mubr.msk.f32.mxu1 %vm176_vm1, %v4570_v5 }
 0xcbc   :  { %3631 = vmatmul.mubr.msk.f32.vlgmr.msra.gmra.mrb[40].mxu1 %vm176_vm1, %v4568_v29  ;;  %v2348_v35 = vmul.f32 %v3952_v34, %v4536_v24 }
 0xcbd   :  { %3961 = vrsqrt.f32 %v2337_v18 }
 0xcbe   :  { %v2360_v22 = vmul.f32 %v3191_v7, %v2348_v35 }
 0xcbf   :  { %v3954_v43 = vpop.eup %3953 }
 0xcc0   :  { %v3956_v40 = vpop.eup %3955  ;;  %v4581_v45 = vadd.f32 %v3192_v52, %v2360_v22  ;;  %v2349_v41 = vmul.f32 %v3954_v43, %v4540_v2 }
 0xcc1   :  { %v2350_v46 = vmul.f32 %v3956_v40, %v4543_v19 }
 0xcc2   :  { %2380 = vst.msk [vmem:[#allocation2 + $0x10] sm:$0xff] %vm176_vm1, %v4581_v45  ;;  %3633 = vmatprep.mubr.msk.f32.mxu1 %vm176_vm1, %v4581_v45  ;;  %v2361_v44 = vmul.f32 %v3191_v7, %v2349_v41 }
 0xcc3   :  { %v3958_v31 = vpop.eup %3957  ;;  %v2362_v42 = vmul.f32 %v3191_v7, %v2350_v46 }
 0xcc4   :  { %v4589_v24 = vadd.f32 %v3192_v52, %v2361_v44  ;;  %v2351_v47 = vmul.f32 %v3958_v31, %v4549_v36 }
 0xcc5   :  { %v3960_v48 = vpop.eup %3959  ;;  %v4592_v57 = vadd.f32 %v3192_v52, %v2362_v42 }
 0xcc6   :  { %2381 = vst.msk [vmem:[#allocation2 + $0x18] sm:$0xff] %vm176_vm1, %v4589_v24  ;;  %3634 = vmatmul.mubr.msk.f32.gmra.mrb[42].mxu1 %vm176_vm1, %v4589_v24  ;;  %v2363_v2 = vmul.f32 %v3191_v7, %v2351_v47  ;;  %v2352_v19 = vmul.f32 %v3960_v48, %v4553_v13 }
 0xcc7   :  { %v3962_v58 = vpop.eup %3961  ;;  %2382 = vst.msk [vmem:[#allocation2 + $0x20] sm:$0xff] %vm176_vm1, %v4592_v57  ;;  %3636 = vmatprep.mubr.msk.f32.mxu1 %vm176_vm1, %v4592_v57 }
 0xcc8   :  { %v4603_v36 = vadd.f32 %v3192_v52, %v2363_v2  ;;  %v2364_v59 = vmul.f32 %v3191_v7, %v2352_v19  ;;  %v2353_v37 = vmul.f32 %v3962_v58, %v4557_v32  ;;  %v1519_v32 = vld [vmem:[#allocation3 + $0x138] sm:$0xff] }
 0xcc9   :  { %v3802_v61 = vpack.c.bf16 %v1520_v16, %v1519_v32 }
 0xcca   :  { %2383 = vst.msk [vmem:[#allocation2 + $0x28] sm:$0xff] %vm176_vm1, %v4603_v36  ;;  %3637 = vmatmul.mubr.msk.f32.gmra.mrb[44].mxu1 %vm176_vm1, %v4603_v36  ;;  %v4610_v38 = vadd.f32 %v3192_v52, %v2364_v59  ;;  %v2365_v13 = vmul.f32 %v3191_v7, %v2353_v37 }
 0xccb   :  { %3803 = vmatprep.subr.bf16.mxu0 %v3802_v61 }
 0xccc   :  { %2384 = vst.msk [vmem:[#allocation2 + $0x30] sm:$0xff] %vm176_vm1, %v4610_v38  ;;  %3639 = vmatprep.mubr.msk.f32.mxu1 %vm176_vm1, %v4610_v38  ;;  %v4616_v56 = vadd.f32 %v3192_v52, %v2365_v13  ;;  %3805 = vmatpush3.bf16.msra.mxu0 %v3802_v61 }
 0xcce   :  { %2385 = vst.msk [vmem:[#allocation2 + $0x38] sm:$0xff] %vm176_vm1, %v4616_v56  ;;  %3640 = vmatmul.mubr.msk.f32.gmra.mrb[46].mxu1 %vm176_vm1, %v4616_v56 }
 0xd8f   :  { %v3632_v6 = vpop.f32.mrb[40].mxu1 }
 0xd90   :  { %v2486_v8 = vadd.f32 %v3632_v6, %v3193_v60  ;;  %v2480_v63 = vpop.f32.mrb[41].mxu1 }
 0xd91   :  { %v2481_v10 = vadd.f32 %v3193_v60, %v2480_v63 }
 0xd92   :  { %v2520_v11 = vmax.f32 %v2486_v8, 0.0 }
 0xd93   :  { %v2519_v51 = vmax.f32 %v2481_v10, 0.0 }
 0xd95   :  { %3658 = vmatprep.mubr.msk.f32.mxu0 %vm1223_vm2, %v2519_v51 }
 0xd96   :  { %3659 = vmatmul.mubr.msk.f32.vlgmr.msra.gmra.mrb[48].mxu0 %vm1223_vm2, %v2520_v11 }
 0xd99   :  { %v3635_v0 = vpop.f32.mrb[42].mxu1 }
 0xd9a   :  { %v2496_v1 = vadd.f32 %v3635_v0, %v3193_v60  ;;  %v2490_v4 = vpop.f32.mrb[43].mxu1 }
 0xd9b   :  { %v2491_v53 = vadd.f32 %v3193_v60, %v2490_v4 }
 0xd9c   :  { %v2522_v17 = vmax.f32 %v2496_v1, 0.0 }
 0xd9d   :  { %v2521_v55 = vmax.f32 %v2491_v53, 0.0  ;;  %v3638_v54 = vpop.f32.mrb[44].mxu1 }
 0xd9e   :  { %v2506_v49 = vadd.f32 %v3638_v54, %v3193_v60  ;;  %v2500_v50 = vpop.f32.mrb[45].mxu1 }
 0xd9f   :  { %v2501_v26 = vadd.f32 %v3193_v60, %v2500_v50  ;;  %3661 = vmatprep.mubr.msk.f32.mxu0 %vm1223_vm2, %v2521_v55 }
 0xda0   :  { %3662 = vmatmul.mubr.msk.f32.gmra.mrb[50].mxu0 %vm1223_vm2, %v2522_v17  ;;  %v2524_v62 = vmax.f32 %v2506_v49, 0.0 }
 0xda1   :  { %v2523_v7 = vmax.f32 %v2501_v26, 0.0  ;;  %v3641_v20 = vpop.f32.mrb[46].mxu1 }
 0xda2   :  { %v2516_v21 = vadd.f32 %v3641_v20, %v3193_v60  ;;  %v2510_v23 = vpop.f32.mrb[47].mxu1 }
 0xda3   :  { %v2511_v25 = vadd.f32 %v3193_v60, %v2510_v23  ;;  %3664 = vmatprep.mubr.msk.f32.mxu0 %vm1223_vm2, %v2523_v7 }
 0xda4   :  { %3665 = vmatmul.mubr.msk.f32.gmra.mrb[52].mxu0 %vm1223_vm2, %v2524_v62  ;;  %v2526_v28 = vmax.f32 %v2516_v21, 0.0 }
 0xda5   :  { %v2525_v52 = vmax.f32 %v2511_v25, 0.0 }
 0xda7   :  { %3667 = vmatprep.mubr.msk.f32.mxu0 %vm1223_vm2, %v2525_v52 }
 0xda8   :  { %3668 = vmatmul.mubr.msk.f32.gmra.mrb[54].mxu0 %vm1223_vm2, %v2526_v28 }
 0xe69   :  { %v3660_v9 = vpop.f32.mrb[48].mxu0 }
 0xe6a   :  { %v2627_v12 = vadd.f32 %v3660_v9, %v3202_v27  ;;  %v2621_v3 = vpop.f32.mrb[49].mxu0 }
 0xe6b   :  { %v2622_v30 = vadd.f32 %v3202_v27, %v2621_v3 }
 0xe6c   :  { %v2661_v15 = vadd.f32 %v2627_v12, %v4568_v29 }
 0xe6d   :  { %v2660_v39 = vadd.f32 %v2622_v30, %v4570_v5 }
 0xe6e   :  { %v2671_v14 = vsel %vm176_vm1, %v2661_v15, 0.0 }
 0xe6f   :  { %2672 = vadd.xlane.f32.xlu0 %v2671_v14  ;;  %v2668_v33 = vsel %vm176_vm1, %v2660_v39, 0.0 }
 0xe70   :  { %2669 = vadd.xlane.f32.xlu1 %v2668_v33 }
 0xe73   :  { %v3663_v34 = vpop.f32.mrb[50].mxu0 }
 0xe74   :  { %v2637_v18 = vadd.f32 %v3663_v34, %v3202_v27  ;;  %v2631_v35 = vpop.f32.mrb[51].mxu0 }
 0xe75   :  { %v2632_v22 = vadd.f32 %v3202_v27, %v2631_v35 }
 0xe76   :  { %v2663_v43 = vadd.f32 %v2637_v18, %v4589_v24 }
 0xe77   :  { %v3666_v40 = vpop.f32.mrb[52].mxu0  ;;  %v2662_v41 = vadd.f32 %v2632_v22, %v4581_v45 }
 0xe78   :  { %v2647_v46 = vadd.f32 %v3666_v40, %v3202_v27  ;;  %v2641_v44 = vpop.f32.mrb[53].mxu0  ;;  %v2677_v29 = vsel %vm176_vm1, %v2663_v43, 0.0 }
 0xe79   :  { %v2642_v5 = vadd.f32 %v3202_v27, %v2641_v44  ;;  %2678 = vadd.xlane.f32.xlu0 %v2677_v29  ;;  %v2674_v31 = vsel %vm176_vm1, %v2662_v41, 0.0 }
 0xe7a   :  { %2675 = vadd.xlane.f32.xlu1 %v2674_v31  ;;  %v2665_v42 = vadd.f32 %v2647_v46, %v4603_v36 }
 0xe7b   :  { %v3669_v47 = vpop.f32.mrb[54].mxu0  ;;  %v2664_v48 = vadd.f32 %v2642_v5, %v4592_v57 }
 0xe7c   :  { %v2657_v2 = vadd.f32 %v3669_v47, %v3202_v27  ;;  %v2651_v19 = vpop.f32.mrb[55].mxu0  ;;  %v2683_v24 = vsel %vm176_vm1, %v2665_v42, 0.0 }
 0xe7d   :  { %v2652_v58 = vadd.f32 %v3202_v27, %v2651_v19  ;;  %2684 = vadd.xlane.f32.xlu0 %v2683_v24  ;;  %v2680_v45 = vsel %vm176_vm1, %v2664_v48, 0.0 }
 0xe7e   :  { %2681 = vadd.xlane.f32.xlu1 %v2680_v45  ;;  %v2667_v59 = vadd.f32 %v2657_v2, %v4616_v56 }
 0xe7f   :  { %v2666_v37 = vadd.f32 %v2652_v58, %v4610_v38 }
 0xe80   :  { %v2689_v13 = vsel %vm176_vm1, %v2667_v59, 0.0 }
 0xe81   :  { %2690 = vadd.xlane.f32.xlu0 %v2689_v13  ;;  %v2686_v36 = vsel %vm176_vm1, %v2666_v37, 0.0 }
 0xe82   :  { %2687 = vadd.xlane.f32.xlu1 %v2686_v36 }
 0xefc   :  { %v2673_v57 = vpop.xlane.xlu0 %2672 }
 0xefd   :  { %v2693_v32 = vmul.f32 0.03125, %v2673_v57  ;;  %v2670_v16 = vpop.xlane.xlu1 %2669 }
 0xefe   :  { %v2692_v61 = vmul.f32 0.03125, %v2670_v16 }
 0xeff   :  { %v4646_v60 = vsub.f32 %v2661_v15, %v2693_v32 }
 0xf00   :  { %v4648_v6 = vsub.f32 %v2660_v39, %v2692_v61 }
 0xf01   :  { %v2709_v8 = vmul.f32 %v4646_v60, %v4646_v60 }
 0xf02   :  { %v2708_v38 = vmul.f32 %v4648_v6, %v4648_v6 }
 0xf03   :  { %v2719_v56 = vsel %vm176_vm1, %v2709_v8, 0.0 }
 0xf04   :  { %2720 = vadd.xlane.f32.xlu0 %v2719_v56  ;;  %v2716_v63 = vsel %vm176_vm1, %v2708_v38, 0.0 }
 0xf05   :  { %2717 = vadd.xlane.f32.xlu1 %v2716_v63 }
 0xf06   :  { %v2679_v10 = vpop.xlane.xlu0 %2678 }
 0xf07   :  { %v2695_v51 = vmul.f32 0.03125, %v2679_v10  ;;  %v2676_v11 = vpop.xlane.xlu1 %2675 }
 0xf08   :  { %v2694_v0 = vmul.f32 0.03125, %v2676_v11 }
 0xf09   :  { %v4656_v1 = vsub.f32 %v2663_v43, %v2695_v51 }
 0xf0a   :  { %v4658_v4 = vsub.f32 %v2662_v41, %v2694_v0  ;;  %v2685_v53 = vpop.xlane.xlu0 %2684 }
 0xf0b   :  { %v2697_v55 = vmul.f32 0.03125, %v2685_v53  ;;  %v2682_v54 = vpop.xlane.xlu1 %2681  ;;  %v2711_v17 = vmul.f32 %v4656_v1, %v4656_v1 }
 0xf0c   :  { %v2696_v49 = vmul.f32 0.03125, %v2682_v54  ;;  %v2710_v50 = vmul.f32 %v4658_v4, %v4658_v4 }
 0xf0d   :  { %v4664_v26 = vsub.f32 %v2665_v42, %v2697_v55  ;;  %v2725_v7 = vsel %vm176_vm1, %v2711_v17, 0.0 }
 0xf0e   :  { %v4667_v20 = vsub.f32 %v2664_v48, %v2696_v49  ;;  %2726 = vadd.xlane.f32.xlu0 %v2725_v7  ;;  %v2691_v62 = vpop.xlane.xlu0 %2690  ;;  %v2722_v21 = vsel %vm176_vm1, %v2710_v50, 0.0  ;;  %v3211_v48 = vld [vmem:[#allocation3 + $0x14e] ss:$0 sm:$0xff] }
 0xf0f   :  { %v2699_v23 = vmul.f32 0.03125, %v2691_v62  ;;  %2723 = vadd.xlane.f32.xlu1 %v2722_v21  ;;  %v2688_v25 = vpop.xlane.xlu1 %2687  ;;  %v2713_v52 = vmul.f32 %v4664_v26, %v4664_v26 }
 0xf10   :  { %v2698_v28 = vmul.f32 0.03125, %v2688_v25  ;;  %v2712_v27 = vmul.f32 %v4667_v20, %v4667_v20 }
 0xf11   :  { %v4674_v9 = vsub.f32 %v2667_v59, %v2699_v23  ;;  %v2731_v12 = vsel %vm176_vm1, %v2713_v52, 0.0  ;;  %v3212_v59 = vld [vmem:[#allocation3 + $0x14f] ss:$0 sm:$0xff] }
 0xf12   :  { %v4677_v3 = vsub.f32 %v2666_v37, %v2698_v28  ;;  %2732 = vadd.xlane.f32.xlu0 %v2731_v12  ;;  %v2728_v30 = vsel %vm176_vm1, %v2712_v27, 0.0 }
 0xf13   :  { %2729 = vadd.xlane.f32.xlu1 %v2728_v30  ;;  %v2715_v15 = vmul.f32 %v4674_v9, %v4674_v9 }
 0xf14   :  { %v2714_v39 = vmul.f32 %v4677_v3, %v4677_v3 }
 0xf15   :  { %v2737_v14 = vsel %vm176_vm1, %v2715_v15, 0.0 }
 0xf16   :  { %2738 = vadd.xlane.f32.xlu0 %v2737_v14  ;;  %v2734_v33 = vsel %vm176_vm1, %v2714_v39, 0.0 }
 0xf17   :  { %2735 = vadd.xlane.f32.xlu1 %v2734_v33 }
 0xf91   :  { %v2721_v34 = vpop.xlane.xlu0 %2720 }
 0xf92   :  { %v2741_v18 = vmul.f32 0.03125, %v2721_v34  ;;  %v2718_v35 = vpop.xlane.xlu1 %2717 }
 0xf93   :  { %v2740_v22 = vmul.f32 0.03125, %v2718_v35 }
 0xf94   :  { %v2749_v43 = vadd.f32 1e-05, %v2741_v18 }
 0xf95   :  { %v2748_v40 = vadd.f32 1e-05, %v2740_v22 }
 0xf96   :  { %3963 = vrsqrt.f32 %v2749_v43 }
 0xf97   :  { %3965 = vrsqrt.f32 %v2748_v40 }
 0xf9b   :  { %v2727_v41 = vpop.xlane.xlu0 %2726 }
 0xf9c   :  { %v2743_v46 = vmul.f32 0.03125, %v2727_v41  ;;  %v2724_v44 = vpop.xlane.xlu1 %2723 }
 0xf9d   :  { %v2742_v29 = vmul.f32 0.03125, %v2724_v44 }
 0xf9e   :  { %v2751_v5 = vadd.f32 1e-05, %v2743_v46 }
 0xf9f   :  { %v2750_v31 = vadd.f32 1e-05, %v2742_v29  ;;  %v2733_v42 = vpop.xlane.xlu0 %2732 }
 0xfa0   :  { %v3964_v47 = vpop.eup %3963  ;;  %3967 = vrsqrt.f32 %v2751_v5  ;;  %v2745_v2 = vmul.f32 0.03125, %v2733_v42  ;;  %v2730_v19 = vpop.xlane.xlu1 %2729 }
 0xfa1   :  { %v3966_v24 = vpop.eup %3965  ;;  %v2765_v58 = vmul.f32 %v3964_v47, %v4646_v60  ;;  %3969 = vrsqrt.f32 %v2750_v31  ;;  %v2744_v45 = vmul.f32 0.03125, %v2730_v19 }
 0xfa2   :  { %v2764_v37 = vmul.f32 %v3966_v24, %v4648_v6  ;;  %v2753_v13 = vadd.f32 1e-05, %v2745_v2 }
 0xfa3   :  { %v2777_v36 = vmul.f32 %v3211_v48, %v2765_v58  ;;  %v2752_v57 = vadd.f32 1e-05, %v2744_v45  ;;  %v2739_v32 = vpop.xlane.xlu0 %2738 }
 0xfa4   :  { %v2776_v16 = vmul.f32 %v3211_v48, %v2764_v37  ;;  %3971 = vrsqrt.f32 %v2753_v13  ;;  %v2747_v61 = vmul.f32 0.03125, %v2739_v32  ;;  %v2736_v8 = vpop.xlane.xlu1 %2735 }
 0xfa5   :  { %v2789_v38 = vadd.f32 %v3212_v59, %v2777_v36  ;;  %3973 = vrsqrt.f32 %v2752_v57  ;;  %v2746_v56 = vmul.f32 0.03125, %v2736_v8 }
 0xfa6   :  { %v2788_v63 = vadd.f32 %v3212_v59, %v2776_v16  ;;  %v2755_v10 = vadd.f32 1e-05, %v2747_v61 }
 0xfa7   :  { %2797 = vst.msk [vmem:[#allocation2 + $0x8] sm:$0xff] %vm176_vm1, %v2789_v38  ;;  %v2754_v60 = vadd.f32 1e-05, %v2746_v56 }
 0xfa8   :  { %2796 = vst.msk [vmem:[#allocation2] sm:$0xff] %vm176_vm1, %v2788_v63  ;;  %3975 = vrsqrt.f32 %v2755_v10 }
 0xfa9   :  { %3977 = vrsqrt.f32 %v2754_v60 }
 0xfaa   :  { %v3968_v6 = vpop.eup %3967 }
 0xfab   :  { %v3970_v51 = vpop.eup %3969  ;;  %v2767_v11 = vmul.f32 %v3968_v6, %v4656_v1 }
 0xfac   :  { %v2766_v0 = vmul.f32 %v3970_v51, %v4658_v4 }
 0xfad   :  { %v2779_v53 = vmul.f32 %v3211_v48, %v2767_v11 }
 0xfae   :  { %v3972_v55 = vpop.eup %3971  ;;  %v2778_v54 = vmul.f32 %v3211_v48, %v2766_v0  ;;  %v2812_v17 = vld [vmem:[#allocation2 + $0x8] sm:$0xff] }
 0xfaf   :  { %v3974_v49 = vpop.eup %3973  ;;  %v2791_v50 = vadd.f32 %v3212_v59, %v2779_v53  ;;  %v2769_v7 = vmul.f32 %v3972_v55, %v4664_v26  ;;  %v2822_v62 = vsel %vm176_vm1, %v2812_v17, 0.0  ;;  %v2811_v21 = vld [vmem:[#allocation2] sm:$0xff] }
 0xfb0   :  { %v2790_v23 = vadd.f32 %v3212_v59, %v2778_v54  ;;  %v2768_v25 = vmul.f32 %v3974_v49, %v4667_v20  ;;  %2823 = vadd.xlane.f32.xlu0 %v2822_v62  ;;  %v2819_v52 = vsel %vm176_vm1, %v2811_v21, 0.0 }
 0xfb1   :  { %2799 = vst.msk [vmem:[#allocation2 + $0x18] sm:$0xff] %vm176_vm1, %v2791_v50  ;;  %v2781_v1 = vmul.f32 %v3211_v48, %v2769_v7  ;;  %2820 = vadd.xlane.f32.xlu1 %v2819_v52 }
 0xfb2   :  { %v3976_v4 = vpop.eup %3975  ;;  %2798 = vst.msk [vmem:[#allocation2 + $0x10] sm:$0xff] %vm176_vm1, %v2790_v23  ;;  %v2780_v28 = vmul.f32 %v3211_v48, %v2768_v25 }
 0xfb3   :  { %v3978_v27 = vpop.eup %3977  ;;  %v2793_v12 = vadd.f32 %v3212_v59, %v2781_v1  ;;  %v2771_v26 = vmul.f32 %v3976_v4, %v4674_v9  ;;  %v2806_v1 = vld [vmem:[%s4820_s1 + $0xa0] sm:$0xff]  ;;  %v2807_v4 = vld [vmem:[%s4820_s1 + $0xa8] sm:$0xff] }
 0xfb4   :  { %v2792_v30 = vadd.f32 %v3212_v59, %v2780_v28  ;;  %v2770_v15 = vmul.f32 %v3978_v27, %v4677_v3  ;;  %v3806_v28 = vpack.c.bf16 %v2807_v4, %v2806_v1  ;;  %v2808_v27 = vld [vmem:[%s4820_s1 + $0xb0] sm:$0xff] }
 0xfb5   :  { %2801 = vst.msk [vmem:[#allocation2 + $0x28] sm:$0xff] %vm176_vm1, %v2793_v12  ;;  %v2783_v20 = vmul.f32 %v3211_v48, %v2771_v26  ;;  %v2809_v12 = vld [vmem:[%s4820_s1 + $0xb8] sm:$0xff] }
 0xfb6   :  { %2800 = vst.msk [vmem:[#allocation2 + $0x20] sm:$0xff] %vm176_vm1, %v2792_v30  ;;  %v2782_v39 = vmul.f32 %v3211_v48, %v2770_v15  ;;  %3807 = vmatprep.subr.bf16.mxu1 %v3806_v28  ;;  %v3810_v26 = vpack.c.bf16 %v2809_v12, %v2808_v27 }
 0xfb7   :  { %v2795_v14 = vadd.f32 %v3212_v59, %v2783_v20  ;;  %3809 = vmatpush3.bf16.msra.mxu1 %v3806_v28 }
 0xfb8   :  { %v2794_v33 = vadd.f32 %v3212_v59, %v2782_v39  ;;  %v2814_v34 = vld [vmem:[#allocation2 + $0x18] sm:$0xff]  ;;  %3811 = vmatprep.subr.bf16.mxu1 %v3810_v26 }
 0xfb9   :  { %2803 = vst.msk [vmem:[#allocation2 + $0x38] sm:$0xff] %vm176_vm1, %v2795_v14  ;;  %v2828_v18 = vsel %vm176_vm1, %v2814_v34, 0.0  ;;  %v2813_v35 = vld [vmem:[#allocation2 + $0x10] sm:$0xff] }
 0xfba   :  { %2802 = vst.msk [vmem:[#allocation2 + $0x30] sm:$0xff] %vm176_vm1, %v2794_v33  ;;  %2829 = vadd.xlane.f32.xlu0 %v2828_v18  ;;  %v2825_v9 = vsel %vm176_vm1, %v2813_v35, 0.0 }
 0xfbb   :  { %2826 = vadd.xlane.f32.xlu1 %v2825_v9  ;;  %3813 = vmatpush3.bf16.msra.mxu1 %v3810_v26 }
 0xfbc   :  { %v2816_v3 = vld [vmem:[#allocation2 + $0x28] sm:$0xff] }
 0xfbd   :  { %v2834_v22 = vsel %vm176_vm1, %v2816_v3, 0.0  ;;  %v2815_v43 = vld [vmem:[#allocation2 + $0x20] sm:$0xff] }
 0xfbe   :  { %2835 = vadd.xlane.f32.xlu0 %v2834_v22  ;;  %v2831_v40 = vsel %vm176_vm1, %v2815_v43, 0.0 }
 0xfbf   :  { %2832 = vadd.xlane.f32.xlu1 %v2831_v40 }
 0xfc0   :  { %v2818_v41 = vld [vmem:[#allocation2 + $0x38] sm:$0xff] }
 0xfc1   :  { %v2840_v46 = vsel %vm176_vm1, %v2818_v41, 0.0  ;;  %v2817_v44 = vld [vmem:[#allocation2 + $0x30] sm:$0xff] }
 0xfc2   :  { %2841 = vadd.xlane.f32.xlu0 %v2840_v46  ;;  %v2837_v29 = vsel %vm176_vm1, %v2817_v44, 0.0 }
 0xfc3   :  { %2838 = vadd.xlane.f32.xlu1 %v2837_v29 }
0x103d   :  { %v2824_v5 = vpop.xlane.xlu0 %2823 }
0x103e   :  { %v2844_v31 = vmul.f32 0.03125, %v2824_v5  ;;  %v2821_v42 = vpop.xlane.xlu1 %2820 }
0x103f   :  { %v2843_v47 = vmul.f32 0.03125, %v2821_v42 }
0x1040   :  { %v4710_v48 = vsub.f32 %v2812_v17, %v2844_v31 }
0x1041   :  { %v4712_v2 = vsub.f32 %v2811_v21, %v2843_v47 }
0x1042   :  { %v2860_v19 = vmul.f32 %v4710_v48, %v4710_v48 }
0x1043   :  { %v2859_v24 = vmul.f32 %v4712_v2, %v4712_v2 }
0x1044   :  { %v2870_v58 = vsel %vm176_vm1, %v2860_v19, 0.0  ;;  %v3214_v19 = vld [vmem:[%s4820_s1 + $0xc1] ss:$0 sm:$0xff] }
0x1045   :  { %2871 = vadd.xlane.f32.xlu0 %v2870_v58  ;;  %v2867_v45 = vsel %vm176_vm1, %v2859_v24, 0.0 }
0x1046   :  { %2868 = vadd.xlane.f32.xlu1 %v2867_v45 }
0x1047   :  { %v2830_v59 = vpop.xlane.xlu0 %2829 }
0x1048   :  { %v2846_v37 = vmul.f32 0.03125, %v2830_v59  ;;  %v2827_v13 = vpop.xlane.xlu1 %2826 }
0x1049   :  { %v2845_v36 = vmul.f32 0.03125, %v2827_v13 }
0x104a   :  { %v4720_v57 = vsub.f32 %v2814_v34, %v2846_v37 }
0x104b   :  { %v4722_v32 = vsub.f32 %v2813_v35, %v2845_v36  ;;  %v2836_v16 = vpop.xlane.xlu0 %2835 }
0x104c   :  { %v2848_v61 = vmul.f32 0.03125, %v2836_v16  ;;  %v2833_v8 = vpop.xlane.xlu1 %2832  ;;  %v2862_v38 = vmul.f32 %v4720_v57, %v4720_v57 }
0x104d   :  { %v2847_v56 = vmul.f32 0.03125, %v2833_v8  ;;  %v2861_v63 = vmul.f32 %v4722_v32, %v4722_v32 }
0x104e   :  { %v4728_v10 = vsub.f32 %v2816_v3, %v2848_v61  ;;  %v2876_v60 = vsel %vm176_vm1, %v2862_v38, 0.0 }
0x104f   :  { %v4731_v6 = vsub.f32 %v2815_v43, %v2847_v56  ;;  %2877 = vadd.xlane.f32.xlu0 %v2876_v60  ;;  %v2842_v51 = vpop.xlane.xlu0 %2841  ;;  %v2873_v11 = vsel %vm176_vm1, %v2861_v63, 0.0 }
0x1050   :  { %v2850_v0 = vmul.f32 0.03125, %v2842_v51  ;;  %2874 = vadd.xlane.f32.xlu1 %v2873_v11  ;;  %v2839_v53 = vpop.xlane.xlu1 %2838  ;;  %v2864_v55 = vmul.f32 %v4728_v10, %v4728_v10 }
0x1051   :  { %v2849_v54 = vmul.f32 0.03125, %v2839_v53  ;;  %v2863_v17 = vmul.f32 %v4731_v6, %v4731_v6 }
0x1052   :  { %v4738_v49 = vsub.f32 %v2818_v41, %v2850_v0  ;;  %v2882_v50 = vsel %vm176_vm1, %v2864_v55, 0.0  ;;  %v3213_v41 = vld [vmem:[%s4820_s1 + $0xc0] ss:$0 sm:$0xff] }
0x1053   :  { %v4741_v7 = vsub.f32 %v2817_v44, %v2849_v54  ;;  %2883 = vadd.xlane.f32.xlu0 %v2882_v50  ;;  %v2879_v62 = vsel %vm176_vm1, %v2863_v17, 0.0 }
0x1054   :  { %2880 = vadd.xlane.f32.xlu1 %v2879_v62  ;;  %v2866_v21 = vmul.f32 %v4738_v49, %v4738_v49 }
0x1055   :  { %v2865_v23 = vmul.f32 %v4741_v7, %v4741_v7 }
0x1056   :  { %v2888_v25 = vsel %vm176_vm1, %v2866_v21, 0.0 }
0x1057   :  { %2889 = vadd.xlane.f32.xlu0 %v2888_v25  ;;  %v2885_v52 = vsel %vm176_vm1, %v2865_v23, 0.0 }
0x1058   :  { %2886 = vadd.xlane.f32.xlu1 %v2885_v52 }
0x10d2   :  { %v2872_v30 = vpop.xlane.xlu0 %2871 }
0x10d3   :  { %v2892_v15 = vmul.f32 0.03125, %v2872_v30  ;;  %v2869_v20 = vpop.xlane.xlu1 %2868 }
0x10d4   :  { %v2891_v39 = vmul.f32 0.03125, %v2869_v20 }
0x10d5   :  { %v2900_v14 = vadd.f32 1e-05, %v2892_v15 }
0x10d6   :  { %v2899_v33 = vadd.f32 1e-05, %v2891_v39 }
0x10d7   :  { %3979 = vrsqrt.f32 %v2900_v14 }
0x10d8   :  { %3981 = vrsqrt.f32 %v2899_v33 }
0x10dc   :  { %v2878_v34 = vpop.xlane.xlu0 %2877 }
0x10dd   :  { %v2894_v18 = vmul.f32 0.03125, %v2878_v34  ;;  %v2875_v35 = vpop.xlane.xlu1 %2874 }
0x10de   :  { %v2893_v9 = vmul.f32 0.03125, %v2875_v35 }
0x10df   :  { %v2902_v3 = vadd.f32 1e-05, %v2894_v18 }
0x10e0   :  { %v2901_v22 = vadd.f32 1e-05, %v2893_v9  ;;  %v2884_v43 = vpop.xlane.xlu0 %2883 }
0x10e1   :  { %v3980_v40 = vpop.eup %3979  ;;  %3983 = vrsqrt.f32 %v2902_v3  ;;  %v2896_v46 = vmul.f32 0.03125, %v2884_v43  ;;  %v2881_v44 = vpop.xlane.xlu1 %2880 }
0x10e2   :  { %v3982_v29 = vpop.eup %3981  ;;  %v2916_v5 = vmul.f32 %v3980_v40, %v4710_v48  ;;  %3985 = vrsqrt.f32 %v2901_v22  ;;  %v2895_v31 = vmul.f32 0.03125, %v2881_v44 }
0x10e3   :  { %v2904_v42 = vadd.f32 1e-05, %v2896_v46  ;;  %v2915_v47 = vmul.f32 %v3982_v29, %v4712_v2 }
0x10e4   :  { %v2928_v24 = vmul.f32 %v3213_v41, %v2916_v5  ;;  %v2903_v58 = vadd.f32 1e-05, %v2895_v31  ;;  %v2890_v45 = vpop.xlane.xlu0 %2889 }
0x10e5   :  { %3987 = vrsqrt.f32 %v2904_v42  ;;  %v2898_v59 = vmul.f32 0.03125, %v2890_v45  ;;  %v2887_v37 = vpop.xlane.xlu1 %2886  ;;  %v2927_v13 = vmul.f32 %v3213_v41, %v2915_v47 }
0x10e6   :  { %3989 = vrsqrt.f32 %v2903_v58  ;;  %v2897_v36 = vmul.f32 0.03125, %v2887_v37  ;;  %v2940_v61 = vadd.f32 %v3214_v19, %v2928_v24 }
0x10e7   :  { %v2906_v16 = vadd.f32 1e-05, %v2898_v59  ;;  %v2939_v48 = vadd.f32 %v3214_v19, %v2927_v13 }
0x10e8   :  { %v2905_v8 = vadd.f32 1e-05, %v2897_v36 }
0x10e9   :  { %3991 = vrsqrt.f32 %v2906_v16  ;;  %3678 = vmatprep.mubr.msk.f32.mxu1 %vm176_vm1, %v2939_v48 }
0x10ea   :  { %3993 = vrsqrt.f32 %v2905_v8  ;;  %3679 = vmatmul.mubr.msk.f32.vlgmr.msra.gmra.mrb[48].mxu1 %vm176_vm1, %v2940_v61 }
0x10eb   :  { %v3984_v2 = vpop.eup %3983 }
0x10ec   :  { %v3986_v38 = vpop.eup %3985  ;;  %v2918_v56 = vmul.f32 %v3984_v2, %v4720_v57 }
0x10ed   :  { %v2917_v63 = vmul.f32 %v3986_v38, %v4722_v32 }
0x10ee   :  { %v2930_v60 = vmul.f32 %v3213_v41, %v2918_v56 }
0x10ef   :  { %v3988_v51 = vpop.eup %3987  ;;  %v2929_v11 = vmul.f32 %v3213_v41, %v2917_v63 }
0x10f0   :  { %v3990_v0 = vpop.eup %3989  ;;  %v2920_v53 = vmul.f32 %v3988_v51, %v4728_v10  ;;  %v2942_v17 = vadd.f32 %v3214_v19, %v2930_v60 }
0x10f1   :  { %v2941_v55 = vadd.f32 %v3214_v19, %v2929_v11  ;;  %v2919_v54 = vmul.f32 %v3990_v0, %v4731_v6 }
0x10f2   :  { %v2932_v50 = vmul.f32 %v3213_v41, %v2920_v53 }
0x10f3   :  { %v3992_v62 = vpop.eup %3991  ;;  %3681 = vmatprep.mubr.msk.f32.mxu1 %vm176_vm1, %v2941_v55  ;;  %v2931_v21 = vmul.f32 %v3213_v41, %v2919_v54 }
0x10f4   :  { %v3994_v23 = vpop.eup %3993  ;;  %3682 = vmatmul.mubr.msk.f32.gmra.mrb[50].mxu1 %vm176_vm1, %v2942_v17  ;;  %v2922_v57 = vmul.f32 %v3992_v62, %v4738_v49  ;;  %v2944_v52 = vadd.f32 %v3214_v19, %v2932_v50  ;;  %v3215_v49 = vld [vmem:[%s4820_s1 + $0xc2] ss:$0 sm:$0xff] }
0x10f5   :  { %v2943_v32 = vadd.f32 %v3214_v19, %v2931_v21  ;;  %v2921_v25 = vmul.f32 %v3994_v23, %v4741_v7 }
0x10f6   :  { %v2934_v1 = vmul.f32 %v3213_v41, %v2922_v57 }
0x10f7   :  { %3684 = vmatprep.mubr.msk.f32.mxu1 %vm176_vm1, %v2943_v32  ;;  %v2933_v10 = vmul.f32 %v3213_v41, %v2921_v25 }
0x10f8   :  { %3685 = vmatmul.mubr.msk.f32.gmra.mrb[52].mxu1 %vm176_vm1, %v2944_v52  ;;  %v2946_v4 = vadd.f32 %v3214_v19, %v2934_v1 }
0x10f9   :  { %v2945_v6 = vadd.f32 %v3214_v19, %v2933_v10 }
0x10fb   :  { %3687 = vmatprep.mubr.msk.f32.mxu1 %vm176_vm1, %v2945_v6 }
0x10fc   :  { %3688 = vmatmul.mubr.msk.f32.gmra.mrb[54].mxu1 %vm176_vm1, %v2946_v4 }
0x11bd   :  { %v3680_v28 = vpop.f32.mrb[48].mxu1 }
0x11be   :  { %v3047_v27 = vadd.f32 %v3680_v28, %v3215_v49  ;;  %v3041_v7 = vpop.f32.mrb[49].mxu1 }
0x11bf   :  { %v3042_v12 = vadd.f32 %v3215_v49, %v3041_v7 }
0x11c0   :  { %3081 = vst.msk [vmem:[%s4822_s3 + $0x8] sm:$0xff] %vm46_vm0, %v3047_v27 }
0x11c1   :  { %3080 = vst.msk [vmem:[%s4822_s3] sm:$0xff] %vm46_vm0, %v3042_v12 }
0x11c7   :  { %v3683_v26 = vpop.f32.mrb[50].mxu1 }
0x11c8   :  { %v3057_v30 = vadd.f32 %v3683_v26, %v3215_v49  ;;  %v3051_v15 = vpop.f32.mrb[51].mxu1 }
0x11c9   :  { %v3052_v20 = vadd.f32 %v3215_v49, %v3051_v15 }
0x11ca   :  { %3083 = vst.msk [vmem:[%s4822_s3 + $0x18] sm:$0xff] %vm46_vm0, %v3057_v30 }
0x11cb   :  { %3082 = vst.msk [vmem:[%s4822_s3 + $0x10] sm:$0xff] %vm46_vm0, %v3052_v20  ;;  %v3686_v39 = vpop.f32.mrb[52].mxu1 }
0x11cc   :  { %v3067_v14 = vadd.f32 %v3686_v39, %v3215_v49  ;;  %v3061_v33 = vpop.f32.mrb[53].mxu1 }
0x11cd   :  { %v3062_v34 = vadd.f32 %v3215_v49, %v3061_v33 }
0x11ce   :  { %3085 = vst.msk [vmem:[%s4822_s3 + $0x28] sm:$0xff] %vm46_vm0, %v3067_v14 }
0x11cf   :  { %3084 = vst.msk [vmem:[%s4822_s3 + $0x20] sm:$0xff] %vm46_vm0, %v3062_v34  ;;  %v3689_v18 = vpop.f32.mrb[54].mxu1 }
0x11d0   :  { %v3077_v35 = vadd.f32 %v3689_v18, %v3215_v49  ;;  %v3071_v9 = vpop.f32.mrb[55].mxu1 }
0x11d1   :  { %v3072_v3 = vadd.f32 %v3215_v49, %v3071_v9 }
0x11d2   :  { %3087 = vst.msk [vmem:[%s4822_s3 + $0x38] sm:$0xff] %vm46_vm0, %v3077_v35 }
0x11d3   :  { %3086 = vst.msk [vmem:[%s4822_s3 + $0x30] sm:$0xff] %vm46_vm0, %v3072_v3 }
0x11d4   :  { %3092 = vsyncpa [#allocation4], 1 }

</bundles_post_ra>
